<compile_context>
chip_gen: v5e
topology: v5e:2x2
jax: 0.10.0
libtpu: 0.0.40
codegen_flags: <defaults>
</compile_context>

<pallas_src>
import functools

import jax
import jax.numpy as jnp
from jax.experimental import pallas as pl
from jax.experimental.pallas import tpu as pltpu


def _round_up(x, m):
    return ((x + m - 1) // m) * m


# ----------------------------------------------------------------------------
# Pallas kernel: direct conv for one (batch image, output-row tile).
#   x_ref : (1, Hp, Wp, Cp)        bf16  (whole padded image, resident per n)
#   w_ref : (kh*kw, Cp, Op)        bf16  (resident for the whole kernel)
#   b_ref : (1, Op)                f32
#   o_ref : (1, TOH, OW, Op)       f32
# ----------------------------------------------------------------------------
def _sn_conv_kernel(x_ref, w_ref, b_ref, o_ref, *, kh, kw, sh, sw, toh, ow, o_pad):
    r = pl.program_id(1)
    row0 = r * (toh * sh)  # first padded-input row for this output-row tile

    acc = jnp.zeros((toh * ow, o_pad), jnp.float32)
    for i in range(kh):          # static loops -> fully unrolled tap matmuls
        for j in range(kw):
            if sh == 1 and sw == 1:
                patch = x_ref[0, pl.ds(row0 + i, toh), pl.ds(j, ow), :]
            else:
                # General stride: contiguous load then static strided slice.
                patch = x_ref[0,
                              pl.ds(row0 + i, (toh - 1) * sh + 1),
                              pl.ds(j, (ow - 1) * sw + 1), :]
                patch = patch[::sh, ::sw, :]
            lhs = patch.reshape(toh * ow, patch.shape[-1])           # bf16
            acc = acc + jnp.dot(lhs, w_ref[i * kw + j],
                                preferred_element_type=jnp.float32)  # MXU
    acc = acc + b_ref[...]                                           # (1,Op) bcast
    o_ref[...] = acc.reshape(1, toh, ow, o_pad)


# ----------------------------------------------------------------------------
# Spectral normalization (parameter setup, matches torch.nn.utils.spectral_norm
# training-mode forward with n_power_iterations=1).
# ----------------------------------------------------------------------------
def _l2normalize(v, eps):
    return v / jnp.maximum(jnp.linalg.norm(v), eps)


def spectral_normalize_weight(weight, u, *, eps=1e-12, n_power_iterations=1):
    """weight: [O, I, kh, kw]; u: [O]. Returns (weight / sigma, u_new, v_new)."""
    O = weight.shape[0]
    w_mat = weight.reshape(O, -1)  # [O, K]
    v = None
    for _ in range(n_power_iterations):
        v = _l2normalize(w_mat.T @ u, eps)   # [K]
        u = _l2normalize(w_mat @ v, eps)     # [O]
    sigma = u @ (w_mat @ v)
    return weight / sigma, u, v


# ----------------------------------------------------------------------------
# SN_Conv2d forward.
# Returns (out_NCHW, u_new) — PyTorch's spectral_norm updates the `u` buffer
# in place during the forward pass; thread u_new to stay in sync.
# ----------------------------------------------------------------------------
def sn_conv2d_forward(x, weight, bias, u, *, stride=(1, 1), padding=(1, 1),
                      eps=1e-12):
    N, C, H, W = x.shape
    O, Cw, kh, kw = weight.shape
    assert C == Cw
    sh, sw = stride
    ph, pw = padding
    OH = (H + 2 * ph - kh) // sh + 1
    OW = (W + 2 * pw - kw) // sw + 1

    # --- spectral norm (tiny matvec chain; parameter setup in plain JAX) ---
    w_sn, u_new, _ = spectral_normalize_weight(weight, u, eps=eps)

    # --- padded / lane-friendly shapes ---
    C_pad = _round_up(C, 8)      # clean MXU contraction operand
    O_pad = _round_up(O, 128)    # lane-dense output stores

    # Output-row tile: ~512 output pixels per grid step.
    toh = max(1, min(OH, max(1, 512 // max(OW, 1))))
    R = pl.cdiv(OH, toh)
    OH_pad = R * toh

    # NHWC + spatial zero padding (+ extra rows so the padded OH tail stays
    # in bounds) + channel zero padding, cast to bf16 for the MXU.
    x_nhwc = jnp.transpose(x, (0, 2, 3, 1)).astype(jnp.bfloat16)
    Hp = H + 2 * ph
    Wp = W + 2 * pw
    extra_h = max(0, (OH_pad - 1) * sh + kh - Hp)
    Hp_tot = Hp + extra_h
    x_p = jnp.pad(x_nhwc,
                  ((0, 0), (ph, ph + extra_h), (pw, pw), (0, C_pad - C)))

    # Weight taps: [kh*kw, C_pad, O_pad], w_taps[i*kw+j, c, o] = w_sn[o, c, i, j].
    w_taps = jnp.transpose(w_sn, (2, 3, 1, 0)).reshape(kh * kw, C, O)
    w_taps = jnp.pad(w_taps,
                     ((0, 0), (0, C_pad - C), (0, O_pad - O))).astype(jnp.bfloat16)

    b_pad = jnp.pad(bias.astype(jnp.float32), (0, O_pad - O)).reshape(1, O_pad)

    kernel = functools.partial(_sn_conv_kernel, kh=kh, kw=kw, sh=sh, sw=sw,
                               toh=toh, ow=OW, o_pad=O_pad)

    out = pl.pallas_call(
        kernel,
        out_shape=jax.ShapeDtypeStruct((N, OH_pad, OW, O_pad), jnp.float32),
        grid_spec=pltpu.PrefetchScalarGridSpec(
            num_scalar_prefetch=0,
            grid=(N, R),
            in_specs=[
                # Whole padded image; re-DMA'd only when the batch index changes.
                pl.BlockSpec((1, Hp_tot, Wp, C_pad), lambda n, r: (n, 0, 0, 0)),
                # Full weight + bias resident for the entire kernel.
                pl.BlockSpec((kh * kw, C_pad, O_pad), lambda n, r: (0, 0, 0)),
                pl.BlockSpec((1, O_pad), lambda n, r: (0, 0)),
            ],
            out_specs=pl.BlockSpec((1, toh, OW, O_pad),
                                   lambda n, r: (n, r, 0, 0)),
        ),
        compiler_params=pltpu.CompilerParams(
            dimension_semantics=("parallel", "parallel"),
            vmem_limit_bytes=48 * 1024 * 1024,
        ),
    )(x_p, w_taps, b_pad)

    # Drop row / out-channel padding; back to NCHW to match the PyTorch module.
    out = out[:, :OH, :, :O]
    out = jnp.transpose(out, (0, 3, 1, 2))
    return out, u_new


# ----------------------------------------------------------------------------
# Example / smoke test
# ----------------------------------------------------------------------------
if __name__ == "__main__":
    key = jax.random.PRNGKey(0)
    k_x, k_w, k_b, k_u = jax.random.split(key, 4)

    # Module config (kwargs of nn.Conv2d inside SN_Conv2d):
    #   in_channels=4, out_channels=8, kernel_size=3, stride=1, padding=1, bias=True
    N, C, H, W = 2, 4, 16, 16
    O, kh, kw = 8, 3, 3
    stride, padding = (1, 1), (1, 1)

    x = jax.random.normal(k_x, (N, C, H, W), dtype=jnp.float32)
    weight = jax.random.normal(k_w, (O, C, kh, kw), dtype=jnp.float32) * 0.1
    bias = jax.random.normal(k_b, (O,), dtype=jnp.float32) * 0.1
    # spectral_norm's `u` buffer: random normal, L2-normalized (as PyTorch does)
    u0 = jax.random.normal(k_u, (O,), dtype=jnp.float32)
    u0 = u0 / jnp.maximum(jnp.linalg.norm(u0), 1e-12)

    out, u_new = sn_conv2d_forward(x, weight, bias, u0,
                                   stride=stride, padding=padding)
    out = jax.block_until_ready(out)
    assert out.shape == (N, O, H, W), out.shape

    # Cross-check against XLA's conv with the same bf16 operand rounding and
    # f32 accumulation (same numerics as the kernel's MXU path).
    w_sn, _, _ = spectral_normalize_weight(weight, u0, eps=1e-12)
    ref = jax.lax.conv_general_dilated(
        x.astype(jnp.bfloat16), w_sn.astype(jnp.bfloat16),
        window_strides=stride,
        padding=[(padding[0], padding[0]), (padding[1], padding[1])],
        dimension_numbers=("NCHW", "OIHW", "NCHW"),
        preferred_element_type=jnp.float32,
    ) + bias.reshape(1, O, 1, 1)
    ref = jax.block_until_ready(ref)
    err = float(jnp.max(jnp.abs(out - ref)))
    assert jnp.allclose(out, ref, atol=5e-3, rtol=5e-3), err

    print("KERNEL_OK")
</pallas_src>

<mosaic_0001>
module attributes {stable_mosaic.version = 11 : i64} {
  func.func @_sn_conv_kernel(%arg0: i32, %arg1: i32, %arg2: memref<1x18x18x8xbf16, #tpu.memory_space<vmem>>, %arg3: memref<9x8x128xbf16, #tpu.memory_space<vmem>>, %arg4: memref<1x128xf32, #tpu.memory_space<vmem>>, %arg5: memref<1x16x16x128xf32, #tpu.memory_space<vmem>>) attributes {dimension_semantics = [#tpu.dimension_semantics<parallel>, #tpu.dimension_semantics<parallel>], iteration_bounds = array<i64: 2, 1>, scalar_prefetch = 0 : i64, scratch_operands = 0 : i64, tpu.core_type = #tpu.core_type<tc>, window_params = [{transform_indices = @transform_0, window_bounds = array<i64: 1, 18, 18, 8>}, {pipeline_mode = #tpu.pipeline_mode<synchronous>, transform_indices = @transform_1, window_bounds = array<i64: 9, 8, 128>}, {pipeline_mode = #tpu.pipeline_mode<synchronous>, transform_indices = @transform_2, window_bounds = array<i64: 1, 128>}, {transform_indices = @transform_3, window_bounds = array<i64: 1, 16, 16, 128>}]} {
    %c16_i32 = arith.constant 16 : i32
    %0 = arith.muli %arg1, %c16_i32 : i32
    %cst = arith.constant 0.000000e+00 : f32
    %1 = vector.broadcast %cst : f32 to vector<256x128xf32>
    %c0_i32 = arith.constant 0 : i32
    %2 = arith.addi %0, %c0_i32 : i32
    %c0 = arith.constant 0 : index
    %3 = arith.index_cast %2 : i32 to index
    %c0_0 = arith.constant 0 : index
    %c0_1 = arith.constant 0 : index
    %4 = vector.load %arg2[%c0, %3, %c0_0, %c0_1] : memref<1x18x18x8xbf16, #tpu.memory_space<vmem>>, vector<1x16x16x8xbf16>
    %5 = vector.shape_cast %4 : vector<1x16x16x8xbf16> to vector<16x16x8xbf16>
    %6 = vector.shape_cast %5 : vector<16x16x8xbf16> to vector<256x8xbf16>
    %c0_2 = arith.constant 0 : index
    %c0_3 = arith.constant 0 : index
    %c0_4 = arith.constant 0 : index
    %7 = vector.load %arg3[%c0_2, %c0_3, %c0_4] : memref<9x8x128xbf16, #tpu.memory_space<vmem>>, vector<1x8x128xbf16>
    %8 = vector.shape_cast %7 : vector<1x8x128xbf16> to vector<8x128xbf16>
    %cst_5 = arith.constant dense<0.000000e+00> : vector<256x128xf32>
    %9 = tpu.matmul %6, %8, %cst_5 {dimension_numbers = #tpu.dot_dimension_numbers<[1], [0], [0], [1], [0, 0, 1, 1], [], []>} : vector<256x8xbf16>, vector<8x128xbf16>, vector<256x128xf32> -> vector<256x128xf32>
    %10 = arith.addf %1, %9 : vector<256x128xf32>
    %c0_i32_6 = arith.constant 0 : i32
    %11 = arith.addi %0, %c0_i32_6 : i32
    %c0_7 = arith.constant 0 : index
    %12 = arith.index_cast %11 : i32 to index
    %c1 = arith.constant 1 : index
    %c0_8 = arith.constant 0 : index
    %13 = vector.load %arg2[%c0_7, %12, %c1, %c0_8] : memref<1x18x18x8xbf16, #tpu.memory_space<vmem>>, vector<1x16x16x8xbf16>
    %14 = vector.shape_cast %13 : vector<1x16x16x8xbf16> to vector<16x16x8xbf16>
    %15 = vector.shape_cast %14 : vector<16x16x8xbf16> to vector<256x8xbf16>
    %c1_9 = arith.constant 1 : index
    %c0_10 = arith.constant 0 : index
    %c0_11 = arith.constant 0 : index
    %16 = vector.load %arg3[%c1_9, %c0_10, %c0_11] : memref<9x8x128xbf16, #tpu.memory_space<vmem>>, vector<1x8x128xbf16>
    %17 = vector.shape_cast %16 : vector<1x8x128xbf16> to vector<8x128xbf16>
    %cst_12 = arith.constant dense<0.000000e+00> : vector<256x128xf32>
    %18 = tpu.matmul %15, %17, %cst_12 {dimension_numbers = #tpu.dot_dimension_numbers<[1], [0], [0], [1], [0, 0, 1, 1], [], []>} : vector<256x8xbf16>, vector<8x128xbf16>, vector<256x128xf32> -> vector<256x128xf32>
    %19 = arith.addf %10, %18 : vector<256x128xf32>
    %c0_i32_13 = arith.constant 0 : i32
    %20 = arith.addi %0, %c0_i32_13 : i32
    %c0_14 = arith.constant 0 : index
    %21 = arith.index_cast %20 : i32 to index
    %c2 = arith.constant 2 : index
    %c0_15 = arith.constant 0 : index
    %22 = vector.load %arg2[%c0_14, %21, %c2, %c0_15] : memref<1x18x18x8xbf16, #tpu.memory_space<vmem>>, vector<1x16x16x8xbf16>
    %23 = vector.shape_cast %22 : vector<1x16x16x8xbf16> to vector<16x16x8xbf16>
    %24 = vector.shape_cast %23 : vector<16x16x8xbf16> to vector<256x8xbf16>
    %c2_16 = arith.constant 2 : index
    %c0_17 = arith.constant 0 : index
    %c0_18 = arith.constant 0 : index
    %25 = vector.load %arg3[%c2_16, %c0_17, %c0_18] : memref<9x8x128xbf16, #tpu.memory_space<vmem>>, vector<1x8x128xbf16>
    %26 = vector.shape_cast %25 : vector<1x8x128xbf16> to vector<8x128xbf16>
    %cst_19 = arith.constant dense<0.000000e+00> : vector<256x128xf32>
    %27 = tpu.matmul %24, %26, %cst_19 {dimension_numbers = #tpu.dot_dimension_numbers<[1], [0], [0], [1], [0, 0, 1, 1], [], []>} : vector<256x8xbf16>, vector<8x128xbf16>, vector<256x128xf32> -> vector<256x128xf32>
    %28 = arith.addf %19, %27 : vector<256x128xf32>
    %c1_i32 = arith.constant 1 : i32
    %29 = arith.addi %0, %c1_i32 : i32
    %c0_20 = arith.constant 0 : index
    %30 = arith.index_cast %29 : i32 to index
    %c0_21 = arith.constant 0 : index
    %c0_22 = arith.constant 0 : index
    %31 = vector.load %arg2[%c0_20, %30, %c0_21, %c0_22] : memref<1x18x18x8xbf16, #tpu.memory_space<vmem>>, vector<1x16x16x8xbf16>
    %32 = vector.shape_cast %31 : vector<1x16x16x8xbf16> to vector<16x16x8xbf16>
    %33 = vector.shape_cast %32 : vector<16x16x8xbf16> to vector<256x8xbf16>
    %c3 = arith.constant 3 : index
    %c0_23 = arith.constant 0 : index
    %c0_24 = arith.constant 0 : index
    %34 = vector.load %arg3[%c3, %c0_23, %c0_24] : memref<9x8x128xbf16, #tpu.memory_space<vmem>>, vector<1x8x128xbf16>
    %35 = vector.shape_cast %34 : vector<1x8x128xbf16> to vector<8x128xbf16>
    %cst_25 = arith.constant dense<0.000000e+00> : vector<256x128xf32>
    %36 = tpu.matmul %33, %35, %cst_25 {dimension_numbers = #tpu.dot_dimension_numbers<[1], [0], [0], [1], [0, 0, 1, 1], [], []>} : vector<256x8xbf16>, vector<8x128xbf16>, vector<256x128xf32> -> vector<256x128xf32>
    %37 = arith.addf %28, %36 : vector<256x128xf32>
    %c1_i32_26 = arith.constant 1 : i32
    %38 = arith.addi %0, %c1_i32_26 : i32
    %c0_27 = arith.constant 0 : index
    %39 = arith.index_cast %38 : i32 to index
    %c1_28 = arith.constant 1 : index
    %c0_29 = arith.constant 0 : index
    %40 = vector.load %arg2[%c0_27, %39, %c1_28, %c0_29] : memref<1x18x18x8xbf16, #tpu.memory_space<vmem>>, vector<1x16x16x8xbf16>
    %41 = vector.shape_cast %40 : vector<1x16x16x8xbf16> to vector<16x16x8xbf16>
    %42 = vector.shape_cast %41 : vector<16x16x8xbf16> to vector<256x8xbf16>
    %c4 = arith.constant 4 : index
    %c0_30 = arith.constant 0 : index
    %c0_31 = arith.constant 0 : index
    %43 = vector.load %arg3[%c4, %c0_30, %c0_31] : memref<9x8x128xbf16, #tpu.memory_space<vmem>>, vector<1x8x128xbf16>
    %44 = vector.shape_cast %43 : vector<1x8x128xbf16> to vector<8x128xbf16>
    %cst_32 = arith.constant dense<0.000000e+00> : vector<256x128xf32>
    %45 = tpu.matmul %42, %44, %cst_32 {dimension_numbers = #tpu.dot_dimension_numbers<[1], [0], [0], [1], [0, 0, 1, 1], [], []>} : vector<256x8xbf16>, vector<8x128xbf16>, vector<256x128xf32> -> vector<256x128xf32>
    %46 = arith.addf %37, %45 : vector<256x128xf32>
    %c1_i32_33 = arith.constant 1 : i32
    %47 = arith.addi %0, %c1_i32_33 : i32
    %c0_34 = arith.constant 0 : index
    %48 = arith.index_cast %47 : i32 to index
    %c2_35 = arith.constant 2 : index
    %c0_36 = arith.constant 0 : index
    %49 = vector.load %arg2[%c0_34, %48, %c2_35, %c0_36] : memref<1x18x18x8xbf16, #tpu.memory_space<vmem>>, vector<1x16x16x8xbf16>
    %50 = vector.shape_cast %49 : vector<1x16x16x8xbf16> to vector<16x16x8xbf16>
    %51 = vector.shape_cast %50 : vector<16x16x8xbf16> to vector<256x8xbf16>
    %c5 = arith.constant 5 : index
    %c0_37 = arith.constant 0 : index
    %c0_38 = arith.constant 0 : index
    %52 = vector.load %arg3[%c5, %c0_37, %c0_38] : memref<9x8x128xbf16, #tpu.memory_space<vmem>>, vector<1x8x128xbf16>
    %53 = vector.shape_cast %52 : vector<1x8x128xbf16> to vector<8x128xbf16>
    %cst_39 = arith.constant dense<0.000000e+00> : vector<256x128xf32>
    %54 = tpu.matmul %51, %53, %cst_39 {dimension_numbers = #tpu.dot_dimension_numbers<[1], [0], [0], [1], [0, 0, 1, 1], [], []>} : vector<256x8xbf16>, vector<8x128xbf16>, vector<256x128xf32> -> vector<256x128xf32>
    %55 = arith.addf %46, %54 : vector<256x128xf32>
    %c2_i32 = arith.constant 2 : i32
    %56 = arith.addi %0, %c2_i32 : i32
    %c0_40 = arith.constant 0 : index
    %57 = arith.index_cast %56 : i32 to index
    %c0_41 = arith.constant 0 : index
    %c0_42 = arith.constant 0 : index
    %58 = vector.load %arg2[%c0_40, %57, %c0_41, %c0_42] : memref<1x18x18x8xbf16, #tpu.memory_space<vmem>>, vector<1x16x16x8xbf16>
    %59 = vector.shape_cast %58 : vector<1x16x16x8xbf16> to vector<16x16x8xbf16>
    %60 = vector.shape_cast %59 : vector<16x16x8xbf16> to vector<256x8xbf16>
    %c6 = arith.constant 6 : index
    %c0_43 = arith.constant 0 : index
    %c0_44 = arith.constant 0 : index
    %61 = vector.load %arg3[%c6, %c0_43, %c0_44] : memref<9x8x128xbf16, #tpu.memory_space<vmem>>, vector<1x8x128xbf16>
    %62 = vector.shape_cast %61 : vector<1x8x128xbf16> to vector<8x128xbf16>
    %cst_45 = arith.constant dense<0.000000e+00> : vector<256x128xf32>
    %63 = tpu.matmul %60, %62, %cst_45 {dimension_numbers = #tpu.dot_dimension_numbers<[1], [0], [0], [1], [0, 0, 1, 1], [], []>} : vector<256x8xbf16>, vector<8x128xbf16>, vector<256x128xf32> -> vector<256x128xf32>
    %64 = arith.addf %55, %63 : vector<256x128xf32>
    %c2_i32_46 = arith.constant 2 : i32
    %65 = arith.addi %0, %c2_i32_46 : i32
    %c0_47 = arith.constant 0 : index
    %66 = arith.index_cast %65 : i32 to index
    %c1_48 = arith.constant 1 : index
    %c0_49 = arith.constant 0 : index
    %67 = vector.load %arg2[%c0_47, %66, %c1_48, %c0_49] : memref<1x18x18x8xbf16, #tpu.memory_space<vmem>>, vector<1x16x16x8xbf16>
    %68 = vector.shape_cast %67 : vector<1x16x16x8xbf16> to vector<16x16x8xbf16>
    %69 = vector.shape_cast %68 : vector<16x16x8xbf16> to vector<256x8xbf16>
    %c7 = arith.constant 7 : index
    %c0_50 = arith.constant 0 : index
    %c0_51 = arith.constant 0 : index
    %70 = vector.load %arg3[%c7, %c0_50, %c0_51] : memref<9x8x128xbf16, #tpu.memory_space<vmem>>, vector<1x8x128xbf16>
    %71 = vector.shape_cast %70 : vector<1x8x128xbf16> to vector<8x128xbf16>
    %cst_52 = arith.constant dense<0.000000e+00> : vector<256x128xf32>
    %72 = tpu.matmul %69, %71, %cst_52 {dimension_numbers = #tpu.dot_dimension_numbers<[1], [0], [0], [1], [0, 0, 1, 1], [], []>} : vector<256x8xbf16>, vector<8x128xbf16>, vector<256x128xf32> -> vector<256x128xf32>
    %73 = arith.addf %64, %72 : vector<256x128xf32>
    %c2_i32_53 = arith.constant 2 : i32
    %74 = arith.addi %0, %c2_i32_53 : i32
    %c0_54 = arith.constant 0 : index
    %75 = arith.index_cast %74 : i32 to index
    %c2_55 = arith.constant 2 : index
    %c0_56 = arith.constant 0 : index
    %76 = vector.load %arg2[%c0_54, %75, %c2_55, %c0_56] : memref<1x18x18x8xbf16, #tpu.memory_space<vmem>>, vector<1x16x16x8xbf16>
    %77 = vector.shape_cast %76 : vector<1x16x16x8xbf16> to vector<16x16x8xbf16>
    %78 = vector.shape_cast %77 : vector<16x16x8xbf16> to vector<256x8xbf16>
    %c8 = arith.constant 8 : index
    %c0_57 = arith.constant 0 : index
    %c0_58 = arith.constant 0 : index
    %79 = vector.load %arg3[%c8, %c0_57, %c0_58] : memref<9x8x128xbf16, #tpu.memory_space<vmem>>, vector<1x8x128xbf16>
    %80 = vector.shape_cast %79 : vector<1x8x128xbf16> to vector<8x128xbf16>
    %cst_59 = arith.constant dense<0.000000e+00> : vector<256x128xf32>
    %81 = tpu.matmul %78, %80, %cst_59 {dimension_numbers = #tpu.dot_dimension_numbers<[1], [0], [0], [1], [0, 0, 1, 1], [], []>} : vector<256x8xbf16>, vector<8x128xbf16>, vector<256x128xf32> -> vector<256x128xf32>
    %82 = arith.addf %73, %81 : vector<256x128xf32>
    %c0_60 = arith.constant 0 : index
    %c0_61 = arith.constant 0 : index
    %83 = vector.load %arg4[%c0_60, %c0_61] : memref<1x128xf32, #tpu.memory_space<vmem>>, vector<1x128xf32>
    %84 = vector.broadcast %83 : vector<1x128xf32> to vector<256x128xf32>
    %85 = arith.addf %82, %84 : vector<256x128xf32>
    %86 = vector.shape_cast %85 : vector<256x128xf32> to vector<1x16x16x128xf32>
    %c0_62 = arith.constant 0 : index
    %c0_63 = arith.constant 0 : index
    %c0_64 = arith.constant 0 : index
    %c0_65 = arith.constant 0 : index
    %87 = vector.load %arg5[%c0_62, %c0_63, %c0_64, %c0_65] : memref<1x16x16x128xf32, #tpu.memory_space<vmem>>, vector<1x16x16x128xf32>
    tpu.vector_store %arg5[%c0_62, %c0_63, %c0_64, %c0_65], %86 {strides = array<i32>} : memref<1x16x16x128xf32, #tpu.memory_space<vmem>>, vector<1x16x16x128xf32>,
    return
  }
  func.func @transform_0(%arg0: i32, %arg1: i32) -> (i32, i32, i32, i32) {
    %c0_i32 = arith.constant 0 : i32
    %c0_i32_0 = arith.constant 0 : i32
    %c0_i32_1 = arith.constant 0 : i32
    %c0_i32_2 = arith.constant 0 : i32
    return %arg0, %c0_i32, %c0_i32_0, %c0_i32_1 : i32, i32, i32, i32
  }
  func.func @transform_1(%arg0: i32, %arg1: i32) -> (i32, i32, i32) {
    %c0_i32 = arith.constant 0 : i32
    %c0_i32_0 = arith.constant 0 : i32
    %c0_i32_1 = arith.constant 0 : i32
    %c0_i32_2 = arith.constant 0 : i32
    return %c0_i32, %c0_i32_0, %c0_i32_1 : i32, i32, i32
  }
  func.func @transform_2(%arg0: i32, %arg1: i32) -> (i32, i32) {
    %c0_i32 = arith.constant 0 : i32
    %c0_i32_0 = arith.constant 0 : i32
    %c0_i32_1 = arith.constant 0 : i32
    return %c0_i32, %c0_i32_0 : i32, i32
  }
  func.func @transform_3(%arg0: i32, %arg1: i32) -> (i32, i32, i32, i32) {
    %c0_i32 = arith.constant 0 : i32
    %c0_i32_0 = arith.constant 0 : i32
    %c0_i32_1 = arith.constant 0 : i32
    return %arg0, %arg1, %c0_i32, %c0_i32_0 : i32, i32, i32, i32
  }
}

</mosaic_0001>

<bundles_post_ra>
// kernel: tpu_custom_call.1
= control target key start
LH: loop header
LB: loop body
LE: loop exit
PB: predicated region body
PF: predicated region fallthrough
CT: control target
= control target key end

     0   :  { %8 = vsyncpa [#allocation3], 0  ;;  %s6618_s0 = inlined_call_operand.vmem [shape: bf16[2,18,18,8], index: 0, kind: input, shape index: {}]   ;;  %s6619_s1 = inlined_call_operand.vmem [shape: bf16[9,8,128], index: 1, kind: input, shape index: {}]   ;;  %s6620_s2 = inlined_call_operand.vmem [shape: f32[1,128], index: 2, kind: input, shape index: {}]   ;;  %s6621_s3 = inlined_call_operand.hbm [shape: f32[2,16,16,128], index: 3, kind: output, shape index: {}]  }
   0x1   :  { %10 = vsyncpa [#allocation3 + $0x1], 0  ;;  %s5136_s12 = smov 0   ;;  %s5138_s13 = smov 0  }
   0x2   :  { %s5140_s14 = smov 0   ;;  %s5142_s15 = smov 0  }
   0x3   :  { %s5144_s16 = smov 0   ;;  %s5146_s17 = smov 0  }
   0x4 LB: > { %s4276_s18 = sadd.s32 4294967295, %s5112_s17   ;;  %s4277_s19 = sadd.s32 4294967294, %s5112_s17   ;;  %s5112_s17 = sphi %s5146_s17, %s16_s17   ;;  %s5108_s16 = sphi %s5144_s16, %s6638_s16   ;;  %s5104_s15 = sphi %s5142_s15, %s6637_s15   ;;  %s5100_s14 = sphi %s5140_s14, %s6636_s14   ;;  %s5096_s13 = sphi %s5138_s13, %s6635_s13   ;;  %s5092_s12 = sphi %s5136_s12, %s6634_s12  }
   0x5   : > { %s28_s20 = sadd.s32 1, %s5108_s16  ;;  %s105_s21 = sadd.s32 1, %s5100_s14 }
   0x6   : > { %p30_p0 = scmp.ge.s32.totalorder %s28_s20, 2  ;;  %p115_p1 = scmp.ne.s32.totalorder %s5100_s14, %s5096_s13 }
   0x7   : > { %p116_p2 = scmp.eq.s32.totalorder %s4276_s18, 1  ;;  %p121_p3 = scmp.ne.s32.totalorder %s5096_s13, %s5092_s12 }
   0x8   : > { %s6640_s20 = smov (%p30_p0, %s28_s20), 0  ;;  %p122_p5 = scmp.eq.s32.totalorder %s4277_s19, 1 }
   0x9   : > { %p5176_p4 = por %p116_p2, %p115_p1  ;;  %s100_s23 = ssub.s32 %s5108_s16, %s6640_s20 }
   0xa   : > { %p4280_p6 = scmp.ge.s32.totalorder %s5112_s17, 1  ;;  %p103_p7 = scmp.eq.s32.totalorder %s100_s23, 0 }
   0xb   : > { %p5183_p8 = por %p122_p5, %p121_p3  ;;  %p154_p9 = scmp.lt.s32.totalorder %s5112_s17, 3 }
   0xc   : > { %s5189_s25 = scalar_select %p103_p7, %s5100_s14, %s105_s21  }
   0xd   : > { %p155_p10 = pnand %p4280_p6, %p154_p9 }
   0xf   : > { %158 = sbr.rel (%p155_p10) target bundleno = 769 (0x301), region = 32 }
  0x14   : > { %v4283_v0 = vld [vmem:[%s6619_s1 + $0x4] sm:$0xf]  ;;  %vm724_vm0 = vcmask 1043456   ;;  %p178_p11 = scmp.lt.s32.totalorder %s5104_s15, 1  ;;  %v4396_v2 = vld [vmem:[%s6619_s1 + $0x8] sm:$0xf] }
  0x15   : > { %v726_v1 = vsel %vm724_vm0, %v4283_v0, 0  ;;  %v1299_v3 = vsel %vm724_vm0, %v4396_v2, 0  ;;  %v4445_v4 = vld [vmem:[%s6619_s1 + $0xc] sm:$0xf]  ;;  %v221_v5 = vld [vmem:[%s6619_s1] sm:$0xf] }
  0x16   : > { %4921 = vmatpush.bf16.msra.mxu1 %v726_v1  ;;  %4922 = vmatpush.bf16.msra.mxu2 %v726_v1  ;;  %s179_s30 = scalar_select %p178_p11, %s5104_s15, 1  ;;  %v4574_v6 = vld [vmem:[%s6619_s1 + $0x10] sm:$0xf]  ;;  %v1589_v7 = vsel %vm724_vm0, %v4445_v4, 0  ;;  %v946_v8 = vsel %vm724_vm0, %v221_v5, 0  ;;  %vm675_vm4 = vcmask 64512  }
  0x17   : > { %4923 = vmatpush.bf16.msra.mxu3 %v726_v1  ;;  %735 = vmatpush.bf16.msra.mxu0 %v726_v1  ;;  %v2243_v9 = vsel %vm724_vm0, %v4574_v6, 0  ;;  %vm238_vm1 = vsmask.f32 3328  ;;  %vm239_vm2 = vsmask.f32 7440  ;;  %vm1085_vm5 = vcmask 1042432  }
  0x18   : > { %s4924_s10 = smul.u32 216, %s179_s30  ;;  %vm5228_vm3 = vmor %vm238_vm1, %vm239_vm2  ;;  %vm1086_vm6 = vcmask 1046532   ;;  %s175_s5 = sand.u32 1, %s5096_s13  }
  0x19   : > { %vm5402_vm7 = vmor %vm1085_vm5, %vm1086_vm6  ;;  %s4281_s6 = sshll.u32 %s175_s5, 8  ;;  %s4920_s18 = sshll.u32 %s5104_s15, 8 }
  0x1a   : > { %1308 = vmatpush.bf16.msrb.mxu2 %v1299_v3  ;;  %955 = vmatpush.bf16.msrb.mxu1 %v946_v8  ;;  %s5216_s19 = scalar_lea.vmem %s6618_s0, %s4924_s10  ;;  %s6280_s9 = scalar_lea.vmem [#allocation2], %s4281_s6 }
  0x1b   : > { %1598 = vmatpush.bf16.msrb.mxu3 %v1589_v7  ;;  %2252 = vmatpush.bf16.msrb.mxu0 %v2243_v9  ;;  %v197_v10 = vld [vmem:[%s5216_s19 + $0x30] sm:$0xf]  ;;  %v198_v11 = vld [vmem:[%s5216_s19 + $0x34] sm:$0xf]  ;;  %v226_v12 = vld [vmem:[%s5216_s19 + $0x38] sm:$0x1]  ;;  %s4189_s23 = scalar_lea.hbm %s6621_s3, %s4920_s18 }
  0x1c   : > { %v338_v13 = vshrl.u32 %v197_v10, 16  ;;  %v341_v14 = vshll.u32 %v197_v10, 16  ;;  %v347_v15 = vshll.u32 %v198_v11, 16  ;;  %v351_v16 = vshrl.u32 %v198_v11, 16  ;;  %v205_v17 = vld [vmem:[%s5216_s19 + $0x60] sm:$0xf] }
  0x1d   : > { %v357_v18 = vshll.u32 %v226_v12, 16  ;;  %v206_v19 = vld [vmem:[%s5216_s19 + $0x64] sm:$0xf]  ;;  %v230_v20 = vld [vmem:[%s5216_s19 + $0x68] sm:$0x1]  ;;  %v434_v21 = vshrl.u32 %v205_v17, 16 }
  0x1e   : > { %v340_v22 = vrot.slane %v338_v13, 4  ;;  %v343_v23 = vrot.slane %v341_v14, 5  ;;  %v349_v24 = vrot.slane %v347_v15, 5  ;;  %v353_v25 = vrot.slane %v351_v16, 4  ;;  %v213_v26 = vld [vmem:[%s5216_s19 + $0x90] sm:$0xf] }
  0x1f   : > { %v359_v27 = vrot.slane %v357_v18, 5  ;;  %v436_v28 = vrot.slane %v434_v21, 4  ;;  %v437_v29 = vshll.u32 %v205_v17, 16  ;;  %v443_v30 = vshll.u32 %v206_v19, 16  ;;  %v214_v35 = vld [vmem:[%s5216_s19 + $0x94] sm:$0xf] }
  0x20   : > { %v344_v31 = vor.u32 %v343_v23, %v340_v22  ;;  %v354_v32 = vor.u32 %v353_v25, %v349_v24  ;;  %v447_v33 = vshrl.u32 %v206_v19, 16  ;;  %v453_v34 = vshll.u32 %v230_v20, 16  ;;  %v234_v45 = vld [vmem:[%s5216_s19 + $0x98] sm:$0x1]  ;;  %v189_v61 = vld [vmem:[%s5216_s19] sm:$0xf] }
  0x21   : > { %v439_v37 = vrot.slane %v437_v29, 5  ;;  %v445_v38 = vrot.slane %v443_v30, 5  ;;  %v530_v39 = vshrl.u32 %v213_v26, 16  ;;  %v533_v47 = vshll.u32 %v213_v26, 16  ;;  %v5241_v1 = vld [vmem:[%s5216_s19 + $0x4] sm:$0xf] }
  0x22   : > { %v345_v40 = vrot.slane %v344_v31, 4  ;;  %v355_v41 = vrot.slane %v354_v32, 4  ;;  %v449_v42 = vrot.slane %v447_v33, 4  ;;  %v455_v43 = vrot.slane %v453_v34, 5  ;;  %v5244_v2 = vld [vmem:[%s5216_s19 + $0x8] sm:$0x1] }
  0x23   : > { %v440_v44 = vor.u32 %v439_v37, %v436_v28  ;;  %v532_v46 = vrot.slane %v530_v39, 4  ;;  %v539_v48 = vshll.u32 %v214_v35, 16  ;;  %v543_v52 = vshrl.u32 %v214_v35, 16  ;;  %v199_v19 = vld [vmem:[%s5216_s19 + $0x3c] sm:$0xf]  ;;  %s4190_s26 = sshll.u32 %s6280_s9, 4  ;;  %s4191_s26 = int_to_ptr.vmem [resolvable:$true] %s4190_s26 }
  0x24   : > { %v350_v49 = vsel %vm5228_vm3, %v345_v40, %v349_v24  ;;  %v360_v50 = vsel %vm5228_vm3, %v355_v41, %v359_v27  ;;  %v450_v51 = vor.u32 %v449_v42, %v445_v38  ;;  %v535_v56 = vrot.slane %v533_v47, 5  ;;  %v5256_v20 = vld [vmem:[%s5216_s19 + $0x40] sm:$0xf]  ;;  %v5261_v25 = vld [vmem:[%s5216_s19 + $0x44] sm:$0x1]  ;;  %s4192_s27 = sshll.u32 %s4189_s23, 4  ;;  %s4193_s27 = int_to_ptr.hbm [resolvable:$true] %s4192_s27 }
  0x25   : > { %v635_v53 = vunpack.c.l.b16 %v350_v49  ;;  %v636_v54 = vunpack.c.l.b16 %v360_v50  ;;  %v441_v55 = vrot.slane %v440_v44, 4  ;;  %v541_v58 = vrot.slane %v539_v48, 5  ;;  %v207_v33 = vld [vmem:[%s5216_s19 + $0x6c] sm:$0xf]  ;;  %v231_v47 = vld [vmem:[%s5216_s19 + $0x74] sm:$0x1] }
  0x26   : > { %v451_v57 = vrot.slane %v450_v51, 4  ;;  %v545_v59 = vrot.slane %v543_v52, 4  ;;  %v549_v60 = vshll.u32 %v234_v45, 16  ;;  %v536_v0 = vor.u32 %v535_v56, %v532_v46  ;;  %s4175_s15 = scalar_lea.sflag [#allocation3], %s175_s5  ;;  %s5048_s28 = sshra.s32 %s4193_s27, 4  ;;  %s5049_s28 = int_to_ptr.hbm [resolvable:$true] %s5048_s28 }
  0x27   : > { %v663_v62 = vpack.c.b16 %v636_v54, %v635_v53  ;;  %v446_v63 = vsel %vm5228_vm3, %v441_v55, %v445_v38  ;;  %v242_v9 = vshrl.u32 %v189_v61, 16  ;;  %v245_v10 = vshll.u32 %v189_v61, 16  ;;  %v215_v61 = vld [vmem:[%s5216_s19 + $0x9c] sm:$0xf]  ;;  %s5050_s29 = scalar_lea.hbm %s5049_s28, 256  ;;  %s5054_s6 = scalar_lea.hbm %s6621_s3, 512 }
  0x28   : > { %v456_v3 = vsel %vm5228_vm3, %v451_v57, %v455_v43  ;;  %v643_v4 = vunpack.c.l.b16 %v446_v63  ;;  %v546_v5 = vor.u32 %v545_v59, %v541_v58  ;;  %v551_v6 = vrot.slane %v549_v60, 5  ;;  %v208_v43 = vld [vmem:[%s5216_s19 + $0x70] sm:$0xf]  ;;  %p5051_p12 = scmp.ne.s32.totalorder %s5049_s28, %s5050_s29  ;;  %p5055_p1 = scmp.lt.s32.totalorder %s5049_s28, %s6621_s3 }
  0x29   : > { %4288 = vmatmul.msk.bf16.vlgmr.msra.gmra.mxu1 %vm675_vm4, %v663_v62  ;;  %v644_v7 = vunpack.c.l.b16 %v456_v3  ;;  %v537_v8 = vrot.slane %v536_v0, 4  ;;  %v251_v12 = vshll.u32 %v5241_v1, 16  ;;  %v255_v13 = vshrl.u32 %v5241_v1, 16  ;;  %v216_v3 = vld [vmem:[%s5216_s19 + $0xa0] sm:$0xf]  ;;  %p5056_p2 = scmp.lt.s32.totalorder %s5054_s6, %s5050_s29 }
  0x2a   : > { %v547_v11 = vrot.slane %v546_v5, 4  ;;  %v261_v14 = vshll.u32 %v5244_v2, 16  ;;  %v244_v17 = vrot.slane %v242_v9, 4  ;;  %v247_v18 = vrot.slane %v245_v10, 5  ;;  %p5052_p13 = pnand %p5051_p12, %p5176_p4 }
  0x2b   : > { %v667_v15 = vpack.c.b16 %v644_v7, %v643_v4  ;;  %v542_v16 = vsel %vm5228_vm3, %v537_v8, %v541_v58  ;;  %v253_v23 = vrot.slane %v251_v12, 5  ;;  %v257_v24 = vrot.slane %v255_v13, 4  ;;  %v235_v8 = vld [vmem:[%s5216_s19 + $0xa4] sm:$0x1]  ;;  %p5057_p3 = por %p5056_p2, %p5055_p1 }
  0x2c   : > { %v552_v21 = vsel %vm5228_vm3, %v547_v11, %v551_v6  ;;  %v651_v22 = vunpack.c.l.b16 %v542_v16  ;;  %v248_v27 = vor.u32 %v247_v18, %v244_v17  ;;  %v263_v28 = vrot.slane %v261_v14, 5  ;;  %p5053_p0 = pneg %p5052_p13 }
  0x2d   : > { %4292 = vmatmul.msk.bf16.vlgmr.msra.gmra.mxu2 %vm675_vm4, %v667_v15  ;;  %v652_v26 = vunpack.c.l.b16 %v552_v21  ;;  %v258_v29 = vor.u32 %v257_v24, %v253_v23  ;;  %v362_v30 = vshrl.u32 %v199_v19, 16  ;;  %v365_v31 = vshll.u32 %v199_v19, 16 }
  0x2e   : > { %v371_v32 = vshll.u32 %v5256_v20, 16  ;;  %v249_v35 = vrot.slane %v248_v27, 4  ;;  %v375_v37 = vshrl.u32 %v5256_v20, 16  ;;  %v381_v38 = vshll.u32 %v5261_v25, 16  ;;  %p5058_p5 = pnand %p5057_p3, %p5053_p0 }
  0x2f   : > { %v671_v34 = vpack.c.b16 %v652_v26, %v651_v22  ;;  %v259_v39 = vrot.slane %v258_v29, 4  ;;  %v364_v40 = vrot.slane %v362_v30, 4  ;;  %v367_v41 = vrot.slane %v365_v31, 5  ;;  %v191_v22 = vld [vmem:[%s5216_s19 + $0xc] sm:$0xf] }
  0x30   : > { %v373_v42 = vrot.slane %v371_v32, 5  ;;  %v254_v44 = vsel %vm5228_vm3, %v249_v35, %v253_v23  ;;  %v377_v45 = vrot.slane %v375_v37, 4  ;;  %v383_v46 = vrot.slane %v381_v38, 5  ;;  %v5290_v32 = vld [vmem:[%s5216_s19 + $0x14] sm:$0x1] }
  0x31   : > { %4296 = vmatmul.msk.bf16.vlgmr.msra.gmra.mxu3 %vm675_vm4, %v671_v34  ;;  %v458_v48 = vshrl.u32 %v207_v33, 16  ;;  %v264_v49 = vsel %vm5228_vm3, %v259_v39, %v263_v28  ;;  %v627_v50 = vunpack.c.l.b16 %v254_v44  ;;  %v368_v51 = vor.u32 %v367_v41, %v364_v40  ;;  %v5287_v28 = vld [vmem:[%s5216_s19 + $0x10] sm:$0xf] }
  0x32   : > { %v461_v52 = vshll.u32 %v207_v33, 16  ;;  %v628_v53 = vunpack.c.l.b16 %v264_v49  ;;  %v378_v54 = vor.u32 %v377_v45, %v373_v42  ;;  %v467_v56 = vshll.u32 %v208_v43, 16 }
  0x33   : > { %v460_v55 = vrot.slane %v458_v48, 4  ;;  %v369_v57 = vrot.slane %v368_v51, 4  ;;  %v471_v59 = vshrl.u32 %v208_v43, 16  ;;  %v477_v60 = vshll.u32 %v231_v47, 16  ;;  %v5300_v47 = vld [vmem:[%s5216_s19 + $0x4c] sm:$0xf] }
  0x34   : > { %v463_v58 = vrot.slane %v461_v52, 5  ;;  %v659_v62 = vpack.c.b16 %v628_v53, %v627_v50  ;;  %v379_v63 = vrot.slane %v378_v54, 4  ;;  %v469_v0 = vrot.slane %v467_v56, 5  ;;  %v5305_v56 = vld [vmem:[%s5216_s19 + $0x50] sm:$0x1] }
  0x35   : > { %v374_v4 = vsel %vm5228_vm3, %v369_v57, %v373_v42  ;;  %v473_v6 = vrot.slane %v471_v59, 4  ;;  %v479_v7 = vrot.slane %v477_v60, 5  ;;  %v554_v11 = vshrl.u32 %v215_v61, 16  ;;  %v201_v42 = vld [vmem:[%s5216_s19 + $0x48] sm:$0xf] }
  0x36   : > { %v464_v5 = vor.u32 %v463_v58, %v460_v55  ;;  %4284 = vmatmul.msk.bf16.vlgmr.msra.gmra.mxu0 %vm675_vm4, %v659_v62  ;;  %v384_v9 = vsel %vm5228_vm3, %v379_v63, %v383_v46  ;;  %v637_v10 = vunpack.c.l.b16 %v374_v4  ;;  %v557_v12 = vshll.u32 %v215_v61, 16 }
  0x37   : > { %v638_v13 = vunpack.c.l.b16 %v384_v9  ;;  %v474_v15 = vor.u32 %v473_v6, %v469_v0  ;;  %v563_v16 = vshll.u32 %v216_v3, 16  ;;  %v556_v17 = vrot.slane %v554_v11, 4 }
  0x38   : > { %v465_v14 = vrot.slane %v464_v5, 4  ;;  %v559_v18 = vrot.slane %v557_v12, 5  ;;  %v567_v19 = vshrl.u32 %v216_v3, 16  ;;  %v573_v21 = vshll.u32 %v235_v8, 16  ;;  %v209_v3 = vld [vmem:[%s5216_s19 + $0x78] sm:$0xf] }
  0x39   : > { %v664_v23 = vpack.c.b16 %v638_v13, %v637_v10  ;;  %v475_v26 = vrot.slane %v474_v15, 4  ;;  %v565_v27 = vrot.slane %v563_v16, 5  ;;  %v266_v35 = vshrl.u32 %v191_v22, 16  ;;  %v210_v8 = vld [vmem:[%s5216_s19 + $0x7c] sm:$0xf] }
  0x3a   : > { %v470_v24 = vsel %vm5228_vm3, %v465_v14, %v469_v0  ;;  %v560_v30 = vor.u32 %v559_v18, %v556_v17  ;;  %v569_v31 = vrot.slane %v567_v19, 4  ;;  %v575_v34 = vrot.slane %v573_v21, 5  ;;  %v232_v16 = vld [vmem:[%s5216_s19 + $0x80] sm:$0x1] }
  0x3b   : > { %v645_v29 = vunpack.c.l.b16 %v470_v24  ;;  %4289 = vmatmul.msk.bf16.gmra.mxu1 %vm675_vm4, %v664_v23  ;;  %v480_v33 = vsel %vm5228_vm3, %v475_v26, %v479_v7  ;;  %v269_v37 = vshll.u32 %v191_v22, 16  ;;  %v275_v41 = vshll.u32 %v5287_v28, 16 }
  0x3c   : > { %v646_v38 = vunpack.c.l.b16 %v480_v33  ;;  %v561_v39 = vrot.slane %v560_v30, 4  ;;  %v570_v40 = vor.u32 %v569_v31, %v565_v27  ;;  %v268_v43 = vrot.slane %v266_v35, 4 }
  0x3d   : > { %v271_v44 = vrot.slane %v269_v37, 5  ;;  %v279_v45 = vshrl.u32 %v5287_v28, 16  ;;  %v285_v46 = vshll.u32 %v5290_v32, 16  ;;  %v277_v51 = vrot.slane %v275_v41, 5 }
  0x3e   : > { %v668_v48 = vpack.c.b16 %v646_v38, %v645_v29  ;;  %v566_v49 = vsel %vm5228_vm3, %v561_v39, %v565_v27  ;;  %v571_v50 = vrot.slane %v570_v40, 4  ;;  %v386_v58 = vshrl.u32 %v201_v42, 16  ;;  %v218_v39 = vld [vmem:[%s5216_s19 + $0xac] sm:$0xf]  ;;  %v236_v40 = vld [vmem:[%s5216_s19 + $0xb0] sm:$0x1] }
  0x3f   : > { %v653_v52 = vunpack.c.l.b16 %v566_v49  ;;  %v272_v53 = vor.u32 %v271_v44, %v268_v43  ;;  %v281_v54 = vrot.slane %v279_v45, 4  ;;  %v287_v55 = vrot.slane %v285_v46, 5 }
  0x40   : > { %4293 = vmatmul.msk.bf16.gmra.mxu2 %vm675_vm4, %v668_v48  ;;  %v576_v57 = vsel %vm5228_vm3, %v571_v50, %v575_v34  ;;  %v389_v59 = vshll.u32 %v201_v42, 16  ;;  %v395_v60 = vshll.u32 %v5300_v47, 16  ;;  %v399_v0 = vshrl.u32 %v5300_v47, 16  ;;  %v217_v34 = vld [vmem:[%s5216_s19 + $0xa8] sm:$0xf] }
  0x41   : > { %v654_v61 = vunpack.c.l.b16 %v576_v57  ;;  %v273_v62 = vrot.slane %v272_v53, 4  ;;  %v282_v63 = vor.u32 %v281_v54, %v277_v51  ;;  %v388_v4 = vrot.slane %v386_v58, 4 }
  0x42   : > { %v391_v5 = vrot.slane %v389_v59, 5  ;;  %v397_v6 = vrot.slane %v395_v60, 5  ;;  %v405_v7 = vshll.u32 %v5305_v56, 16  ;;  %v401_v12 = vrot.slane %v399_v0, 4  ;;  %v193_v59 = vld [vmem:[%s5216_s19 + $0x18] sm:$0xf] }
  0x43   : > { %v672_v9 = vpack.c.b16 %v654_v61, %v653_v52  ;;  %v278_v10 = vsel %vm5228_vm3, %v273_v62, %v277_v51  ;;  %v283_v11 = vrot.slane %v282_v63, 4  ;;  %v482_v17 = vshrl.u32 %v209_v3, 16  ;;  %v5333_v63 = vld [vmem:[%s5216_s19 + $0x1c] sm:$0xf]  ;;  %v5336_v0 = vld [vmem:[%s5216_s19 + $0x20] sm:$0x1] }
  0x44   : > { %v629_v13 = vunpack.c.l.b16 %v278_v10  ;;  %v392_v14 = vor.u32 %v391_v5, %v388_v4  ;;  %v407_v15 = vrot.slane %v405_v7, 5  ;;  %v402_v19 = vor.u32 %v401_v12, %v397_v6 }
  0x45   : > { %4297 = vmatmul.msk.bf16.gmra.mxu3 %vm675_vm4, %v672_v9  ;;  %v288_v18 = vsel %vm5228_vm3, %v283_v11, %v287_v55  ;;  %v485_v21 = vshll.u32 %v209_v3, 16  ;;  %v491_v22 = vshll.u32 %v210_v8, 16  ;;  %v484_v26 = vrot.slane %v482_v17, 4 }
  0x46   : > { %v630_v23 = vunpack.c.l.b16 %v288_v18  ;;  %v393_v24 = vrot.slane %v392_v14, 4  ;;  %v495_v27 = vshrl.u32 %v210_v8, 16  ;;  %v403_v29 = vrot.slane %v402_v19, 4 }
  0x47   : > { %v487_v30 = vrot.slane %v485_v21, 5  ;;  %v493_v31 = vrot.slane %v491_v22, 5  ;;  %v501_v33 = vshll.u32 %v232_v16, 16  ;;  %v578_v48 = vshrl.u32 %v217_v34, 16  ;;  %v5346_v21 = vld [vmem:[%s5216_s19 + $0x58] sm:$0xf] }
  0x48   : > { %v660_v35 = vpack.c.b16 %v630_v23, %v629_v13  ;;  %v398_v37 = vsel %vm5228_vm3, %v393_v24, %v397_v6  ;;  %v497_v38 = vrot.slane %v495_v27, 4  ;;  %v408_v41 = vsel %vm5228_vm3, %v403_v29, %v407_v15  ;;  %v203_v15 = vld [vmem:[%s5216_s19 + $0x54] sm:$0xf]  ;;  %v5351_v27 = vld [vmem:[%s5216_s19 + $0x5c] sm:$0x1] }
  0x49   : > { %v639_v42 = vunpack.c.l.b16 %v398_v37  ;;  %v488_v43 = vor.u32 %v487_v30, %v484_v26  ;;  %v503_v44 = vrot.slane %v501_v33, 5  ;;  %v640_v45 = vunpack.c.l.b16 %v408_v41 }
  0x4a   : > { %4285 = vmatmul.msk.bf16.gmra.mxu0 %vm675_vm4, %v660_v35  ;;  %v498_v46 = vor.u32 %v497_v38, %v493_v31  ;;  %v581_v49 = vshll.u32 %v217_v34, 16  ;;  %v587_v51 = vshll.u32 %v218_v39, 16  ;;  %v591_v52 = vshrl.u32 %v218_v39, 16  ;;  %v211_v39 = vld [vmem:[%s5216_s19 + $0x84] sm:$0xf] }
  0x4b   : > { %v489_v50 = vrot.slane %v488_v43, 4  ;;  %v597_v53 = vshll.u32 %v236_v40, 16  ;;  %v665_v54 = vpack.c.b16 %v640_v45, %v639_v42  ;;  %v580_v57 = vrot.slane %v578_v48, 4 }
  0x4c   : > { %v499_v55 = vrot.slane %v498_v46, 4  ;;  %v583_v58 = vrot.slane %v581_v49, 5  ;;  %v589_v61 = vrot.slane %v587_v51, 5  ;;  %v593_v62 = vrot.slane %v591_v52, 4  ;;  %v212_v49 = vld [vmem:[%s5216_s19 + $0x88] sm:$0xf] }
  0x4d   : > { %v494_v60 = vsel %vm5228_vm3, %v489_v50, %v493_v31  ;;  %4290 = vmatmul.msk.bf16.gmra.mxu1 %vm675_vm4, %v665_v54  ;;  %v599_v6 = vrot.slane %v597_v53, 5  ;;  %v290_v9 = vshrl.u32 %v193_v59, 16  ;;  %v293_v10 = vshll.u32 %v193_v59, 16  ;;  %v233_v53 = vld [vmem:[%s5216_s19 + $0x8c] sm:$0x1] }
  0x4e   : > { %v504_v3 = vsel %vm5228_vm3, %v499_v55, %v503_v44  ;;  %v647_v4 = vunpack.c.l.b16 %v494_v60  ;;  %v584_v5 = vor.u32 %v583_v58, %v580_v57  ;;  %v594_v8 = vor.u32 %v593_v62, %v589_v61 }
  0x4f   : > { %v648_v7 = vunpack.c.l.b16 %v504_v3  ;;  %v299_v12 = vshll.u32 %v5333_v63, 16  ;;  %v303_v13 = vshrl.u32 %v5333_v63, 16  ;;  %v309_v14 = vshll.u32 %v5336_v0, 16 }
  0x50   : > { %v585_v11 = vrot.slane %v584_v5, 4  ;;  %v595_v17 = vrot.slane %v594_v8, 4  ;;  %v292_v18 = vrot.slane %v290_v9, 4  ;;  %v295_v19 = vrot.slane %v293_v10, 5  ;;  %v219_v8 = vld [vmem:[%s5216_s19 + $0xb4] sm:$0xf] }
  0x51   : > { %v669_v16 = vpack.c.b16 %v648_v7, %v647_v4  ;;  %v301_v23 = vrot.slane %v299_v12, 5  ;;  %v305_v24 = vrot.slane %v303_v13, 4  ;;  %v311_v26 = vrot.slane %v309_v14, 5  ;;  %v220_v12 = vld [vmem:[%s5216_s19 + $0xb8] sm:$0xf] }
  0x52   : > { %v590_v22 = vsel %vm5228_vm3, %v585_v11, %v589_v61  ;;  %v600_v29 = vsel %vm5228_vm3, %v595_v17, %v599_v6  ;;  %v296_v31 = vor.u32 %v295_v19, %v292_v18  ;;  %v410_v33 = vshrl.u32 %v203_v15, 16  ;;  %v237_v17 = vld [vmem:[%s5216_s19 + $0xbc] sm:$0x1] }
  0x53   : > { %4294 = vmatmul.msk.bf16.gmra.mxu2 %vm675_vm4, %v669_v16  ;;  %v655_v30 = vunpack.c.l.b16 %v590_v22  ;;  %v656_v34 = vunpack.c.l.b16 %v600_v29  ;;  %v306_v35 = vor.u32 %v305_v24, %v301_v23  ;;  %v413_v37 = vshll.u32 %v203_v15, 16 }
  0x54   : > { %v419_v38 = vshll.u32 %v5346_v21, 16  ;;  %v297_v40 = vrot.slane %v296_v31, 4  ;;  %v412_v41 = vrot.slane %v410_v33, 4  ;;  %v423_v42 = vshrl.u32 %v5346_v21, 16 }
  0x55   : > { %v429_v43 = vshll.u32 %v5351_v27, 16  ;;  %v673_v44 = vpack.c.b16 %v656_v34, %v655_v30  ;;  %v307_v45 = vrot.slane %v306_v35, 4  ;;  %v415_v46 = vrot.slane %v413_v37, 5  ;;  %v195_v37 = vld [vmem:[%s5216_s19 + $0x24] sm:$0xf] }
  0x56   : > { %v421_v48 = vrot.slane %v419_v38, 5  ;;  %v302_v50 = vsel %vm5228_vm3, %v297_v40, %v301_v23  ;;  %v425_v51 = vrot.slane %v423_v42, 4  ;;  %v506_v54 = vshrl.u32 %v211_v39, 16  ;;  %v5379_v42 = vld [vmem:[%s5216_s19 + $0x28] sm:$0xf] }
  0x57   : > { %v431_v52 = vrot.slane %v429_v43, 5  ;;  %4298 = vmatmul.msk.bf16.gmra.mxu3 %vm675_vm4, %v673_v44  ;;  %v312_v55 = vsel %vm5228_vm3, %v307_v45, %v311_v26  ;;  %v631_v57 = vunpack.c.l.b16 %v302_v50  ;;  %v416_v58 = vor.u32 %v415_v46, %v412_v41 }
  0x58   : > { %v509_v59 = vshll.u32 %v211_v39, 16  ;;  %v632_v60 = vunpack.c.l.b16 %v312_v55  ;;  %v426_v61 = vor.u32 %v425_v51, %v421_v48  ;;  %v508_v62 = vrot.slane %v506_v54, 4 }
  0x59   : > { %v515_v3 = vshll.u32 %v212_v49, 16  ;;  %v417_v4 = vrot.slane %v416_v58, 4  ;;  %v519_v6 = vshrl.u32 %v212_v49, 16  ;;  %v525_v7 = vshll.u32 %v233_v53, 16 }
  0x5a   : > { %v511_v5 = vrot.slane %v509_v59, 5  ;;  %v661_v9 = vpack.c.b16 %v632_v60, %v631_v57  ;;  %v427_v10 = vrot.slane %v426_v61, 4  ;;  %v602_v22 = vshrl.u32 %v219_v8, 16  ;;  %v1037_v61 = vld [vmem:[%s5216_s19] sm:$0xe] }
  0x5b   : > { %v517_v11 = vrot.slane %v515_v3, 5  ;;  %v422_v13 = vsel %vm5228_vm3, %v417_v4, %v421_v48  ;;  %v521_v15 = vrot.slane %v519_v6, 4  ;;  %v527_v16 = vrot.slane %v525_v7, 5  ;;  %v5383_v48 = vld [vmem:[%s5216_s19 + $0x2c] sm:$0x1] }
  0x5c   : > { %v512_v14 = vor.u32 %v511_v5, %v508_v62  ;;  %4286 = vmatmul.msk.bf16.gmra.mxu0 %vm675_vm4, %v661_v9  ;;  %v432_v18 = vsel %vm5228_vm3, %v427_v10, %v431_v52  ;;  %v641_v19 = vunpack.c.l.b16 %v422_v13  ;;  %v605_v23 = vshll.u32 %v219_v8, 16  ;;  %v4526_v6 = vld [vmem:[%s5216_s19 + $0xc] sm:$0xf] }
  0x5d   : > { %v642_v24 = vunpack.c.l.b16 %v432_v18  ;;  %v522_v29 = vor.u32 %v521_v15, %v517_v11  ;;  %v611_v30 = vshll.u32 %v220_v12, 16  ;;  %v604_v31 = vrot.slane %v602_v22, 4 }
  0x5e   : > { %v513_v26 = vrot.slane %v512_v14, 4  ;;  %v607_v33 = vrot.slane %v605_v23, 5  ;;  %v615_v34 = vshrl.u32 %v220_v12, 16  ;;  %v621_v35 = vshll.u32 %v237_v17, 16  ;;  %v4527_v12 = vld [vmem:[%s5216_s19 + $0x10] sm:$0xf] }
  0x5f   : > { %v666_v38 = vpack.c.b16 %v642_v24, %v641_v19  ;;  %v523_v40 = vrot.slane %v522_v29, 4  ;;  %v613_v41 = vrot.slane %v611_v30, 5  ;;  %v1093_v43 = vrot.slane %v5244_v2, 5 }
  0x60   : > { %v518_v39 = vsel %vm5228_vm3, %v513_v26, %v517_v11  ;;  %v608_v45 = vor.u32 %v607_v33, %v604_v31  ;;  %v617_v46 = vrot.slane %v615_v34, 4  ;;  %v623_v50 = vrot.slane %v621_v35, 5  ;;  %v4672_v11 = vld [vmem:[%s6619_s1 + $0x18] sm:$0xf] }
  0x61   : > { %v649_v44 = vunpack.c.l.b16 %v518_v39  ;;  %4291 = vmatmul.msk.bf16.gmra.mxu1 %vm675_vm4, %v666_v38  ;;  %v528_v49 = vsel %vm5228_vm3, %v523_v40, %v527_v16  ;;  %v314_v51 = vshrl.u32 %v195_v37, 16  ;;  %v317_v52 = vshll.u32 %v195_v37, 16  ;;  %v4528_v38 = vld [vmem:[%s5216_s19 + $0x14] sm:$0x1] }
  0x62   : > { %v650_v53 = vunpack.c.l.b16 %v528_v49  ;;  %v609_v54 = vrot.slane %v608_v45, 4  ;;  %v618_v55 = vor.u32 %v617_v46, %v613_v41  ;;  %v323_v2 = vshll.u32 %v5379_v42, 16  ;;  %v4801_v45 = vld [vmem:[%s6619_s1 + $0x1c] sm:$0xf] }
  0x63   : > { %v316_v57 = vrot.slane %v314_v51, 4  ;;  %v319_v58 = vrot.slane %v317_v52, 5  ;;  %v327_v59 = vshrl.u32 %v5379_v42, 16  ;;  %v333_v60 = vshll.u32 %v5383_v48, 16  ;;  %v4872_v51 = vld [vmem:[%s5216_s19] sm:$0xff] }
  0x64   : > { %v670_v62 = vpack.c.b16 %v650_v53, %v649_v44  ;;  %v614_v3 = vsel %vm5228_vm3, %v609_v54, %v613_v41  ;;  %v619_v4 = vrot.slane %v618_v55, 4  ;;  %v325_v5 = vrot.slane %v323_v2, 5  ;;  %v4850_v2 = vld [vmem:[%s6619_s1 + $0x20] sm:$0xf] }
  0x65   : > { %v657_v7 = vunpack.c.l.b16 %v614_v3  ;;  %v320_v8 = vor.u32 %v319_v58, %v316_v57  ;;  %v329_v9 = vrot.slane %v327_v59, 4  ;;  %v335_v10 = vrot.slane %v333_v60, 5 }
  0x66   : > { %4295 = vmatmul.msk.bf16.gmra.mxu2 %vm675_vm4, %v670_v62  ;;  %v624_v13 = vsel %vm5228_vm3, %v619_v4, %v623_v50  ;;  %v4380_v14 = vrot.slane %v1037_v61, 9  ;;  %v1090_v19 = vrot.slane %v5241_v1, 5  ;;  %v2931_v22 = vsel %vm724_vm0, %v4672_v11, 0  ;;  %v4623_v50 = vld [vmem:[%s6619_s1 + $0x14] sm:$0xf] }
  0x67   : > { %v658_v15 = vunpack.c.l.b16 %v624_v13  ;;  %v321_v16 = vrot.slane %v320_v8, 4  ;;  %v330_v17 = vor.u32 %v329_v9, %v325_v5  ;;  %v1761_v23 = vshrl.u32 %v4526_v6, 16  ;;  %2940 = vmatpush.bf16.msra.mxu2 %v2931_v22  ;;  %v1038_v8 = vld [vmem:[%s5216_s19 + $0xc] sm:$0xe] }
  0x68   : > { %v1764_v24 = vshll.u32 %v4526_v6, 16  ;;  %v1770_v26 = vshll.u32 %v4527_v12, 16  ;;  %v1091_v33 = vsel %vm5402_vm7, %v4380_v14, %v1090_v19  ;;  %v1092_v35 = vrot.slane %v1090_v19, 4  ;;  %v4530_v6 = vld [vmem:[%s5216_s19 + $0x1c] sm:$0xf] }
  0x69   : > { %v674_v29 = vpack.c.b16 %v658_v15, %v657_v7  ;;  %v326_v30 = vsel %vm5228_vm3, %v321_v16, %v325_v5  ;;  %v331_v31 = vrot.slane %v330_v17, 4  ;;  %v1202_v37 = vunpack.c.l.b16 %v1091_v33  ;;  %v4529_v5 = vld [vmem:[%s5216_s19 + $0x18] sm:$0xf]  ;;  %v4888_v15 = vld [vmem:[%s5216_s19 + $0xc] sm:$0xff] }
  0x6a   : > { %v633_v34 = vunpack.c.l.b16 %v326_v30  ;;  %v1763_v1 = vrot.slane %v1761_v23, 4  ;;  %v1766_v40 = vrot.slane %v1764_v24, 5  ;;  %v1772_v41 = vrot.slane %v1770_v26, 5  ;;  %v4531_v30 = vld [vmem:[%s5216_s19 + $0x20] sm:$0x1] }
  0x6b   : > { %4299 = vmatmul.msk.bf16.gmra.mxu3 %vm675_vm4, %v674_v29  ;;  %v336_v39 = vsel %vm5228_vm3, %v331_v31, %v335_v10  ;;  %v1774_v44 = vshrl.u32 %v4527_v12, 16  ;;  %v1094_v49 = vsel %vm5402_vm7, %v1092_v35, %v1093_v43  ;;  %v1780_v55 = vshll.u32 %v4528_v38, 16  ;;  %v4873_v35 = vld [vmem:[%s5216_s19 + $0xc] sm:$0xff] }
  0x6c   : > { %v634_v46 = vunpack.c.l.b16 %v336_v39  ;;  %v1203_v52 = vunpack.c.l.b16 %v1094_v49  ;;  %v1767_v53 = vor.u32 %v1766_v40, %v1763_v1  ;;  %v3585_v58 = vsel %vm724_vm0, %v4801_v45, 0 }
  0x6d   : > { %v1776_v54 = vrot.slane %v1774_v44, 4  ;;  %3594 = vmatpush.bf16.msra.mxu3 %v3585_v58  ;;  %v2641_v60 = vsel %vm724_vm0, %v4623_v50, 0  ;;  %v3983_v61 = vsel %vm724_vm0, %v4850_v2, 0  ;;  %v1782_v4 = vrot.slane %v1780_v55, 5  ;;  %v1039_v50 = vld [vmem:[%s5216_s19 + $0x18] sm:$0xe] }
  0x6e   : > { %v662_v57 = vpack.c.b16 %v634_v46, %v633_v34  ;;  %v1234_v43 = vpack.c.b16 %v1203_v52, %v1202_v37  ;;  %2650 = vmatpush.bf16.msra.mxu1 %v2641_v60  ;;  %v1768_v62 = vrot.slane %v1767_v53, 4  ;;  %3992 = vmatpush.bf16.msra.mxu0 %v3983_v61  ;;  %v1097_v7 = vrot.slane %v5287_v28, 5  ;;  %v4533_v46 = vld [vmem:[%s5216_s19 + $0x28] sm:$0xf] }
  0x6f   : > { %v1777_v59 = vor.u32 %v1776_v54, %v1772_v41  ;;  %v1785_v9 = vshrl.u32 %v4529_v5, 16  ;;  %v1788_v10 = vshll.u32 %v4529_v5, 16  ;;  %v1794_v13 = vshll.u32 %v4530_v6, 16 }
  0x70   : > { %4287 = vmatmul.msk.bf16.gmra.mxu0 %vm675_vm4, %v662_v57  ;;  %v1773_v11 = vsel %vm5228_vm3, %v1768_v62, %v1772_v41  ;;  %v1798_v14 = vshrl.u32 %v4530_v6, 16  ;;  %v4381_v16 = vrot.slane %v1038_v8, 9  ;;  %v1099_v17 = vrot.slane %v1097_v7, 4  ;;  %v4532_v41 = vld [vmem:[%s5216_s19 + $0x24] sm:$0xf] }
  0x71   : > { %4364 = vmatmul.msk.bf16.vlgmr.msrb.gmra.mxu1 %vm675_vm4, %v4872_v51  ;;  %v1778_v3 = vrot.slane %v1777_v59, 4  ;;  %v1100_v28 = vrot.slane %v5290_v32, 5  ;;  %v2146_v19 = vunpack.c.l.b16 %v1773_v11  ;;  %v1787_v23 = vrot.slane %v1785_v9, 4  ;;  %v4534_v6 = vld [vmem:[%s5216_s19 + $0x2c] sm:$0x1] }
  0x72   : > { %v1790_v24 = vrot.slane %v1788_v10, 5  ;;  %v1796_v26 = vrot.slane %v1794_v13, 5  ;;  %v1800_v29 = vrot.slane %v1798_v14, 4  ;;  %v1098_v31 = vsel %vm5402_vm7, %v4381_v16, %v1097_v7 }
  0x73   : > { %v1783_v12 = vsel %vm5228_vm3, %v1778_v3, %v1782_v4  ;;  %v1101_v33 = vsel %vm5402_vm7, %v1099_v17, %v1100_v28  ;;  %v1804_v38 = vshll.u32 %v4531_v30, 16  ;;  %v1204_v1 = vunpack.c.l.b16 %v1098_v31 }
  0x74   : > { %v2147_v22 = vunpack.c.l.b16 %v1783_v12  ;;  %v1791_v32 = vor.u32 %v1790_v24, %v1787_v23  ;;  %v1801_v37 = vor.u32 %v1800_v29, %v1796_v26  ;;  %v1205_v39 = vunpack.c.l.b16 %v1101_v33  ;;  %v4874_v12 = vld [vmem:[%s5216_s19 + $0x18] sm:$0xff]  ;;  %v1040_v29 = vld [vmem:[%s5216_s19 + $0x24] sm:$0xe] }
  0x75   : > { %v1806_v45 = vrot.slane %v1804_v38, 5  ;;  %v1104_v51 = vrot.slane %v5333_v63, 5  ;;  %v1809_v52 = vshrl.u32 %v4532_v41, 16  ;;  %v1812_v54 = vshll.u32 %v4532_v41, 16 }
  0x76   : > { %4397 = vmatmul.msk.bf16.vlgmr.msrb.gmra.mxu2 %vm675_vm4, %v1234_v43  ;;  %v2178_v34 = vpack.c.b16 %v2147_v22, %v2146_v19  ;;  %v1792_v40 = vrot.slane %v1791_v32, 4  ;;  %v1802_v44 = vrot.slane %v1801_v37, 4  ;;  %v1235_v49 = vpack.c.b16 %v1205_v39, %v1204_v1  ;;  %v4889_v43 = vld [vmem:[%s5216_s19 + $0x18] sm:$0xff]  ;;  %v4535_v19 = vld [vmem:[%s5216_s19 + $0x30] sm:$0xf]  ;;  %v4890_v32 = vld [vmem:[%s5216_s19 + $0x24] sm:$0xff] }
  0x77   : > { %v1818_v55 = vshll.u32 %v4533_v46, 16  ;;  %v1822_v2 = vshrl.u32 %v4533_v46, 16  ;;  %v4382_v58 = vrot.slane %v1039_v50, 9  ;;  %v1106_v60 = vrot.slane %v1104_v51, 4  ;;  %v4536_v22 = vld [vmem:[%s5216_s19 + $0x34] sm:$0xf] }
  0x78   : > { %v1797_v53 = vsel %vm5228_vm3, %v1792_v40, %v1796_v26  ;;  %v1807_v57 = vsel %vm5228_vm3, %v1802_v44, %v1806_v45  ;;  %v1107_v63 = vrot.slane %v5336_v0, 5  ;;  %v1811_v61 = vrot.slane %v1809_v52, 4  ;;  %v4537_v45 = vld [vmem:[%s5216_s19 + $0x38] sm:$0x1] }
  0x79   : > { %v2148_v59 = vunpack.c.l.b16 %v1797_v53  ;;  %v2149_v62 = vunpack.c.l.b16 %v1807_v57  ;;  %v1814_v3 = vrot.slane %v1812_v54, 5  ;;  %v1820_v4 = vrot.slane %v1818_v55, 5  ;;  %v4539_v57 = vld [vmem:[%s5216_s19 + $0x40] sm:$0xf] }
  0x7a   : > { %v1824_v5 = vrot.slane %v1822_v2, 4  ;;  %v1105_v7 = vsel %vm5402_vm7, %v4382_v58, %v1104_v51  ;;  %v1108_v8 = vsel %vm5402_vm7, %v1106_v60, %v1107_v63  ;;  %v1828_v0 = vshll.u32 %v4534_v6, 16  ;;  %v4538_v2 = vld [vmem:[%s5216_s19 + $0x3c] sm:$0xf]  ;;  %v4983_v63 = vld [vmem:[%s5216_s19 + $0x34] sm:$0xf] }
  0x7b   : > { %4510 = vmatmul.msk.bf16.vlgmr.msrb.gmra.mxu3 %vm675_vm4, %v4888_v15  ;;  %v2179_v9 = vpack.c.b16 %v2149_v62, %v2148_v59  ;;  %v1815_v10 = vor.u32 %v1814_v3, %v1811_v61  ;;  %v1206_v13 = vunpack.c.l.b16 %v1105_v7  ;;  %v1207_v14 = vunpack.c.l.b16 %v1108_v8  ;;  %v1041_v62 = vld [vmem:[%s5216_s19 + $0x30] sm:$0xe] }
  0x7c   : > { %v1825_v11 = vor.u32 %v1824_v5, %v1820_v4  ;;  %v1830_v17 = vrot.slane %v1828_v0, 5  ;;  %v1111_v23 = vrot.slane %v5379_v42, 5  ;;  %v1833_v30 = vshrl.u32 %v4535_v19, 16  ;;  %v4984_v0 = vld [vmem:[%s5216_s19 + $0x38] sm:$0x1] }
  0x7d   : > { %v1816_v15 = vrot.slane %v1815_v10, 4  ;;  %v1236_v28 = vpack.c.b16 %v1207_v14, %v1206_v13  ;;  %v1836_v31 = vshll.u32 %v4535_v19, 16  ;;  %v1842_v33 = vshll.u32 %v4536_v22, 16  ;;  %v4891_v13 = vld [vmem:[%s5216_s19 + $0x30] sm:$0xff] }
  0x7e   : > { %v1826_v16 = vrot.slane %v1825_v11, 4  ;;  %v1113_v37 = vrot.slane %v1111_v23, 4  ;;  %v1114_v42 = vrot.slane %v5383_v48, 5  ;;  %v1835_v39 = vrot.slane %v1833_v30, 4  ;;  %v4875_v48 = vld [vmem:[%s5216_s19 + $0x24] sm:$0xff] }
  0x7f   : > { %v1821_v24 = vsel %vm5228_vm3, %v1816_v15, %v1820_v4  ;;  %v1838_v40 = vrot.slane %v1836_v31, 5  ;;  %v1844_v41 = vrot.slane %v1842_v33, 5  ;;  %v1852_v53 = vshll.u32 %v4537_v45, 16  ;;  %v4876_v33 = vld [vmem:[%s5216_s19 + $0x30] sm:$0xff] }
  0x80   : > { %4575 = vmatmul.msk.bf16.vlgmr.msrb.gmra.mxu0 %vm675_vm4, %v2178_v34  ;;  %v1831_v26 = vsel %vm5228_vm3, %v1826_v16, %v1830_v17  ;;  %v1846_v34 = vshrl.u32 %v4536_v22, 16  ;;  %v2150_v38 = vunpack.c.l.b16 %v1821_v24  ;;  %v1118_v61 = vrot.slane %v4983_v63, 5  ;;  %v4540_v22 = vld [vmem:[%s5216_s19 + $0x44] sm:$0x1] }
  0x81   : > { %4365 = vmatmul.msk.bf16.gmra.mxu1 %vm675_vm4, %v4873_v35  ;;  %v4383_v35 = vrot.slane %v1040_v29, 9  ;;  %v2151_v1 = vunpack.c.l.b16 %v1831_v26  ;;  %v1839_v51 = vor.u32 %v1838_v40, %v1835_v39  ;;  %v1854_v59 = vrot.slane %v1852_v53, 5  ;;  %v4541_v39 = vld [vmem:[%s5216_s19 + $0x48] sm:$0xf]  ;;  %v4542_v40 = vld [vmem:[%s5216_s19 + $0x4c] sm:$0xf] }
  0x82   : > { %v1848_v44 = vrot.slane %v1846_v34, 4  ;;  %v1857_v3 = vshrl.u32 %v4538_v2, 16  ;;  %v1860_v4 = vshll.u32 %v4538_v2, 16  ;;  %v1866_v5 = vshll.u32 %v4539_v57, 16  ;;  %v4892_v2 = vld [vmem:[%s5216_s19 + $0x3c] sm:$0xff] }
  0x83   : > { %v1112_v46 = vsel %vm5402_vm7, %v4383_v35, %v1111_v23  ;;  %v2180_v50 = vpack.c.b16 %v2151_v1, %v2150_v38  ;;  %v1840_v58 = vrot.slane %v1839_v51, 4  ;;  %v1870_v6 = vshrl.u32 %v4539_v57, 16 }
  0x84   : > { %v1849_v52 = vor.u32 %v1848_v44, %v1844_v41  ;;  %v1208_v54 = vunpack.c.l.b16 %v1112_v46  ;;  %v4384_v10 = vrot.slane %v1041_v62, 9  ;;  %v1120_v11 = vrot.slane %v1118_v61, 4 }
  0x85   : > { %v1845_v8 = vsel %vm5228_vm3, %v1840_v58, %v1844_v41  ;;  %v1859_v14 = vrot.slane %v1857_v3, 4  ;;  %v1862_v15 = vrot.slane %v1860_v4, 5  ;;  %v1868_v16 = vrot.slane %v1866_v5, 5  ;;  %v4543_v4 = vld [vmem:[%s5216_s19 + $0x50] sm:$0x1] }
  0x86   : > { %4398 = vmatmul.msk.bf16.gmra.mxu2 %vm675_vm4, %v1235_v49  ;;  %v1115_v49 = vsel %vm5402_vm7, %v1113_v37, %v1114_v42  ;;  %v1872_v17 = vrot.slane %v1870_v6, 4  ;;  %v1119_v23 = vsel %vm5402_vm7, %v4384_v10, %v1118_v61  ;;  %v1876_v30 = vshll.u32 %v4540_v22, 16 }
  0x87   : > { %v1209_v55 = vunpack.c.l.b16 %v1115_v49  ;;  %v1863_v26 = vor.u32 %v1862_v15, %v1859_v14  ;;  %v1881_v51 = vshrl.u32 %v4541_v39, 16  ;;  %v1890_v53 = vshll.u32 %v4542_v40, 16 }
  0x88   : > { %v1873_v29 = vor.u32 %v1872_v17, %v1868_v16  ;;  %v1878_v1 = vrot.slane %v1876_v30, 5 }
  0x89   : > { %v1237_v60 = vpack.c.b16 %v1209_v55, %v1208_v54  ;;  %v1864_v42 = vrot.slane %v1863_v26, 4  ;;  %v1894_v54 = vshrl.u32 %v4542_v40, 16  ;;  %v1892_v62 = vrot.slane %v1890_v53, 5 }
  0x8a   : > { %v1874_v38 = vrot.slane %v1873_v29, 4  ;;  %v1132_v26 = vrot.slane %v5300_v47, 5 }
  0x8b   : > { %4511 = vmatmul.msk.bf16.gmra.mxu3 %vm675_vm4, %v4889_v43  ;;  %v1850_v43 = vrot.slane %v1849_v52, 4  ;;  %v1869_v45 = vsel %vm5228_vm3, %v1864_v42, %v1868_v16  ;;  %v1884_v52 = vshll.u32 %v4541_v39, 16  ;;  %v1896_v3 = vrot.slane %v1894_v54, 4  ;;  %v4546_v54 = vld [vmem:[%s5216_s19 + $0x5c] sm:$0x1] }
  0x8c   : > { %v1879_v46 = vsel %vm5228_vm3, %v1874_v38, %v1878_v1  ;;  %v2154_v55 = vunpack.c.l.b16 %v1869_v45  ;;  %v4893_v1 = vld [vmem:[%s5216_s19 + $0x48] sm:$0xff]  ;;  %v1134_v40 = vrot.slane %v1132_v26, 4 }
  0x8d   : > { %v2155_v57 = vunpack.c.l.b16 %v1879_v46  ;;  %v1886_v61 = vrot.slane %v1884_v52, 5  ;;  %v1897_v10 = vor.u32 %v1896_v3, %v1892_v62 }
  0x8f   : > { %v1898_v16 = vrot.slane %v1897_v10, 4 }
  0x90   : > { %4576 = vmatmul.msk.bf16.gmra.mxu0 %vm675_vm4, %v2179_v9  ;;  %v1855_v9 = vsel %vm5228_vm3, %v1850_v43, %v1854_v59 }
  0x91   : > { %4366 = vmatmul.msk.bf16.gmra.mxu1 %vm675_vm4, %v4874_v12  ;;  %v1121_v12 = vrot.slane %v4984_v0, 5  ;;  %v2153_v19 = vunpack.c.l.b16 %v1855_v9 }
  0x93   : > { %v1122_v24 = vsel %vm5402_vm7, %v1120_v11, %v1121_v12  ;;  %v1900_v11 = vshll.u32 %v4543_v4, 16  ;;  %v4877_v12 = vld [vmem:[%s5216_s19 + $0x3c] sm:$0xff] }
  0x94   : > { %v1211_v35 = vunpack.c.l.b16 %v1122_v24  ;;  %v4545_v24 = vld [vmem:[%s5216_s19 + $0x58] sm:$0xf]  ;;  %v4547_v4 = vld [vmem:[%s5216_s19 + $0x60] sm:$0xf] }
  0x95   : > { %v1902_v17 = vrot.slane %v1900_v11, 5  ;;  %v1918_v42 = vshrl.u32 %v4545_v24, 16 }
  0x96   : > { %4399 = vmatmul.msk.bf16.gmra.mxu2 %vm675_vm4, %v1236_v28  ;;  %v2152_v28 = vunpack.c.l.b16 %v1845_v8  ;;  %v2182_v8 = vpack.c.b16 %v2155_v57, %v2154_v55 }
  0x97   : > { %v1903_v30 = vsel %vm5228_vm3, %v1898_v16, %v1902_v17  ;;  %v1920_v52 = vrot.slane %v1918_v42, 4 }
  0x98   : > { %v2181_v31 = vpack.c.b16 %v2153_v19, %v2152_v28  ;;  %v2157_v46 = vunpack.c.l.b16 %v1903_v30 }
  0x9b   : > { %4512 = vmatmul.msk.bf16.gmra.mxu3 %vm675_vm4, %v4890_v32  ;;  %v1210_v32 = vunpack.c.l.b16 %v1119_v23  ;;  %v4544_v23 = vld [vmem:[%s5216_s19 + $0x54] sm:$0xf] }
  0x9d   : > { %v1238_v44 = vpack.c.b16 %v1211_v35, %v1210_v32  ;;  %v1908_v32 = vshll.u32 %v4544_v23, 16  ;;  %v1914_v35 = vshll.u32 %v4545_v24, 16 }
  0xa0   : > { %4577 = vmatmul.msk.bf16.gmra.mxu0 %vm675_vm4, %v2180_v50  ;;  %v1125_v50 = vrot.slane %v5256_v20, 5  ;;  %v1883_v20 = vrot.slane %v1881_v51, 4  ;;  %v1916_v51 = vrot.slane %v1914_v35, 5  ;;  %v1142_v35 = vrot.slane %v5351_v27, 5 }
  0xa1   : > { %4367 = vmatmul.msk.bf16.gmra.mxu1 %vm675_vm4, %v4875_v48  ;;  %v1042_v48 = vld [vmem:[%s5216_s19 + $0x3c] sm:$0xe] }
  0xa2   : > { %v4385_v43 = vrot.slane %v1042_v48, 9  ;;  %v1127_v59 = vrot.slane %v1125_v50, 4  ;;  %v1910_v48 = vrot.slane %v1908_v32, 5 }
  0xa4   : > { %v1126_v5 = vsel %vm5402_vm7, %v4385_v43, %v1125_v50  ;;  %v4878_v43 = vld [vmem:[%s5216_s19 + $0x48] sm:$0xff] }
  0xa6   : > { %v5497_v7 = vpop.f32.mrf.mxu1  ;;  %4400 = vmatmul.msk.bf16.gmra.mxu2 %vm675_vm4, %v1237_v60  ;;  %v1128_v60 = vrot.slane %v5261_v25, 5  ;;  %v1887_v25 = vor.u32 %v1886_v61, %v1883_v20  ;;  %v1924_v20 = vshll.u32 %v4546_v54, 16  ;;  %v4879_v54 = vld [vmem:[%s5216_s19 + $0x54] sm:$0xff] }
  0xa8   : > { %v1129_v6 = vsel %vm5402_vm7, %v1127_v59, %v1128_v60  ;;  %v1888_v15 = vrot.slane %v1887_v25, 4  ;;  %v1921_v60 = vor.u32 %v1920_v52, %v1916_v51  ;;  %v1926_v10 = vrot.slane %v1924_v20, 5 }
  0xa9   : > { %v1213_v14 = vunpack.c.l.b16 %v1129_v6 }
  0xaa   : > { %v1893_v29 = vsel %vm5228_vm3, %v1888_v15, %v1892_v62  ;;  %v1922_v25 = vrot.slane %v1921_v60, 4  ;;  %v1139_v15 = vrot.slane %v5346_v21, 5 }
  0xab   : > { %4513 = vmatmul.msk.bf16.gmra.mxu3 %vm675_vm4, %v4891_v13  ;;  %v1212_v13 = vunpack.c.l.b16 %v1126_v5  ;;  %v2156_v45 = vunpack.c.l.b16 %v1893_v29  ;;  %v4548_v5 = vld [vmem:[%s5216_s19 + $0x64] sm:$0xf] }
  0xac   : > { %v1942_v16 = vshrl.u32 %v4548_v5, 16  ;;  %v1927_v24 = vsel %vm5228_vm3, %v1922_v25, %v1926_v10  ;;  %v1141_v32 = vrot.slane %v1139_v15, 4  ;;  %v4985_v10 = vld [vmem:[%s5216_s19 + $0x64] sm:$0xf] }
  0xad   : > { %v1239_v19 = vpack.c.b16 %v1213_v14, %v1212_v13  ;;  %v2183_v57 = vpack.c.b16 %v2157_v46, %v2156_v45  ;;  %v1932_v13 = vshll.u32 %v4547_v4, 16  ;;  %v1938_v14 = vshll.u32 %v4548_v5, 16 }
  0xae   : > { %v5513_v34 = vpop.f32.mrf.mxu1  ;;  %v1944_v42 = vrot.slane %v1942_v16, 4 }
  0xaf   : > { %v1934_v30 = vrot.slane %v1932_v13, 5  ;;  %v1045_v13 = vld [vmem:[%s5216_s19 + $0x60] sm:$0xe] }
  0xb0   : > { %v5515_v37 = vpop.f32.mrf.mxu2  ;;  %4578 = vmatmul.msk.bf16.gmra.mxu0 %vm675_vm4, %v2181_v31  ;;  %v1043_v31 = vld [vmem:[%s5216_s19 + $0x48] sm:$0xe] }
  0xb1   : > { %4368 = vmatmul.msk.bf16.gmra.mxu1 %vm675_vm4, %v4876_v33  ;;  %v1905_v33 = vshrl.u32 %v4544_v23, 16  ;;  %v4386_v47 = vrot.slane %v1043_v31, 9  ;;  %v1940_v31 = vrot.slane %v1938_v14, 5 }
  0xb3   : > { %v5521_v41 = vpop.f32.mrf.mxu0  ;;  %v1907_v50 = vrot.slane %v1905_v33, 4  ;;  %v4894_v33 = vld [vmem:[%s5216_s19 + $0x54] sm:$0xff]  ;;  %v1945_v27 = vor.u32 %v1944_v42, %v1940_v31 }
  0xb4   : > { %v5527_v49 = vpop.f32.mrf.mxu3 }
  0xb5   : > { %v1911_v59 = vor.u32 %v1910_v48, %v1907_v50  ;;  %v1143_v48 = vsel %vm5402_vm7, %v1141_v32, %v1142_v35  ;;  %v1946_v60 = vrot.slane %v1945_v27, 4 }
  0xb6   : > { %4401 = vmatmul.msk.bf16.gmra.mxu2 %vm675_vm4, %v1238_v44  ;;  %v1135_v44 = vrot.slane %v5305_v56, 5 }
  0xb8   : > { %v5533_v58 = vpop.f32.mrf.mxu1  ;;  %v5536_v63 = vpop.f32.mrf.mxu2  ;;  %v1136_v56 = vsel %vm5402_vm7, %v1134_v40, %v1135_v44  ;;  %v4549_v40 = vld [vmem:[%s5216_s19 + $0x68] sm:$0x1] }
  0xb9   : > { %v1215_v62 = vunpack.c.l.b16 %v1136_v56 }
  0xbb   : > { %4514 = vmatmul.msk.bf16.gmra.mxu3 %vm675_vm4, %v4892_v2  ;;  %v5544_v9 = vpop.f32.mrf.mxu0  ;;  %v1133_v2 = vsel %vm5402_vm7, %v4386_v47, %v1132_v26  ;;  %v2159_v47 = vunpack.c.l.b16 %v1927_v24 }
  0xbc   : > { %v5546_v0 = vpop.f32.mrf.mxu3  ;;  %v1214_v61 = vunpack.c.l.b16 %v1133_v2 }
  0xbe   : > { %v1240_v11 = vpack.c.b16 %v1215_v62, %v1214_v61  ;;  %v4550_v61 = vld [vmem:[%s5216_s19 + $0x6c] sm:$0xf]  ;;  %v4551_v62 = vld [vmem:[%s5216_s19 + $0x70] sm:$0xf] }
  0xbf   : > { %v1953_v14 = vshrl.u32 %v4550_v61, 16  ;;  %v1962_v16 = vshll.u32 %v4551_v62, 16 }
  0xc0   : > { %4579 = vmatmul.msk.bf16.gmra.mxu0 %vm675_vm4, %v2182_v8  ;;  %v5550_v28 = vpop.f32.mrf.mxu1  ;;  %v1912_v8 = vrot.slane %v1911_v59, 4 }
  0xc1   : > { %4369 = vmatmul.msk.bf16.gmra.mxu1 %vm675_vm4, %v4877_v12  ;;  %v1929_v12 = vshrl.u32 %v4547_v4, 16  ;;  %v1955_v35 = vrot.slane %v1953_v14, 4  ;;  %v4554_v14 = vld [vmem:[%s5216_s19 + $0x7c] sm:$0xf] }
  0xc2   : > { %v1917_v23 = vsel %vm5228_vm3, %v1912_v8, %v1916_v51  ;;  %v1948_v51 = vshll.u32 %v4549_v40, 16 }
  0xc3   : > { %v5553_v22 = vpop.f32.mrf.mxu2  ;;  %v1931_v29 = vrot.slane %v1929_v12, 4 }
  0xc4   : > { %v1950_v20 = vrot.slane %v1948_v51, 5 }
  0xc5   : > { %v1935_v46 = vor.u32 %v1934_v30, %v1931_v29  ;;  %v4895_v30 = vld [vmem:[%s5216_s19 + $0x60] sm:$0xff] }
  0xc6   : > { %4402 = vmatmul.msk.bf16.gmra.mxu2 %vm675_vm4, %v1239_v19  ;;  %v1044_v19 = vld [vmem:[%s5216_s19 + $0x54] sm:$0xe]  ;;  %v1951_v25 = vsel %vm5228_vm3, %v1946_v60, %v1950_v20 }
  0xc7   : > { %v5563_v38 = vpop.f32.mrf.mxu0  ;;  %v4387_v21 = vrot.slane %v1044_v19, 9  ;;  %v1936_v59 = vrot.slane %v1935_v46, 4  ;;  %v1966_v19 = vshrl.u32 %v4551_v62, 16  ;;  %v4552_v46 = vld [vmem:[%s5216_s19 + $0x74] sm:$0x1] }
  0xc8   : > { %v5567_v39 = vpop.f32.mrf.mxu3 }
  0xc9   : > { %v1140_v50 = vsel %vm5402_vm7, %v4387_v21, %v1139_v15  ;;  %v1941_v8 = vsel %vm5228_vm3, %v1936_v59, %v1940_v31  ;;  %v1956_v15 = vshll.u32 %v4550_v61, 16  ;;  %v4388_v21 = vrot.slane %v1045_v13, 9  ;;  %v4553_v13 = vld [vmem:[%s5216_s19 + $0x78] sm:$0xf] }
  0xca   : > { %v5570_v53 = vpop.f32.mrf.mxu1  ;;  %v1216_v56 = vunpack.c.l.b16 %v1140_v50  ;;  %v2160_v31 = vunpack.c.l.b16 %v1941_v8 }
  0xcb   : > { %4515 = vmatmul.msk.bf16.gmra.mxu3 %vm675_vm4, %v4893_v1  ;;  %v5574_v55 = vpop.f32.mrf.mxu2  ;;  %v2158_v1 = vunpack.c.l.b16 %v1917_v23  ;;  %v4986_v23 = vld [vmem:[%s5216_s19 + $0x68] sm:$0x1]  ;;  %v1958_v42 = vrot.slane %v1956_v15, 5  ;;  %v4987_v15 = vld [vmem:[%s5216_s19 + $0x70] sm:$0xf] }
  0xcc   : > { %v1149_v24 = vrot.slane %v4986_v23, 5  ;;  %v1046_v23 = vld [vmem:[%s5216_s19 + $0x6c] sm:$0xe] }
  0xcd   : > { %v2184_v52 = vpack.c.b16 %v2159_v47, %v2158_v1  ;;  %v1964_v1 = vrot.slane %v1962_v16, 5  ;;  %v1968_v47 = vrot.slane %v1966_v19, 4  ;;  %v1959_v51 = vor.u32 %v1958_v42, %v1955_v35  ;;  %v4988_v42 = vld [vmem:[%s5216_s19 + $0x74] sm:$0x1] }
  0xce   : > { %v1153_v16 = vrot.slane %v4987_v15, 5 }
  0xcf   : > { %v5581_v3 = vpop.f32.mrf.mxu0 }
  0xd0   : > { %4580 = vmatmul.msk.bf16.gmra.mxu0 %vm675_vm4, %v2183_v57  ;;  %v5586_v6 = vpop.f32.mrf.mxu3  ;;  %v1217_v57 = vunpack.c.l.b16 %v1143_v48 }
  0xd1   : > { %4370 = vmatmul.msk.bf16.gmra.mxu1 %vm675_vm4, %v4878_v43 }
  0xd2   : > { %v5590_v17 = vpop.f32.mrf.mxu1  ;;  %v1241_v4 = vpack.c.b16 %v1217_v57, %v1216_v56  ;;  %v4880_v57 = vld [vmem:[%s5216_s19 + $0x60] sm:$0xff] }
  0xd6   : > { %v5597_v26 = vpop.f32.mrf.mxu2  ;;  %4403 = vmatmul.msk.bf16.gmra.mxu2 %vm675_vm4, %v1240_v11  ;;  %v1146_v11 = vrot.slane %v4985_v10, 5 }
  0xd8   : > { %v1148_v32 = vrot.slane %v1146_v11, 4  ;;  %v1147_v50 = vsel %vm5402_vm7, %v4388_v21, %v1146_v11  ;;  %v1990_v21 = vshrl.u32 %v4554_v14, 16 }
  0xd9   : > { %v5603_v44 = vpop.f32.mrf.mxu0  ;;  %v1218_v20 = vunpack.c.l.b16 %v1147_v50  ;;  %v4389_v50 = vrot.slane %v1046_v23, 9 }
  0xda   : > { %v5605_v45 = vpop.f32.mrf.mxu3  ;;  %v1150_v48 = vsel %vm5402_vm7, %v1148_v32, %v1149_v24 }
  0xdb   : > { %4516 = vmatmul.msk.bf16.gmra.mxu3 %vm675_vm4, %v4894_v33  ;;  %v2161_v33 = vunpack.c.l.b16 %v1951_v25  ;;  %v1219_v61 = vunpack.c.l.b16 %v1150_v48  ;;  %v1155_v48 = vrot.slane %v1153_v16, 4 }
  0xdd   : > { %v2185_v27 = vpack.c.b16 %v2161_v33, %v2160_v31  ;;  %v1242_v11 = vpack.c.b16 %v1219_v61, %v1218_v20  ;;  %v1980_v31 = vshll.u32 %v4553_v13, 16  ;;  %v1986_v33 = vshll.u32 %v4554_v14, 16 }
  0xde   : > { %v5613_v2 = vpop.f32.mrf.mxu1  ;;  %v5615_v43 = vpop.f32.mrf.mxu2  ;;  %v1992_v20 = vrot.slane %v1990_v21, 4 }
  0xe0   : > { %4581 = vmatmul.msk.bf16.gmra.mxu0 %vm675_vm4, %v2184_v52  ;;  %v1969_v52 = vor.u32 %v1968_v47, %v1964_v1  ;;  %v1156_v47 = vrot.slane %v4988_v42, 5 }
  0xe1   : > { %4371 = vmatmul.msk.bf16.gmra.mxu1 %vm675_vm4, %v4879_v54  ;;  %v5621_v5 = vpop.f32.mrf.mxu0  ;;  %v1972_v54 = vshll.u32 %v4552_v46, 16  ;;  %v4896_v46 = vld [vmem:[%s5216_s19 + $0x6c] sm:$0xff] }
  0xe2   : > { %v5628_v12 = vpop.f32.mrf.mxu3  ;;  %v1970_v8 = vrot.slane %v1969_v52, 4 }
  0xe3   : > { %v1974_v25 = vrot.slane %v1972_v54, 5 }
  0xe6   : > { %4404 = vmatmul.msk.bf16.gmra.mxu2 %vm675_vm4, %v1241_v4  ;;  %v5633_v29 = vpop.f32.mrf.mxu1  ;;  %v1960_v4 = vrot.slane %v1959_v51, 4 }
  0xe8   : > { %v1965_v19 = vsel %vm5228_vm3, %v1960_v4, %v1964_v1  ;;  %v4555_v4 = vld [vmem:[%s5216_s19 + $0x80] sm:$0x1] }
  0xe9   : > { %v5636_v40 = vpop.f32.mrf.mxu2 }
  0xeb   : > { %4517 = vmatmul.msk.bf16.gmra.mxu3 %vm675_vm4, %v4895_v30  ;;  %v1977_v30 = vshrl.u32 %v4553_v13, 16  ;;  %v4881_v13 = vld [vmem:[%s5216_s19 + $0x6c] sm:$0xff] }
  0xed   : > { %v5644_v56 = vpop.f32.mrf.mxu0  ;;  %v1979_v54 = vrot.slane %v1977_v30, 4 }
  0xee   : > { %v5647_v59 = vpop.f32.mrf.mxu3  ;;  %v957_v60 = vpop.f32.mrf.mxu1 }
  0xef   : > { %v958_v62 = vadd.f32 %v957_v60, %v5521_v41  ;;  %v1975_v41 = vsel %vm5228_vm3, %v1970_v8, %v1974_v25  ;;  %v1988_v60 = vrot.slane %v1986_v33, 5  ;;  %v1154_v8 = vsel %vm5402_vm7, %v4389_v50, %v1153_v16 }
  0xf0   : > { %4582 = vmatmul.msk.bf16.gmra.mxu0 %vm675_vm4, %v2185_v27  ;;  %v2162_v27 = vunpack.c.l.b16 %v1965_v19  ;;  %v2163_v51 = vunpack.c.l.b16 %v1975_v41  ;;  %v1996_v19 = vshll.u32 %v4555_v4, 16 }
  0xf1   : > { %v5651_v10 = vpop.f32.mrf.mxu2  ;;  %4372 = vmatmul.msk.bf16.gmra.mxu1 %vm675_vm4, %v4880_v57  ;;  %v1982_v57 = vrot.slane %v1980_v31, 5  ;;  %v1993_v15 = vor.u32 %v1992_v20, %v1988_v60 }
  0xf2   : > { %v2186_v25 = vpack.c.b16 %v2163_v51, %v2162_v27  ;;  %v1998_v42 = vrot.slane %v1996_v19, 5  ;;  %v4557_v27 = vld [vmem:[%s5216_s19 + $0x88] sm:$0xf]  ;;  %v4989_v51 = vld [vmem:[%s5216_s19 + $0x7c] sm:$0xf] }
  0xf3   : > { %v1983_v14 = vor.u32 %v1982_v57, %v1979_v54  ;;  %v1047_v54 = vld [vmem:[%s5216_s19 + $0x78] sm:$0xe] }
  0xf5   : > { %v5662_v24 = vpop.f32.mrf.mxu0  ;;  %v1984_v21 = vrot.slane %v1983_v14, 4 }
  0xf6   : > { %v5664_v32 = vpop.f32.mrf.mxu3  ;;  %4405 = vmatmul.msk.bf16.gmra.mxu2 %vm675_vm4, %v1242_v11  ;;  %v959_v35 = vpop.f32.mrf.mxu1 }
  0xf7   : > { %v960_v1 = vadd.f32 %v959_v35, %v5544_v9  ;;  %v1157_v9 = vsel %vm5402_vm7, %v1155_v48, %v1156_v47  ;;  %v1994_v35 = vrot.slane %v1993_v15, 4  ;;  %v4556_v47 = vld [vmem:[%s5216_s19 + $0x84] sm:$0xf]  ;;  %v4897_v15 = vld [vmem:[%s5216_s19 + $0x78] sm:$0xff] }
  0xf8   : > { %v1221_v30 = vunpack.c.l.b16 %v1157_v9  ;;  %v2004_v57 = vshll.u32 %v4556_v47, 16  ;;  %v2014_v9 = vshrl.u32 %v4557_v27, 16 }
  0xf9   : > { %v1310_v52 = vpop.f32.mrf.mxu2  ;;  %v1999_v4 = vsel %vm5228_vm3, %v1994_v35, %v1998_v42 }
  0xfa   : > { %v1390_v61 = vadd.f32 %v1310_v52, %v958_v62  ;;  %v1220_v62 = vunpack.c.l.b16 %v1154_v8  ;;  %v1160_v52 = vrot.slane %v4989_v51, 5  ;;  %v2010_v8 = vshll.u32 %v4557_v27, 16 }
  0xfb   : > { %4518 = vmatmul.msk.bf16.gmra.mxu3 %vm675_vm4, %v4896_v46  ;;  %v2016_v35 = vrot.slane %v2014_v9, 4 }
  0xfc   : > { %v1243_v48 = vpack.c.b16 %v1221_v30, %v1220_v62 }
  0xfd   : > { %v2254_v11 = vpop.f32.mrf.mxu0 }
  0xfe   : > { %v1600_v41 = vpop.f32.mrf.mxu3  ;;  %v962_v23 = vpop.f32.mrf.mxu1 }
  0xff   : > { %v1680_v31 = vadd.f32 %v1600_v41, %v1390_v61  ;;  %v963_v16 = vadd.f32 %v962_v23, %v5563_v38  ;;  %v2001_v38 = vshrl.u32 %v4556_v47, 16  ;;  %v1989_v61 = vsel %vm5228_vm3, %v1984_v21, %v1988_v60 }
 0x100   : > { %4583 = vmatmul.msk.bf16.gmra.mxu0 %vm675_vm4, %v2186_v25  ;;  %v4990_v25 = vld [vmem:[%s5216_s19 + $0x80] sm:$0x1]  ;;  %v4390_v41 = vrot.slane %v1047_v54, 9  ;;  %v1162_v23 = vrot.slane %v1160_v52, 4  ;;  %v2164_v62 = vunpack.c.l.b16 %v1989_v61  ;;  %v2165_v60 = vunpack.c.l.b16 %v1999_v4 }
 0x101   : > { %v1312_v33 = vpop.f32.mrf.mxu2  ;;  %4373 = vmatmul.msk.bf16.gmra.mxu1 %vm675_vm4, %v4881_v13  ;;  %v5681_v46 = vadd.f32 %v2254_v11, %v1680_v31  ;;  %v1163_v11 = vrot.slane %v4990_v25, 5  ;;  %v2003_v30 = vrot.slane %v2001_v38, 4  ;;  %v2006_v31 = vrot.slane %v2004_v57, 5  ;;  %v4882_v38 = vld [vmem:[%s5216_s19 + $0x78] sm:$0xff] }
 0x102   : > { %v1391_v50 = vadd.f32 %v1312_v33, %v960_v1  ;;  %v2012_v21 = vrot.slane %v2010_v8, 5  ;;  %v2187_v27 = vpack.c.b16 %v2165_v60, %v2164_v62  ;;  %v4560_v62 = vld [vmem:[%s5216_s19 + $0x94] sm:$0xf]  ;;  %v4991_v60 = vld [vmem:[%s5216_s19 + $0x88] sm:$0xf] }
 0x103   : > { %v2007_v51 = vor.u32 %v2006_v31, %v2003_v30  ;;  %v1167_v30 = vrot.slane %v4991_v60, 5  ;;  %v1048_v31 = vld [vmem:[%s5216_s19 + $0x84] sm:$0xe] }
 0x104   : > { %v2017_v57 = vor.u32 %v2016_v35, %v2012_v21 }
 0x105   : > { %v2256_v20 = vpop.f32.mrf.mxu0  ;;  %v2008_v25 = vrot.slane %v2007_v51, 4 }
 0x106   : > { %v1602_v1 = vpop.f32.mrf.mxu3  ;;  %4406 = vmatmul.msk.bf16.gmra.mxu2 %vm675_vm4, %v1243_v48  ;;  %v964_v13 = vpop.f32.mrf.mxu1  ;;  %v4558_v48 = vld [vmem:[%s5216_s19 + $0x8c] sm:$0x1] }
 0x107   : > { %v1681_v14 = vadd.f32 %v1602_v1, %v1391_v50  ;;  %v965_v19 = vadd.f32 %v964_v13, %v5581_v3  ;;  %v1161_v50 = vsel %vm5402_vm7, %v4390_v41, %v1160_v52  ;;  %v1164_v3 = vsel %vm5402_vm7, %v1162_v23, %v1163_v11 }
 0x108   : > { %v2020_v61 = vshll.u32 %v4558_v48, 16  ;;  %v1223_v8 = vunpack.c.l.b16 %v1164_v3  ;;  %v2018_v1 = vrot.slane %v2017_v57, 4  ;;  %v2038_v3 = vshrl.u32 %v4560_v62, 16  ;;  %v4898_v57 = vld [vmem:[%s5216_s19 + $0x84] sm:$0xff] }
 0x109   : > { %v1315_v33 = vpop.f32.mrf.mxu2  ;;  %v5694_v42 = vadd.f32 %v2256_v20, %v1681_v14  ;;  %v4559_v14 = vld [vmem:[%s5216_s19 + $0x90] sm:$0xf] }
 0x10a   : > { %v1392_v47 = vadd.f32 %v1315_v33, %v963_v16  ;;  %v1222_v16 = vunpack.c.l.b16 %v1161_v50  ;;  %v2022_v13 = vrot.slane %v2020_v61, 5  ;;  %v2025_v33 = vshrl.u32 %v4559_v14, 16 }
 0x10b   : > { %4519 = vmatmul.msk.bf16.gmra.mxu3 %vm675_vm4, %v4897_v15  ;;  %v2028_v48 = vshll.u32 %v4559_v14, 16  ;;  %v2034_v50 = vshll.u32 %v4560_v62, 16  ;;  %v4391_v61 = vrot.slane %v1048_v31, 9 }
 0x10c   : > { %v1244_v23 = vpack.c.b16 %v1223_v8, %v1222_v16  ;;  %v2027_v8 = vrot.slane %v2025_v33, 4 }
 0x10d   : > { %v2259_v54 = vpop.f32.mrf.mxu0 }
 0x10e   : > { %v1605_v4 = vpop.f32.mrf.mxu3  ;;  %v967_v20 = vpop.f32.mrf.mxu1 }
 0x10f   : > { %v1682_v9 = vadd.f32 %v1605_v4, %v1392_v47  ;;  %v968_v52 = vadd.f32 %v967_v20, %v5603_v44  ;;  %v2013_v44 = vsel %vm5228_vm3, %v2008_v25, %v2012_v21  ;;  %v2023_v47 = vsel %vm5228_vm3, %v2018_v1, %v2022_v13 }
 0x110   : > { %4584 = vmatmul.msk.bf16.gmra.mxu0 %vm675_vm4, %v2187_v27  ;;  %v4992_v27 = vld [vmem:[%s5216_s19 + $0x8c] sm:$0x1]  ;;  %v1169_v4 = vrot.slane %v1167_v30, 4  ;;  %v2166_v20 = vunpack.c.l.b16 %v2013_v44  ;;  %v2167_v16 = vunpack.c.l.b16 %v2023_v47  ;;  %v2030_v25 = vrot.slane %v2028_v48, 5  ;;  %v4883_v44 = vld [vmem:[%s5216_s19 + $0x84] sm:$0xff] }
 0x111   : > { %v1317_v11 = vpop.f32.mrf.mxu2  ;;  %4374 = vmatmul.msk.bf16.gmra.mxu1 %vm675_vm4, %v4882_v38  ;;  %v5707_v15 = vadd.f32 %v2259_v54, %v1682_v9  ;;  %v1170_v51 = vrot.slane %v4992_v27, 5  ;;  %v2040_v1 = vrot.slane %v2038_v3, 4 }
 0x112   : > { %v1393_v41 = vadd.f32 %v1317_v11, %v965_v19  ;;  %v2036_v11 = vrot.slane %v2034_v50, 5  ;;  %v2188_v62 = vpack.c.b16 %v2167_v16, %v2166_v20  ;;  %v2031_v31 = vor.u32 %v2030_v25, %v2027_v8  ;;  %v4563_v20 = vld [vmem:[%s5216_s19 + $0xa0] sm:$0xf]  ;;  %v4993_v16 = vld [vmem:[%s5216_s19 + $0x94] sm:$0xf] }
 0x113   : > { %v1174_v8 = vrot.slane %v4993_v16, 5 }
 0x114   : > { %v2041_v33 = vor.u32 %v2040_v1, %v2036_v11 }
 0x115   : > { %v2261_v35 = vpop.f32.mrf.mxu0 }
 0x116   : > { %v1607_v19 = vpop.f32.mrf.mxu3  ;;  %4407 = vmatmul.msk.bf16.gmra.mxu2 %vm675_vm4, %v1244_v23  ;;  %v969_v54 = vpop.f32.mrf.mxu1  ;;  %v4561_v23 = vld [vmem:[%s5216_s19 + $0x98] sm:$0x1] }
 0x117   : > { %v1683_v38 = vadd.f32 %v1607_v19, %v1393_v41  ;;  %v970_v21 = vadd.f32 %v969_v54, %v5621_v5  ;;  %v1168_v41 = vsel %vm5402_vm7, %v4391_v61, %v1167_v30  ;;  %v1171_v5 = vsel %vm5402_vm7, %v1169_v4, %v1170_v51 }
 0x118   : > { %v2044_v47 = vshll.u32 %v4561_v23, 16  ;;  %v1225_v50 = vunpack.c.l.b16 %v1171_v5  ;;  %v2032_v51 = vrot.slane %v2031_v31, 4  ;;  %v2042_v19 = vrot.slane %v2041_v33, 4  ;;  %v4899_v33 = vld [vmem:[%s5216_s19 + $0x90] sm:$0xff] }
 0x119   : > { %v1320_v9 = vpop.f32.mrf.mxu2  ;;  %v5720_v13 = vadd.f32 %v2261_v35, %v1683_v38  ;;  %v4562_v38 = vld [vmem:[%s5216_s19 + $0x9c] sm:$0xf]  ;;  %v2062_v5 = vshrl.u32 %v4563_v20, 16 }
 0x11a   : > { %v1394_v14 = vadd.f32 %v1320_v9, %v968_v52  ;;  %v1224_v52 = vunpack.c.l.b16 %v1168_v41  ;;  %v2046_v54 = vrot.slane %v2044_v47, 5  ;;  %v1049_v9 = vld [vmem:[%s5216_s19 + $0x90] sm:$0xe]  ;;  %v2052_v25 = vshll.u32 %v4562_v38, 16 }
 0x11b   : > { %4520 = vmatmul.msk.bf16.gmra.mxu3 %vm675_vm4, %v4898_v57  ;;  %v2058_v41 = vshll.u32 %v4563_v20, 16 }
 0x11c   : > { %v1245_v4 = vpack.c.b16 %v1225_v50, %v1224_v52  ;;  %v2047_v23 = vsel %vm5228_vm3, %v2042_v19, %v2046_v54  ;;  %v2064_v19 = vrot.slane %v2062_v5, 4 }
 0x11d   : > { %v2264_v60 = vpop.f32.mrf.mxu0 }
 0x11e   : > { %v1610_v48 = vpop.f32.mrf.mxu3  ;;  %v972_v35 = vpop.f32.mrf.mxu1 }
 0x11f   : > { %v1684_v3 = vadd.f32 %v1610_v48, %v1394_v14  ;;  %v973_v30 = vadd.f32 %v972_v35, %v5644_v56  ;;  %v2049_v56 = vshrl.u32 %v4562_v38, 16  ;;  %v2037_v14 = vsel %vm5228_vm3, %v2032_v51, %v2036_v11 }
 0x120   : > { %4585 = vmatmul.msk.bf16.gmra.mxu0 %vm675_vm4, %v2188_v62  ;;  %v4994_v62 = vld [vmem:[%s5216_s19 + $0x98] sm:$0x1]  ;;  %v4392_v48 = vrot.slane %v1049_v9, 9  ;;  %v1176_v35 = vrot.slane %v1174_v8, 4  ;;  %v2168_v52 = vunpack.c.l.b16 %v2037_v14  ;;  %v2169_v11 = vunpack.c.l.b16 %v2047_v23 }
 0x121   : > { %v1322_v27 = vpop.f32.mrf.mxu2  ;;  %4375 = vmatmul.msk.bf16.gmra.mxu1 %vm675_vm4, %v4883_v44  ;;  %v5733_v57 = vadd.f32 %v2264_v60, %v1684_v3  ;;  %v1177_v60 = vrot.slane %v4994_v62, 5  ;;  %v2051_v50 = vrot.slane %v2049_v56, 4  ;;  %v2054_v3 = vrot.slane %v2052_v25, 5  ;;  %v4884_v56 = vld [vmem:[%s5216_s19 + $0x90] sm:$0xff] }
 0x122   : > { %v1395_v61 = vadd.f32 %v1322_v27, %v970_v21  ;;  %v2060_v51 = vrot.slane %v2058_v41, 5  ;;  %v2189_v20 = vpack.c.b16 %v2169_v11, %v2168_v52  ;;  %v4566_v11 = vld [vmem:[%s5216_s19 + $0xac] sm:$0xf] }
 0x123   : > { %v2055_v16 = vor.u32 %v2054_v3, %v2051_v50  ;;  %v1050_v50 = vld [vmem:[%s5216_s19 + $0x9c] sm:$0xe] }
 0x124   : > { %v2065_v25 = vor.u32 %v2064_v19, %v2060_v51 }
 0x125   : > { %v2266_v1 = vpop.f32.mrf.mxu0 }
 0x126   : > { %v1612_v21 = vpop.f32.mrf.mxu3  ;;  %4408 = vmatmul.msk.bf16.gmra.mxu2 %vm675_vm4, %v1245_v4  ;;  %v974_v44 = vpop.f32.mrf.mxu1  ;;  %v4564_v4 = vld [vmem:[%s5216_s19 + $0xa4] sm:$0x1] }
 0x127   : > { %v1685_v31 = vadd.f32 %v1612_v21, %v1395_v61  ;;  %v975_v47 = vadd.f32 %v974_v44, %v5662_v24  ;;  %v1175_v61 = vsel %vm5402_vm7, %v4392_v48, %v1174_v8  ;;  %v1178_v24 = vsel %vm5402_vm7, %v1176_v35, %v1177_v60  ;;  %v4565_v44 = vld [vmem:[%s5216_s19 + $0xa8] sm:$0xf]  ;;  %v4995_v35 = vld [vmem:[%s5216_s19 + $0xa0] sm:$0xf] }
 0x128   : > { %v2068_v14 = vshll.u32 %v4564_v4, 16  ;;  %v1227_v41 = vunpack.c.l.b16 %v1178_v24  ;;  %v2056_v8 = vrot.slane %v2055_v16, 4  ;;  %v2066_v60 = vrot.slane %v2065_v25, 4 }
 0x129   : > { %v1325_v27 = vpop.f32.mrf.mxu2  ;;  %v5746_v54 = vadd.f32 %v2266_v1, %v1685_v31  ;;  %v1181_v52 = vrot.slane %v4995_v35, 5  ;;  %v2076_v19 = vshll.u32 %v4565_v44, 16  ;;  %v2086_v24 = vshrl.u32 %v4566_v11, 16 }
 0x12a   : > { %v1396_v38 = vadd.f32 %v1325_v27, %v973_v30  ;;  %v1226_v30 = vunpack.c.l.b16 %v1175_v61  ;;  %v2070_v21 = vrot.slane %v2068_v14, 5  ;;  %v2061_v3 = vsel %vm5228_vm3, %v2056_v8, %v2060_v51 }
 0x12b   : > { %4521 = vmatmul.msk.bf16.gmra.mxu3 %vm675_vm4, %v4899_v33  ;;  %v2073_v27 = vshrl.u32 %v4565_v44, 16  ;;  %v2082_v61 = vshll.u32 %v4566_v11, 16  ;;  %v1183_v25 = vrot.slane %v1181_v52, 4  ;;  %v2170_v51 = vunpack.c.l.b16 %v2061_v3  ;;  %v4567_v11 = vld [vmem:[%s5216_s19 + $0xb0] sm:$0x1]  ;;  %v4885_v3 = vld [vmem:[%s5216_s19 + $0x9c] sm:$0xff] }
 0x12c   : > { %v1246_v48 = vpack.c.b16 %v1227_v41, %v1226_v30  ;;  %v2071_v4 = vsel %vm5228_vm3, %v2066_v60, %v2070_v21  ;;  %v2078_v8 = vrot.slane %v2076_v19, 5  ;;  %v2088_v21 = vrot.slane %v2086_v24, 4 }
 0x12d   : > { %v2269_v9 = vpop.f32.mrf.mxu0  ;;  %v2171_v41 = vunpack.c.l.b16 %v2071_v4  ;;  %v2084_v60 = vrot.slane %v2082_v61, 5  ;;  %v2092_v4 = vshll.u32 %v4567_v11, 16 }
 0x12e   : > { %v1615_v1 = vpop.f32.mrf.mxu3  ;;  %v977_v23 = vpop.f32.mrf.mxu1 }
 0x12f   : > { %v1686_v5 = vadd.f32 %v1615_v1, %v1396_v38  ;;  %v4900_v1 = vld [vmem:[%s5216_s19 + $0x9c] sm:$0xff]  ;;  %v978_v30 = vadd.f32 %v977_v23, %v5497_v7  ;;  %v2190_v7 = vpack.c.b16 %v2171_v41, %v2170_v51  ;;  %v2094_v51 = vrot.slane %v2092_v4, 5 }
 0x130   : > { %4586 = vmatmul.msk.bf16.gmra.mxu0 %vm675_vm4, %v2189_v20  ;;  %v4996_v20 = vld [vmem:[%s5216_s19 + $0xa4] sm:$0x1] }
 0x131   : > { %v1327_v62 = vpop.f32.mrf.mxu2  ;;  %4376 = vmatmul.msk.bf16.gmra.mxu1 %vm675_vm4, %v4884_v56  ;;  %v5758_v31 = vadd.f32 %v2269_v9, %v1686_v5  ;;  %v1184_v16 = vrot.slane %v4996_v20, 5  ;;  %v4393_v56 = vrot.slane %v1050_v50, 9  ;;  %v2075_v5 = vrot.slane %v2073_v27, 4 }
 0x132   : > { %v1397_v33 = vadd.f32 %v1327_v62, %v975_v47 }
 0x133   : > { %v2079_v23 = vor.u32 %v2078_v8, %v2075_v5 }
 0x135   : > { %v2271_v38 = vpop.f32.mrf.mxu0 }
 0x136   : > { %v1617_v47 = vpop.f32.mrf.mxu3  ;;  %4409 = vmatmul.msk.bf16.gmra.mxu2 %vm675_vm4, %v1246_v48  ;;  %v979_v9 = vpop.f32.mrf.mxu1  ;;  %v1182_v48 = vsel %vm5402_vm7, %v4393_v56, %v1181_v52  ;;  %v4568_v52 = vld [vmem:[%s5216_s19 + $0xb4] sm:$0xf]  ;;  %v2080_v56 = vrot.slane %v2079_v23, 4 }
 0x137   : > { %v1687_v14 = vadd.f32 %v1617_v47, %v1397_v33  ;;  %v1185_v33 = vsel %vm5402_vm7, %v1183_v25, %v1184_v16  ;;  %v1228_v27 = vunpack.c.l.b16 %v1182_v48  ;;  %v4569_v47 = vld [vmem:[%s5216_s19 + $0xb8] sm:$0xf]  ;;  %v980_v16 = vadd.f32 %v979_v9, %v5513_v34 }
 0x138   : > { %v1229_v19 = vunpack.c.l.b16 %v1185_v33  ;;  %v2097_v5 = vshrl.u32 %v4568_v52, 16  ;;  %v2100_v8 = vshll.u32 %v4568_v52, 16  ;;  %v2110_v48 = vshrl.u32 %v4569_v47, 16  ;;  %v1051_v33 = vld [vmem:[%s5216_s19 + $0xa8] sm:$0xe] }
 0x139   : > { %v1330_v62 = vpop.f32.mrf.mxu2  ;;  %v5771_v44 = vadd.f32 %v2271_v38, %v1687_v14  ;;  %v2089_v38 = vor.u32 %v2088_v21, %v2084_v60  ;;  %v4997_v21 = vld [vmem:[%s5216_s19 + $0xac] sm:$0xf]  ;;  %v2085_v9 = vsel %vm5228_vm3, %v2080_v56, %v2084_v60 }
 0x13a   : > { %v1398_v35 = vadd.f32 %v1330_v62, %v978_v30  ;;  %v1247_v14 = vpack.c.b16 %v1229_v19, %v1228_v27  ;;  %v2106_v62 = vshll.u32 %v4569_v47, 16  ;;  %v2099_v27 = vrot.slane %v2097_v5, 4 }
 0x13b   : > { %4522 = vmatmul.msk.bf16.gmra.mxu3 %vm675_vm4, %v4900_v1  ;;  %v2090_v1 = vrot.slane %v2089_v38, 4  ;;  %v2102_v19 = vrot.slane %v2100_v8, 5  ;;  %v2112_v47 = vrot.slane %v2110_v48, 4  ;;  %v4886_v48 = vld [vmem:[%s5216_s19 + $0xa8] sm:$0xff] }
 0x13c   : > { %v2108_v38 = vrot.slane %v2106_v62, 5 }
 0x13d   : > { %v2274_v50 = vpop.f32.mrf.mxu0  ;;  %v2095_v11 = vsel %vm5228_vm3, %v2090_v1, %v2094_v51 }
 0x13e   : > { %v1620_v61 = vpop.f32.mrf.mxu3  ;;  %v982_v24 = vpop.f32.mrf.mxu1  ;;  %v2173_v56 = vunpack.c.l.b16 %v2095_v11  ;;  %v2113_v8 = vor.u32 %v2112_v47, %v2108_v38 }
 0x13f   : > { %v1688_v20 = vadd.f32 %v1620_v61, %v1398_v35  ;;  %v1188_v35 = vrot.slane %v4997_v21, 5  ;;  %v4901_v61 = vld [vmem:[%s5216_s19 + $0xa8] sm:$0xff]  ;;  %v983_v60 = vadd.f32 %v982_v24, %v5533_v58 }
 0x140   : > { %4587 = vmatmul.msk.bf16.gmra.mxu0 %vm675_vm4, %v2190_v7  ;;  %v4998_v7 = vld [vmem:[%s5216_s19 + $0xb0] sm:$0x1] }
 0x141   : > { %v1332_v25 = vpop.f32.mrf.mxu2  ;;  %4377 = vmatmul.msk.bf16.gmra.mxu1 %vm675_vm4, %v4885_v3  ;;  %v5785_v30 = vadd.f32 %v2274_v50, %v1688_v20  ;;  %v1191_v23 = vrot.slane %v4998_v7, 5  ;;  %v4394_v20 = vrot.slane %v1051_v33, 9  ;;  %v1190_v52 = vrot.slane %v1188_v35, 4 }
 0x142   : > { %v1399_v41 = vadd.f32 %v1332_v25, %v980_v16  ;;  %v2172_v16 = vunpack.c.l.b16 %v2085_v9  ;;  %v4570_v25 = vld [vmem:[%s5216_s19 + $0xbc] sm:$0x1] }
 0x143   : > { %v1192_v5 = vsel %vm5402_vm7, %v1190_v52, %v1191_v23  ;;  %v2116_v58 = vshll.u32 %v4570_v25, 16  ;;  %v4572_v52 = vld [vmem:[%s5216_s19 + $0xc4] sm:$0xf] }
 0x144   : > { %v2191_v24 = vpack.c.b16 %v2173_v56, %v2172_v16  ;;  %v1231_v11 = vunpack.c.l.b16 %v1192_v5  ;;  %v1052_v16 = vld [vmem:[%s5216_s19 + $0xb4] sm:$0xe]  ;;  %v5000_v56 = vld [vmem:[%s5216_s19 + $0xb8] sm:$0xf]  ;;  %v2134_v5 = vshrl.u32 %v4572_v52, 16 }
 0x145   : > { %v2276_v34 = vpop.f32.mrf.mxu0  ;;  %v1195_v25 = vrot.slane %v5000_v56, 5 }
 0x146   : > { %v1622_v50 = vpop.f32.mrf.mxu3  ;;  %4410 = vmatmul.msk.bf16.gmra.mxu2 %vm675_vm4, %v1247_v14  ;;  %v984_v3 = vpop.f32.mrf.mxu1  ;;  %v2103_v14 = vor.u32 %v2102_v19, %v2099_v27  ;;  %v2118_v27 = vrot.slane %v2116_v58, 5  ;;  %v4571_v19 = vld [vmem:[%s5216_s19 + $0xc0] sm:$0xf]  ;;  %v5001_v58 = vld [vmem:[%s5216_s19 + $0x14] sm:$0x1] }
 0x147   : > { %v1689_v4 = vadd.f32 %v1622_v50, %v1399_v41  ;;  %v1189_v41 = vsel %vm5402_vm7, %v4394_v20, %v1188_v35  ;;  %v2114_v35 = vrot.slane %v2113_v8, 4  ;;  %v985_v23 = vadd.f32 %v984_v3, %v5550_v28 }
 0x148   : > { %v1230_v9 = vunpack.c.l.b16 %v1189_v41  ;;  %v2104_v50 = vrot.slane %v2103_v14, 4  ;;  %v2121_v3 = vshrl.u32 %v4571_v19, 16  ;;  %v2124_v14 = vshll.u32 %v4571_v19, 16  ;;  %v4902_v19 = vld [vmem:[%s5216_s19 + $0xb4] sm:$0xff] }
 0x149   : > { %v1335_v1 = vpop.f32.mrf.mxu2  ;;  %v5798_v51 = vadd.f32 %v2276_v34, %v1689_v4  ;;  %v4999_v4 = vld [vmem:[%s5216_s19 + $0x10] sm:$0xf]  ;;  %v2119_v28 = vsel %vm5228_vm3, %v2114_v35, %v2118_v27  ;;  %v2130_v41 = vshll.u32 %v4572_v52, 16  ;;  %v1197_v35 = vrot.slane %v1195_v25, 4  ;;  %v4591_v27 = vld [vmem:[%s5216_s19 + $0xc] sm:$0xe] }
 0x14a   : > { %v1400_v21 = vadd.f32 %v1335_v1, %v983_v60  ;;  %v1248_v60 = vpack.c.b16 %v1231_v11, %v1230_v9  ;;  %v5002_v9 = vld [vmem:[%s5216_s19 + $0xbc] sm:$0x1]  ;;  %v4607_v52 = vrot.slane %v4591_v27, 9 }
 0x14b   : > { %4523 = vmatmul.msk.bf16.gmra.mxu3 %vm675_vm4, %v4901_v61  ;;  %v2432_v61 = vrot.slane %v4999_v4, 5  ;;  %v2123_v4 = vrot.slane %v2121_v3, 4 }
 0x14d   : > { %v2279_v62 = vpop.f32.mrf.mxu0  ;;  %v2434_v8 = vrot.slane %v2432_v61, 4 }
 0x14e   : > { %v1625_v33 = vpop.f32.mrf.mxu3  ;;  %v987_v34 = vpop.f32.mrf.mxu1 }
 0x14f   : > { %v1690_v7 = vadd.f32 %v1625_v33, %v1400_v21  ;;  %v2109_v21 = vsel %vm5228_vm3, %v2104_v50, %v2108_v38  ;;  %v4395_v33 = vrot.slane %v1052_v16, 9  ;;  %v988_v56 = vadd.f32 %v987_v34, %v5570_v53 }
 0x150   : > { %4588 = vmatmul.msk.bf16.gmra.mxu0 %vm675_vm4, %v2191_v24  ;;  %v2435_v24 = vrot.slane %v5001_v58, 5  ;;  %v2174_v38 = vunpack.c.l.b16 %v2109_v21  ;;  %v2132_v16 = vrot.slane %v2130_v41, 5  ;;  %v2136_v58 = vrot.slane %v2134_v5, 4  ;;  %v4573_v21 = vld [vmem:[%s5216_s19 + $0xc8] sm:$0x1] }
 0x151   : > { %v1337_v20 = vpop.f32.mrf.mxu2  ;;  %4378 = vmatmul.msk.bf16.gmra.mxu1 %vm675_vm4, %v4886_v48  ;;  %v5814_v1 = vadd.f32 %v2279_v62, %v1690_v7  ;;  %v1198_v62 = vrot.slane %v5002_v9, 5  ;;  %v2175_v7 = vunpack.c.l.b16 %v2119_v28  ;;  %v2433_v28 = vsel %vm5402_vm7, %v4607_v52, %v2432_v61  ;;  %v4753_v41 = vld [vmem:[%s5216_s19 + $0x18] sm:$0xf] }
 0x152   : > { %v1401_v47 = vadd.f32 %v1337_v20, %v985_v23  ;;  %v2126_v20 = vrot.slane %v2124_v14, 5  ;;  %v2544_v53 = vunpack.c.l.b16 %v2433_v28  ;;  %v2140_v27 = vshll.u32 %v4573_v21, 16 }
 0x153   : > { %v1199_v14 = vsel %vm5402_vm7, %v1197_v35, %v1198_v62  ;;  %v2192_v5 = vpack.c.b16 %v2175_v7, %v2174_v38  ;;  %v3103_v62 = vshrl.u32 %v4753_v41, 16  ;;  %v3106_v35 = vshll.u32 %v4753_v41, 16 }
 0x155   : > { %v2281_v48 = vpop.f32.mrf.mxu0  ;;  %v3105_v21 = vrot.slane %v3103_v62, 4 }
 0x156   : > { %v1627_v11 = vpop.f32.mrf.mxu3  ;;  %4411 = vmatmul.msk.bf16.gmra.mxu2 %vm675_vm4, %v1248_v60  ;;  %v989_v50 = vpop.f32.mrf.mxu1  ;;  %v1196_v60 = vsel %vm5402_vm7, %v4395_v33, %v1195_v25  ;;  %v5838_v25 = vld [vmem:[%s5216_s19 + $0x1c] sm:$0xf]  ;;  %v2137_v33 = vor.u32 %v2136_v58, %v2132_v16 }
 0x157   : > { %v1691_v23 = vadd.f32 %v1627_v11, %v1401_v47  ;;  %v2436_v47 = vsel %vm5402_vm7, %v2434_v8, %v2435_v24  ;;  %v2127_v11 = vor.u32 %v2126_v20, %v2123_v4  ;;  %v4887_v24 = vld [vmem:[%s5216_s19 + $0xb4] sm:$0xff]  ;;  %v3116_v38 = vshrl.u32 %v5838_v25, 16 }
 0x158   : > { %v2545_v34 = vunpack.c.l.b16 %v2436_v47  ;;  %v990_v4 = vadd.f32 %v989_v50, %v5590_v17 }
 0x159   : > { %v1340_v9 = vpop.f32.mrf.mxu2  ;;  %v5842_v52 = vadd.f32 %v2281_v48, %v1691_v23  ;;  %v2128_v48 = vrot.slane %v2127_v11, 4  ;;  %v2138_v23 = vrot.slane %v2137_v33, 4  ;;  %v3118_v41 = vrot.slane %v3116_v38, 4 }
 0x15a   : > { %v1402_v3 = vadd.f32 %v1340_v9, %v988_v56  ;;  %v5840_v61 = vpack.c.b16 %v2545_v34, %v2544_v53  ;;  %v1232_v56 = vunpack.c.l.b16 %v1196_v60  ;;  %v1233_v9 = vunpack.c.l.b16 %v1199_v14 }
 0x15b   : > { %4524 = vmatmul.msk.bf16.gmra.mxu3 %vm675_vm4, %v4902_v19  ;;  %6628 = vst [vmem:[#allocation5_spill] sm:$0xff] %v5842_v52  ;;  %v3112_v19 = vshll.u32 %v5838_v25, 16  ;;  %v2142_v60 = vrot.slane %v2140_v27, 5  ;;  %v3108_v14 = vrot.slane %v3106_v35, 5  ;;  %v2133_v17 = vsel %vm5228_vm3, %v2128_v48, %v2132_v16  ;;  %v4818_v48 = vld [vmem:[%s5216_s19 + $0x18] sm:$0xe] }
 0x15c   : > { %v1249_v58 = vpack.c.b16 %v1233_v9, %v1232_v56  ;;  %v4903_v9 = vld [vmem:[%s5216_s19 + $0xc0] sm:$0xff]  ;;  %v2176_v16 = vunpack.c.l.b16 %v2133_v17 }
 0x15d   : > { %v2284_v8 = vpop.f32.mrf.mxu0  ;;  %v3114_v34 = vrot.slane %v3112_v19, 5  ;;  %v2143_v50 = vsel %vm5228_vm3, %v2138_v23, %v2142_v60  ;;  %v3109_v27 = vor.u32 %v3108_v14, %v3105_v21  ;;  %v4756_v23 = vld [vmem:[%s5216_s19 + $0x24] sm:$0xf]  ;;  %v5868_v60 = vld [vmem:[%s5216_s19 + $0x28] sm:$0xf] }
 0x15e   : > { %v1630_v28 = vpop.f32.mrf.mxu3  ;;  %v992_v47 = vpop.f32.mrf.mxu1  ;;  %v2177_v35 = vunpack.c.l.b16 %v2143_v50 }
 0x15f   : > { %v1692_v7 = vadd.f32 %v1630_v28, %v1402_v3  ;;  %v5853_v3 = vld [vmem:[%s5216_s19 + $0x20] sm:$0x1]  ;;  %v993_v62 = vadd.f32 %v992_v47, %v5613_v2  ;;  %v3110_v38 = vrot.slane %v3109_v27, 4  ;;  %v5003_v47 = vld [vmem:[%s5216_s19 + $0x1c] sm:$0xf] }
 0x160   : > { %4589 = vmatmul.msk.bf16.gmra.mxu0 %vm675_vm4, %v2192_v5  ;;  %v2439_v14 = vrot.slane %v5003_v47, 5  ;;  %v4592_v27 = vld [vmem:[%s5216_s19 + $0x18] sm:$0xe] }
 0x161   : > { %v1342_v20 = vpop.f32.mrf.mxu2  ;;  %4379 = vmatmul.msk.bf16.gmra.mxu1 %vm675_vm4, %v4887_v24  ;;  %v5850_v52 = vadd.f32 %v2284_v8, %v1692_v7  ;;  %v3119_v24 = vor.u32 %v3118_v41, %v3114_v34  ;;  %v3122_v8 = vshll.u32 %v5853_v3, 16  ;;  %v3115_v17 = vsel %vm5228_vm3, %v3110_v38, %v3114_v34 }
 0x162   : > { %v1403_v53 = vadd.f32 %v1342_v20, %v990_v4  ;;  %v2193_v20 = vpack.c.b16 %v2177_v35, %v2176_v16  ;;  %v3777_v34 = vrot.slane %v5853_v3, 5  ;;  %v5004_v16 = vld [vmem:[%s5216_s19 + $0x20] sm:$0x1]  ;;  %v4608_v38 = vrot.slane %v4592_v27, 9 }
 0x163   : > { %v3120_v7 = vrot.slane %v3119_v24, 4  ;;  %v3124_v4 = vrot.slane %v3122_v8, 5  ;;  %v3127_v24 = vshrl.u32 %v4756_v23, 16  ;;  %v3130_v8 = vshll.u32 %v4756_v23, 16 }
 0x164   : > { %v2442_v35 = vrot.slane %v5004_v16, 5  ;;  %v2440_v27 = vsel %vm5402_vm7, %v4608_v38, %v2439_v14  ;;  %v4759_v38 = vld [vmem:[%s5216_s19 + $0x30] sm:$0xf] }
 0x165   : > { %v2286_v5 = vpop.f32.mrf.mxu0  ;;  %v3125_v50 = vsel %vm5228_vm3, %v3120_v7, %v3124_v4  ;;  %v2441_v7 = vrot.slane %v2439_v14, 4  ;;  %v3132_v3 = vrot.slane %v3130_v8, 5 }
 0x166   : > { %v1632_v11 = vpop.f32.mrf.mxu3  ;;  %4412 = vmatmul.msk.bf16.gmra.mxu2 %vm675_vm4, %v1249_v58  ;;  %v994_v33 = vpop.f32.mrf.mxu1  ;;  %v3774_v58 = vrot.slane %v5838_v25, 5  ;;  %v3489_v23 = vunpack.c.l.b16 %v3125_v50 }
 0x167   : > { %v1693_v56 = vadd.f32 %v1632_v11, %v1403_v53  ;;  %v4834_v11 = vrot.slane %v4818_v48, 9  ;;  %v4904_v48 = vld [vmem:[%s5216_s19 + $0x18] sm:$0xff]  ;;  %v2443_v50 = vsel %vm5402_vm7, %v2441_v7, %v2442_v35  ;;  %v5908_v7 = vld [vmem:[%s5216_s19 + $0x34] sm:$0xf] }
 0x169   : > { %v1345_v28 = vpop.f32.mrf.mxu2  ;;  %v5870_v21 = vadd.f32 %v2286_v5, %v1693_v56  ;;  %v3136_v5 = vshll.u32 %v5868_v60, 16  ;;  %v3140_v56 = vshrl.u32 %v5868_v60, 16 }
 0x16a   : > { %v1404_v19 = vadd.f32 %v1345_v28, %v993_v62  ;;  %v3776_v62 = vrot.slane %v3774_v58, 4 }
 0x16b   : > { %4525 = vmatmul.msk.bf16.gmra.mxu3 %vm675_vm4, %v4903_v9  ;;  %v995_v9 = vadd.f32 %v994_v33, %v5633_v29  ;;  %v3129_v33 = vrot.slane %v3127_v24, 4  ;;  %v5891_v47 = vrot.slane %v3136_v5, 5 }
 0x16d   : > { %v2289_v2 = vpop.f32.mrf.mxu0  ;;  %v3133_v5 = vor.u32 %v3132_v3, %v3129_v33  ;;  %v4819_v33 = vld [vmem:[%s5216_s19 + $0x24] sm:$0xe] }
 0x16e   : > { %v1635_v53 = vpop.f32.mrf.mxu3  ;;  %v997_v41 = vpop.f32.mrf.mxu1 }
 0x16f   : > { %v1694_v25 = vadd.f32 %v1635_v53, %v1404_v19  ;;  %v3488_v19 = vunpack.c.l.b16 %v3115_v17  ;;  %v3142_v53 = vrot.slane %v3140_v56, 4  ;;  %v998_v14 = vadd.f32 %v997_v41, %v5515_v37 }
 0x170   : > { %4590 = vmatmul.msk.bf16.gmra.mxu0 %vm675_vm4, %v2193_v20  ;;  %v3775_v20 = vsel %vm5402_vm7, %v4834_v11, %v3774_v58  ;;  %v3781_v37 = vrot.slane %v5868_v60, 5 }
 0x171   : > { %v1347_v28 = vpop.f32.mrf.mxu2  ;;  %4624 = vmatmul.msk.bf16.vlgmr.msra.gmra.mxu1 %vm675_vm4, %v5840_v61  ;;  %v5889_v29 = vadd.f32 %v2289_v2, %v1694_v25  ;;  %v3778_v61 = vsel %vm5402_vm7, %v3776_v62, %v3777_v34  ;;  %v3520_v2 = vpack.c.b16 %v3489_v23, %v3488_v19  ;;  %v3886_v11 = vunpack.c.l.b16 %v3775_v20 }
 0x172   : > { %v1405_v4 = vadd.f32 %v1347_v28, %v995_v9  ;;  %v5900_v9 = vld [vmem:[%s5216_s19 + $0x2c] sm:$0x1]  ;;  %v3887_v8 = vunpack.c.l.b16 %v3778_v61  ;;  %v3143_v56 = vor.u32 %v3142_v53, %v5891_v47  ;;  %v2546_v62 = vunpack.c.l.b16 %v2440_v27 }
 0x173   : > { %v2547_v34 = vunpack.c.l.b16 %v2443_v50  ;;  %v3146_v16 = vshll.u32 %v5900_v9, 16  ;;  %v3151_v53 = vshrl.u32 %v4759_v38, 16  ;;  %v3154_v61 = vshll.u32 %v4759_v38, 16 }
 0x174   : > { %v3918_v19 = vpack.c.b16 %v3887_v8, %v3886_v11  ;;  %v3160_v27 = vshll.u32 %v5908_v7, 16  ;;  %v3164_v50 = vshrl.u32 %v5908_v7, 16  ;;  %v5005_v11 = vld [vmem:[%s5216_s19 + $0x28] sm:$0xf]  ;;  %v3784_v60 = vrot.slane %v5900_v9, 5 }
 0x175   : > { %v2291_v17 = vpop.f32.mrf.mxu0  ;;  %v2577_v23 = vpack.c.b16 %v2547_v34, %v2546_v62  ;;  %v3148_v20 = vrot.slane %v3146_v16, 5  ;;  %v2446_v8 = vrot.slane %v5005_v11, 5  ;;  %v4835_v62 = vrot.slane %v4819_v33, 9  ;;  %v4905_v11 = vld [vmem:[%s5216_s19 + $0x24] sm:$0xff] }
 0x176   : > { %v1637_v58 = vpop.f32.mrf.mxu3  ;;  %4737 = vmatmul.msk.bf16.vlgmr.msra.gmra.mxu2 %vm675_vm4, %v4904_v48  ;;  %v999_v24 = vpop.f32.mrf.mxu1  ;;  %v3144_v48 = vrot.slane %v3143_v56, 4  ;;  %v3156_v33 = vrot.slane %v3154_v61, 5  ;;  %v5929_v9 = vrot.slane %v3160_v27, 5 }
 0x177   : > { %v1695_v25 = vadd.f32 %v1637_v58, %v1405_v4  ;;  %v3134_v4 = vrot.slane %v3133_v5, 4  ;;  %v5006_v5 = vld [vmem:[%s5216_s19 + $0x2c] sm:$0x1] }
 0x178   : > { %v2449_v56 = vrot.slane %v5006_v5, 5  ;;  %v3149_v16 = vsel %vm5228_vm3, %v3144_v48, %v3148_v20  ;;  %v3782_v20 = vsel %vm5402_vm7, %v4835_v62, %v3781_v37 }
 0x179   : > { %v1350_v35 = vpop.f32.mrf.mxu2  ;;  %v5913_v41 = vadd.f32 %v2291_v17, %v1695_v25  ;;  %v4593_v17 = vld [vmem:[%s5216_s19 + $0x24] sm:$0xe]  ;;  %v1000_v25 = vadd.f32 %v999_v24, %v5536_v63  ;;  %v3139_v34 = vsel %vm5228_vm3, %v3134_v4, %v5891_v47  ;;  %v2448_v24 = vrot.slane %v2446_v8, 4 }
 0x17a   : > { %v1406_v28 = vadd.f32 %v1350_v35, %v998_v14  ;;  %v3783_v35 = vrot.slane %v3781_v37, 4  ;;  %v4609_v63 = vrot.slane %v4593_v17, 9  ;;  %v3490_v47 = vunpack.c.l.b16 %v3139_v34 }
 0x17b   : > { %4802 = vmatmul.msk.bf16.vlgmr.msra.gmra.mxu3 %vm675_vm4, %v3520_v2  ;;  %6629 = vst [vmem:[#allocation6_spill] sm:$0xff] %v5913_v41  ;;  %v3491_v4 = vunpack.c.l.b16 %v3149_v16  ;;  %v5935_v41 = vld [vmem:[%s5216_s19 + $0x38] sm:$0x1] }
 0x17c   : > { %v3170_v37 = vshll.u32 %v5935_v41, 16 }
 0x17d   : > { %v2294_v3 = vpop.f32.mrf.mxu0  ;;  %v3521_v17 = vpack.c.b16 %v3491_v4, %v3490_v47  ;;  %v5007_v4 = vld [vmem:[%s5216_s19 + $0x34] sm:$0xf] }
 0x17e   : > { %v1640_v58 = vpop.f32.mrf.mxu3  ;;  %v1002_v2 = vpop.f32.mrf.mxu1 }
 0x17f   : > { %v1696_v14 = vadd.f32 %v1640_v58, %v1406_v28  ;;  %v3153_v28 = vrot.slane %v3151_v53, 4  ;;  %v3166_v58 = vrot.slane %v3164_v50, 4  ;;  %v2450_v50 = vsel %vm5402_vm7, %v2448_v24, %v2449_v56  ;;  %v5954_v24 = vld [vmem:[%s5216_s19 + $0x40] sm:$0xf] }
 0x180   : > { %4851 = vmatmul.msk.bf16.vlgmr.msra.gmra.mxu0 %vm675_vm4, %v3918_v19 }
 0x181   : > { %v1352_v38 = vpop.f32.mrf.mxu2  ;;  %4625 = vmatmul.msk.bf16.gmra.mxu1 %vm675_vm4, %v2577_v23  ;;  %v5932_v5 = vadd.f32 %v2294_v3, %v1696_v14  ;;  %v3785_v23 = vsel %vm5402_vm7, %v3783_v35, %v3784_v60  ;;  %v3157_v53 = vor.u32 %v3156_v33, %v3153_v28  ;;  %v2447_v3 = vsel %vm5402_vm7, %v4609_v63, %v2446_v8 }
 0x182   : > { %v1407_v19 = vadd.f32 %v1352_v38, %v1000_v25  ;;  %v3167_v14 = vor.u32 %v3166_v58, %v5929_v9  ;;  %v1003_v60 = vadd.f32 %v1002_v2, %v5553_v22  ;;  %v3888_v25 = vunpack.c.l.b16 %v3782_v20  ;;  %v4820_v58 = vld [vmem:[%s5216_s19 + $0x30] sm:$0xe] }
 0x183   : > { %v3889_v34 = vunpack.c.l.b16 %v3785_v23  ;;  %v2548_v35 = vunpack.c.l.b16 %v2447_v3  ;;  %v2549_v8 = vunpack.c.l.b16 %v2450_v50  ;;  %v3158_v28 = vrot.slane %v3157_v53, 4 }
 0x184   : > { %v3168_v56 = vrot.slane %v3167_v14, 4  ;;  %v3172_v33 = vrot.slane %v3170_v37, 5  ;;  %v3788_v63 = vrot.slane %v5908_v7, 5  ;;  %v2453_v20 = vrot.slane %v5007_v4, 5  ;;  %v4594_v7 = vld [vmem:[%s5216_s19 + $0x30] sm:$0xe] }
 0x185   : > { %v2296_v48 = vpop.f32.mrf.mxu0  ;;  %v2578_v47 = vpack.c.b16 %v2549_v8, %v2548_v35  ;;  %v4836_v50 = vrot.slane %v4820_v58, 9 }
 0x186   : > { %v1642_v61 = vpop.f32.mrf.mxu3  ;;  %4738 = vmatmul.msk.bf16.gmra.mxu2 %vm675_vm4, %v4905_v11  ;;  %v1004_v27 = vpop.f32.mrf.mxu1  ;;  %v4762_v11 = vld [vmem:[%s5216_s19 + $0x3c] sm:$0xf]  ;;  %v3173_v3 = vsel %vm5228_vm3, %v3168_v56, %v3172_v33  ;;  %v4906_v33 = vld [vmem:[%s5216_s19 + $0x30] sm:$0xff] }
 0x187   : > { %v1697_v62 = vadd.f32 %v1642_v61, %v1407_v19  ;;  %v3919_v19 = vpack.c.b16 %v3889_v34, %v3888_v25  ;;  %v3163_v61 = vsel %vm5228_vm3, %v3158_v28, %v5929_v9  ;;  %v3175_v14 = vshrl.u32 %v4762_v11, 16  ;;  %v5008_v34 = vld [vmem:[%s5216_s19 + $0x38] sm:$0x1] }
 0x188   : > { %v3790_v25 = vrot.slane %v3788_v63, 4  ;;  %v3791_v9 = vrot.slane %v5935_v41, 5  ;;  %v3492_v8 = vunpack.c.l.b16 %v3163_v61  ;;  %v2455_v28 = vrot.slane %v2453_v20, 4 }
 0x189   : > { %v1355_v16 = vpop.f32.mrf.mxu2  ;;  %v5956_v22 = vadd.f32 %v2296_v48, %v1697_v62  ;;  %v3178_v48 = vshll.u32 %v4762_v11, 16  ;;  %v3184_v62 = vshll.u32 %v5954_v24, 16  ;;  %v3493_v58 = vunpack.c.l.b16 %v3173_v3 }
 0x18a   : > { %v1408_v38 = vadd.f32 %v1355_v16, %v1003_v60  ;;  %v1005_v60 = vadd.f32 %v1004_v27, %v5574_v55  ;;  %v2456_v16 = vrot.slane %v5008_v34, 5  ;;  %v3789_v11 = vsel %vm5402_vm7, %v4836_v50, %v3788_v63 }
 0x18b   : > { %4803 = vmatmul.msk.bf16.gmra.mxu3 %vm675_vm4, %v3521_v17  ;;  %v3188_v17 = vshrl.u32 %v5954_v24, 16  ;;  %v3177_v55 = vrot.slane %v3175_v14, 4  ;;  %v3180_v27 = vrot.slane %v3178_v48, 5  ;;  %v5977_v41 = vrot.slane %v3184_v62, 5 }
 0x18c   : > { %v2457_v3 = vsel %vm5402_vm7, %v2455_v28, %v2456_v16  ;;  %v3890_v50 = vunpack.c.l.b16 %v3789_v11  ;;  %v4821_v11 = vld [vmem:[%s5216_s19 + $0x3c] sm:$0xe] }
 0x18d   : > { %v2299_v2 = vpop.f32.mrf.mxu0  ;;  %v3190_v4 = vrot.slane %v3188_v17, 4  ;;  %v3181_v62 = vor.u32 %v3180_v27, %v3177_v55 }
 0x18e   : > { %v1645_v23 = vpop.f32.mrf.mxu3  ;;  %v1007_v53 = vpop.f32.mrf.mxu1 }
 0x18f   : > { %v1698_v37 = vadd.f32 %v1645_v23, %v1408_v38  ;;  %v4610_v38 = vrot.slane %v4594_v7, 9  ;;  %v5986_v7 = vld [vmem:[%s5216_s19 + $0x44] sm:$0x1]  ;;  %v3191_v17 = vor.u32 %v3190_v4, %v5977_v41  ;;  %v3182_v28 = vrot.slane %v3181_v62, 4 }
 0x190   : > { %4852 = vmatmul.msk.bf16.gmra.mxu0 %vm675_vm4, %v3919_v19 }
 0x191   : > { %v1357_v35 = vpop.f32.mrf.mxu2  ;;  %4626 = vmatmul.msk.bf16.gmra.mxu1 %vm675_vm4, %v2578_v47  ;;  %v5975_v19 = vadd.f32 %v2299_v2, %v1698_v37  ;;  %v3792_v47 = vsel %vm5402_vm7, %v3790_v25, %v3791_v9  ;;  %v2454_v61 = vsel %vm5402_vm7, %v4610_v38, %v2453_v20  ;;  %v3522_v2 = vpack.c.b16 %v3493_v58, %v3492_v8  ;;  %v5994_v38 = vld [vmem:[%s5216_s19 + $0x4c] sm:$0xf] }
 0x192   : > { %v1409_v56 = vadd.f32 %v1357_v35, %v1005_v60  ;;  %v3891_v48 = vunpack.c.l.b16 %v3792_v47  ;;  %v1008_v20 = vadd.f32 %v1007_v53, %v5597_v26  ;;  %v2550_v60 = vunpack.c.l.b16 %v2454_v61  ;;  %v4765_v35 = vld [vmem:[%s5216_s19 + $0x48] sm:$0xf] }
 0x193   : > { %v2551_v25 = vunpack.c.l.b16 %v2457_v3  ;;  %v3194_v9 = vshll.u32 %v5986_v7, 16  ;;  %v3795_v26 = vrot.slane %v5954_v24, 5  ;;  %v3199_v27 = vshrl.u32 %v4765_v35, 16 }
 0x194   : > { %v3920_v8 = vpack.c.b16 %v3891_v48, %v3890_v50  ;;  %v3202_v4 = vshll.u32 %v4765_v35, 16  ;;  %v3208_v47 = vshll.u32 %v5994_v38, 16  ;;  %v3212_v61 = vshrl.u32 %v5994_v38, 16  ;;  %v5010_v48 = vld [vmem:[%s5216_s19 + $0x44] sm:$0x1] }
 0x195   : > { %v2301_v23 = vpop.f32.mrf.mxu0  ;;  %v3196_v58 = vrot.slane %v3194_v9, 5  ;;  %v2463_v62 = vrot.slane %v5010_v48, 5  ;;  %v3798_v24 = vrot.slane %v5986_v7, 5  ;;  %v3797_v9 = vrot.slane %v3795_v26, 4  ;;  %v6021_v48 = vld [vmem:[%s5216_s19 + $0x50] sm:$0x1] }
 0x196   : > { %v1647_v63 = vpop.f32.mrf.mxu3  ;;  %4739 = vmatmul.msk.bf16.gmra.mxu2 %vm675_vm4, %v4906_v33  ;;  %v1009_v14 = vpop.f32.mrf.mxu1  ;;  %v2579_v33 = vpack.c.b16 %v2551_v25, %v2550_v60  ;;  %v3187_v60 = vsel %vm5228_vm3, %v3182_v28, %v5977_v41  ;;  %v3204_v35 = vrot.slane %v3202_v4, 5  ;;  %v6015_v7 = vrot.slane %v3208_v47, 5 }
 0x197   : > { %v1699_v37 = vadd.f32 %v1647_v63, %v1409_v56  ;;  %v3192_v56 = vrot.slane %v3191_v17, 4  ;;  %v3494_v41 = vunpack.c.l.b16 %v3187_v60 }
 0x199   : > { %v1360_v34 = vpop.f32.mrf.mxu2  ;;  %v5999_v53 = vadd.f32 %v2301_v23, %v1699_v37  ;;  %v4595_v23 = vld [vmem:[%s5216_s19 + $0x3c] sm:$0xe]  ;;  %v1010_v37 = vadd.f32 %v1009_v14, %v5615_v43  ;;  %v3197_v25 = vsel %vm5228_vm3, %v3192_v56, %v3196_v58 }
 0x19a   : > { %v1410_v16 = vadd.f32 %v1360_v34, %v1008_v20  ;;  %v4837_v20 = vrot.slane %v4821_v11, 9  ;;  %v3214_v11 = vrot.slane %v3212_v61, 4  ;;  %v4611_v43 = vrot.slane %v4595_v23, 9 }
 0x19b   : > { %4804 = vmatmul.msk.bf16.gmra.mxu3 %vm675_vm4, %v3522_v2  ;;  %v5009_v2 = vld [vmem:[%s5216_s19 + $0x40] sm:$0xf]  ;;  %v3495_v28 = vunpack.c.l.b16 %v3197_v25 }
 0x19c   : > { %v2460_v50 = vrot.slane %v5009_v2, 5  ;;  %v3796_v58 = vsel %vm5402_vm7, %v4837_v20, %v3795_v26  ;;  %v3218_v26 = vshll.u32 %v6021_v48, 16 }
 0x19d   : > { %v2304_v55 = vpop.f32.mrf.mxu0  ;;  %v3523_v23 = vpack.c.b16 %v3495_v28, %v3494_v41  ;;  %v5011_v28 = vld [vmem:[%s5216_s19 + $0x4c] sm:$0xf] }
 0x19e   : > { %v1650_v3 = vpop.f32.mrf.mxu3  ;;  %v1012_v63 = vpop.f32.mrf.mxu1  ;;  %v2462_v14 = vrot.slane %v2460_v50, 4 }
 0x19f   : > { %v1700_v17 = vadd.f32 %v1650_v3, %v1410_v16  ;;  %v3201_v16 = vrot.slane %v3199_v27, 4  ;;  %v4907_v3 = vld [vmem:[%s5216_s19 + $0x3c] sm:$0xff] }
 0x1a0   : > { %4853 = vmatmul.msk.bf16.gmra.mxu0 %vm675_vm4, %v3920_v8  ;;  %v2464_v61 = vsel %vm5402_vm7, %v2462_v14, %v2463_v62  ;;  %v6040_v14 = vld [vmem:[%s5216_s19 + $0x58] sm:$0xf] }
 0x1a1   : > { %v1362_v34 = vpop.f32.mrf.mxu2  ;;  %4627 = vmatmul.msk.bf16.gmra.mxu1 %vm675_vm4, %v2579_v33  ;;  %v6018_v2 = vadd.f32 %v2304_v55, %v1700_v17  ;;  %v3799_v33 = vsel %vm5402_vm7, %v3797_v9, %v3798_v24  ;;  %v3205_v27 = vor.u32 %v3204_v35, %v3201_v16  ;;  %v2461_v55 = vsel %vm5402_vm7, %v4611_v43, %v2460_v50 }
 0x1a2   : > { %v1411_v8 = vadd.f32 %v1362_v34, %v1010_v37  ;;  %v3215_v17 = vor.u32 %v3214_v11, %v6015_v7  ;;  %v1013_v24 = vadd.f32 %v1012_v63, %v5636_v40  ;;  %v3892_v37 = vunpack.c.l.b16 %v3796_v58  ;;  %v4822_v11 = vld [vmem:[%s5216_s19 + $0x48] sm:$0xe] }
 0x1a3   : > { %v3893_v60 = vunpack.c.l.b16 %v3799_v33  ;;  %v2552_v9 = vunpack.c.l.b16 %v2461_v55  ;;  %v2553_v50 = vunpack.c.l.b16 %v2464_v61  ;;  %v3206_v16 = vrot.slane %v3205_v27, 4 }
 0x1a4   : > { %v3216_v62 = vrot.slane %v3215_v17, 4  ;;  %v3220_v35 = vrot.slane %v3218_v26, 5  ;;  %v3802_v43 = vrot.slane %v5994_v38, 5  ;;  %v2467_v58 = vrot.slane %v5011_v28, 5  ;;  %v4596_v38 = vld [vmem:[%s5216_s19 + $0x48] sm:$0xe] }
 0x1a5   : > { %v2306_v56 = vpop.f32.mrf.mxu0  ;;  %v2580_v41 = vpack.c.b16 %v2553_v50, %v2552_v9  ;;  %v4838_v61 = vrot.slane %v4822_v11, 9 }
 0x1a6   : > { %v1652_v4 = vpop.f32.mrf.mxu3  ;;  %4740 = vmatmul.msk.bf16.gmra.mxu2 %vm675_vm4, %v4907_v3  ;;  %v1014_v47 = vpop.f32.mrf.mxu1  ;;  %v4768_v3 = vld [vmem:[%s5216_s19 + $0x54] sm:$0xf]  ;;  %v3221_v55 = vsel %vm5228_vm3, %v3216_v62, %v3220_v35  ;;  %v4908_v35 = vld [vmem:[%s5216_s19 + $0x48] sm:$0xff] }
 0x1a7   : > { %v1701_v20 = vadd.f32 %v1652_v4, %v1411_v8  ;;  %v3921_v8 = vpack.c.b16 %v3893_v60, %v3892_v37  ;;  %v3211_v4 = vsel %vm5228_vm3, %v3206_v16, %v6015_v7  ;;  %v3223_v17 = vshrl.u32 %v4768_v3, 16  ;;  %v5012_v60 = vld [vmem:[%s5216_s19 + $0x50] sm:$0x1] }
 0x1a8   : > { %v3804_v37 = vrot.slane %v3802_v43, 4  ;;  %v3805_v7 = vrot.slane %v6021_v48, 5  ;;  %v3496_v50 = vunpack.c.l.b16 %v3211_v4  ;;  %v2469_v16 = vrot.slane %v2467_v58, 4 }
 0x1a9   : > { %v1365_v25 = vpop.f32.mrf.mxu2  ;;  %v6042_v40 = vadd.f32 %v2306_v56, %v1701_v20  ;;  %v3226_v56 = vshll.u32 %v4768_v3, 16  ;;  %v3232_v20 = vshll.u32 %v6040_v14, 16  ;;  %v3497_v11 = vunpack.c.l.b16 %v3221_v55 }
 0x1aa   : > { %v1412_v34 = vadd.f32 %v1365_v25, %v1013_v24  ;;  %v1015_v24 = vadd.f32 %v1014_v47, %v5651_v10  ;;  %v2470_v25 = vrot.slane %v5012_v60, 5  ;;  %v3803_v3 = vsel %vm5402_vm7, %v4838_v61, %v3802_v43 }
 0x1ab   : > { %4805 = vmatmul.msk.bf16.gmra.mxu3 %vm675_vm4, %v3523_v23  ;;  %v3236_v23 = vshrl.u32 %v6040_v14, 16  ;;  %v3225_v10 = vrot.slane %v3223_v17, 4  ;;  %v3228_v47 = vrot.slane %v3226_v56, 5  ;;  %v6063_v48 = vrot.slane %v3232_v20, 5 }
 0x1ac   : > { %v2471_v55 = vsel %vm5402_vm7, %v2469_v16, %v2470_v25  ;;  %v3894_v61 = vunpack.c.l.b16 %v3803_v3  ;;  %v4823_v3 = vld [vmem:[%s5216_s19 + $0x54] sm:$0xe] }
 0x1ad   : > { %v2309_v63 = vpop.f32.mrf.mxu0  ;;  %v3238_v28 = vrot.slane %v3236_v23, 4  ;;  %v3229_v20 = vor.u32 %v3228_v47, %v3225_v10 }
 0x1ae   : > { %v1655_v33 = vpop.f32.mrf.mxu3  ;;  %v1017_v27 = vpop.f32.mrf.mxu1 }
 0x1af   : > { %v1702_v26 = vadd.f32 %v1655_v33, %v1412_v34  ;;  %v4612_v34 = vrot.slane %v4596_v38, 9  ;;  %v6072_v38 = vld [vmem:[%s5216_s19 + $0x5c] sm:$0x1]  ;;  %v3239_v23 = vor.u32 %v3238_v28, %v6063_v48  ;;  %v3230_v16 = vrot.slane %v3229_v20, 4 }
 0x1b0   : > { %4854 = vmatmul.msk.bf16.gmra.mxu0 %vm675_vm4, %v3921_v8 }
 0x1b1   : > { %v1367_v9 = vpop.f32.mrf.mxu2  ;;  %4628 = vmatmul.msk.bf16.gmra.mxu1 %vm675_vm4, %v2580_v41  ;;  %v6061_v8 = vadd.f32 %v2309_v63, %v1702_v26  ;;  %v3806_v41 = vsel %vm5402_vm7, %v3804_v37, %v3805_v7  ;;  %v2468_v4 = vsel %vm5402_vm7, %v4612_v34, %v2467_v58  ;;  %v3524_v63 = vpack.c.b16 %v3497_v11, %v3496_v50  ;;  %v6080_v34 = vld [vmem:[%s5216_s19 + $0x64] sm:$0xf] }
 0x1b2   : > { %v1413_v62 = vadd.f32 %v1367_v9, %v1015_v24  ;;  %v3895_v56 = vunpack.c.l.b16 %v3806_v41  ;;  %v1018_v58 = vadd.f32 %v1017_v27, %v5527_v49  ;;  %v2554_v24 = vunpack.c.l.b16 %v2468_v4  ;;  %v4771_v9 = vld [vmem:[%s5216_s19 + $0x60] sm:$0xf] }
 0x1b3   : > { %v2555_v37 = vunpack.c.l.b16 %v2471_v55  ;;  %v3242_v7 = vshll.u32 %v6072_v38, 16  ;;  %v3809_v49 = vrot.slane %v6040_v14, 5  ;;  %v3247_v47 = vshrl.u32 %v4771_v9, 16 }
 0x1b4   : > { %v3922_v50 = vpack.c.b16 %v3895_v56, %v3894_v61  ;;  %v3250_v28 = vshll.u32 %v4771_v9, 16  ;;  %v3256_v41 = vshll.u32 %v6080_v34, 16  ;;  %v3260_v4 = vshrl.u32 %v6080_v34, 16  ;;  %v5014_v56 = vld [vmem:[%s5216_s19 + $0x5c] sm:$0x1] }
 0x1b5   : > { %v2311_v33 = vpop.f32.mrf.mxu0  ;;  %v3244_v11 = vrot.slane %v3242_v7, 5  ;;  %v2477_v20 = vrot.slane %v5014_v56, 5  ;;  %v3812_v14 = vrot.slane %v6072_v38, 5  ;;  %v3811_v7 = vrot.slane %v3809_v49, 4 }
 0x1b6   : > { %v1657_v43 = vpop.f32.mrf.mxu3  ;;  %4741 = vmatmul.msk.bf16.gmra.mxu2 %vm675_vm4, %v4908_v35  ;;  %v1019_v17 = vpop.f32.mrf.mxu1  ;;  %v2581_v35 = vpack.c.b16 %v2555_v37, %v2554_v24  ;;  %v3235_v24 = vsel %vm5228_vm3, %v3230_v16, %v6063_v48  ;;  %v3252_v9 = vrot.slane %v3250_v28, 5  ;;  %v3258_v38 = vrot.slane %v3256_v41, 5  ;;  %v6105_v16 = vld [vmem:[%s5216_s19 + $0x68] sm:$0x1] }
 0x1b7   : > { %v1703_v26 = vadd.f32 %v1657_v43, %v1413_v62  ;;  %v3240_v62 = vrot.slane %v3239_v23, 4  ;;  %v3498_v56 = vunpack.c.l.b16 %v3235_v24 }
 0x1b9   : > { %v1370_v60 = vpop.f32.mrf.mxu2  ;;  %v6085_v27 = vadd.f32 %v2311_v33, %v1703_v26  ;;  %v4597_v33 = vld [vmem:[%s5216_s19 + $0x54] sm:$0xe]  ;;  %v1020_v26 = vadd.f32 %v1019_v17, %v5546_v0  ;;  %v3245_v37 = vsel %vm5228_vm3, %v3240_v62, %v3244_v11 }
 0x1ba   : > { %v1414_v25 = vadd.f32 %v1370_v60, %v1018_v58  ;;  %v4839_v58 = vrot.slane %v4823_v3, 9  ;;  %v3262_v3 = vrot.slane %v3260_v4, 4  ;;  %v3499_v48 = vunpack.c.l.b16 %v3245_v37 }
 0x1bb   : > { %4806 = vmatmul.msk.bf16.gmra.mxu3 %vm675_vm4, %v3524_v63  ;;  %6630 = vst [vmem:[#allocation7_spill] sm:$0xff] %v6085_v27  ;;  %v5013_v63 = vld [vmem:[%s5216_s19 + $0x58] sm:$0xf] }
 0x1bc   : > { %v2474_v61 = vrot.slane %v5013_v63, 5  ;;  %v4613_v63 = vrot.slane %v4597_v33, 9  ;;  %v3810_v62 = vsel %vm5402_vm7, %v4839_v58, %v3809_v49  ;;  %v3263_v4 = vor.u32 %v3262_v3, %v3258_v38 }
 0x1bd   : > { %v2314_v10 = vpop.f32.mrf.mxu0  ;;  %v3525_v58 = vpack.c.b16 %v3499_v48, %v3498_v56  ;;  %v3896_v33 = vunpack.c.l.b16 %v3810_v62 }
 0x1be   : > { %v1660_v55 = vpop.f32.mrf.mxu3  ;;  %v1022_v43 = vpop.f32.mrf.mxu1  ;;  %v2476_v0 = vrot.slane %v2474_v61, 4 }
 0x1bf   : > { %v1704_v23 = vadd.f32 %v1660_v55, %v1414_v25  ;;  %v3249_v25 = vrot.slane %v3247_v47, 4 }
 0x1c0   : > { %4855 = vmatmul.msk.bf16.gmra.mxu0 %vm675_vm4, %v3922_v50  ;;  %v4909_v50 = vld [vmem:[%s5216_s19 + $0x54] sm:$0xff]  ;;  %v2478_v41 = vsel %vm5402_vm7, %v2476_v0, %v2477_v20  ;;  %v3816_v0 = vrot.slane %v6080_v34, 5  ;;  %v5016_v34 = vld [vmem:[%s5216_s19 + $0x68] sm:$0x1] }
 0x1c1   : > { %v1372_v60 = vpop.f32.mrf.mxu2  ;;  %4629 = vmatmul.msk.bf16.gmra.mxu1 %vm675_vm4, %v2581_v35  ;;  %v6102_v17 = vadd.f32 %v2314_v10, %v1704_v23  ;;  %v3813_v35 = vsel %vm5402_vm7, %v3811_v7, %v3812_v14  ;;  %v3253_v11 = vor.u32 %v3252_v9, %v3249_v25  ;;  %v2475_v10 = vsel %vm5402_vm7, %v4613_v63, %v2474_v61  ;;  %v4774_v9 = vld [vmem:[%s5216_s19 + $0x6c] sm:$0xf]  ;;  %v4824_v63 = vld [vmem:[%s5216_s19 + $0x60] sm:$0xe] }
 0x1c2   : > { %v1415_v55 = vadd.f32 %v1372_v60, %v1020_v26  ;;  %v3266_v23 = vshll.u32 %v6105_v16, 16  ;;  %v1023_v14 = vadd.f32 %v1022_v43, %v5567_v39  ;;  %v3897_v26 = vunpack.c.l.b16 %v3813_v35 }
 0x1c3   : > { %v2556_v37 = vunpack.c.l.b16 %v2475_v10  ;;  %v2557_v7 = vunpack.c.l.b16 %v2478_v41  ;;  %v3254_v61 = vrot.slane %v3253_v11, 4  ;;  %v3264_v25 = vrot.slane %v3263_v4, 4  ;;  %v5015_v11 = vld [vmem:[%s5216_s19 + $0x64] sm:$0xf] }
 0x1c4   : > { %v3268_v20 = vrot.slane %v3266_v23, 5  ;;  %v3923_v3 = vpack.c.b16 %v3897_v26, %v3896_v33  ;;  %v3271_v10 = vshrl.u32 %v4774_v9, 16  ;;  %v3274_v4 = vshll.u32 %v4774_v9, 16 }
 0x1c5   : > { %v2316_v27 = vpop.f32.mrf.mxu0  ;;  %v2582_v43 = vpack.c.b16 %v2557_v7, %v2556_v37  ;;  %v3259_v62 = vsel %vm5228_vm3, %v3254_v61, %v3258_v38  ;;  %v3818_v37 = vrot.slane %v3816_v0, 4  ;;  %v3819_v7 = vrot.slane %v6105_v16, 5  ;;  %v4910_v61 = vld [vmem:[%s5216_s19 + $0x60] sm:$0xff] }
 0x1c6   : > { %v1662_v47 = vpop.f32.mrf.mxu3  ;;  %4742 = vmatmul.msk.bf16.gmra.mxu2 %vm675_vm4, %v4909_v50  ;;  %v1024_v28 = vpop.f32.mrf.mxu1  ;;  %v3269_v35 = vsel %vm5228_vm3, %v3264_v25, %v3268_v20  ;;  %v3500_v26 = vunpack.c.l.b16 %v3259_v62 }
 0x1c7   : > { %v1705_v49 = vadd.f32 %v1662_v47, %v1415_v55  ;;  %v6121_v55 = vld [vmem:[%s5216_s19 + $0x70] sm:$0xf]  ;;  %v2481_v47 = vrot.slane %v5015_v11, 5  ;;  %v1025_v38 = vadd.f32 %v1024_v28, %v5586_v6  ;;  %v6146_v28 = vld [vmem:[%s5216_s19 + $0x74] sm:$0x1]  ;;  %v3820_v16 = vsel %vm5402_vm7, %v3818_v37, %v3819_v7 }
 0x1c8   : > { %v3280_v23 = vshll.u32 %v6121_v55, 16 }
 0x1c9   : > { %v1375_v24 = vpop.f32.mrf.mxu2  ;;  %v6123_v50 = vadd.f32 %v2316_v27, %v1705_v49  ;;  %v4598_v27 = vld [vmem:[%s5216_s19 + $0x60] sm:$0xe]  ;;  %v3284_v49 = vshrl.u32 %v6121_v55, 16  ;;  %v2483_v20 = vrot.slane %v2481_v47, 4 }
 0x1ca   : > { %v1416_v60 = vadd.f32 %v1375_v24, %v1023_v14  ;;  %v4840_v14 = vrot.slane %v4824_v63, 9  ;;  %v3501_v24 = vunpack.c.l.b16 %v3269_v35  ;;  %v4614_v25 = vrot.slane %v4598_v27, 9 }
 0x1cb   : > { %4807 = vmatmul.msk.bf16.gmra.mxu3 %vm675_vm4, %v3525_v58  ;;  %v2484_v58 = vrot.slane %v5016_v34, 5  ;;  %v6143_v11 = vrot.slane %v3280_v23, 5  ;;  %v3286_v6 = vrot.slane %v3284_v49, 4  ;;  %v3290_v23 = vshll.u32 %v6146_v28, 16 }
 0x1cd   : > { %v2319_v39 = vpop.f32.mrf.mxu0  ;;  %v3292_v7 = vrot.slane %v3290_v23, 5 }
 0x1ce   : > { %v1665_v56 = vpop.f32.mrf.mxu3  ;;  %v1027_v48 = vpop.f32.mrf.mxu1 }
 0x1cf   : > { %v1706_v41 = vadd.f32 %v1665_v56, %v1416_v60  ;;  %v3273_v56 = vrot.slane %v3271_v10, 4  ;;  %v2482_v10 = vsel %vm5402_vm7, %v4614_v25, %v2481_v47  ;;  %v1028_v49 = vadd.f32 %v1027_v48, %v5605_v45  ;;  %v4777_v47 = vld [vmem:[%s5216_s19 + $0x78] sm:$0xf] }
 0x1d0   : > { %4856 = vmatmul.msk.bf16.gmra.mxu0 %vm675_vm4, %v3923_v3  ;;  %v3276_v3 = vrot.slane %v3274_v4, 5  ;;  %v3823_v25 = vrot.slane %v6121_v55, 5 }
 0x1d1   : > { %v1377_v33 = vpop.f32.mrf.mxu2  ;;  %4630 = vmatmul.msk.bf16.gmra.mxu1 %vm675_vm4, %v2582_v43  ;;  %v6141_v9 = vadd.f32 %v2319_v39, %v1706_v41  ;;  %v3817_v43 = vsel %vm5402_vm7, %v4840_v14, %v3816_v0  ;;  %v3526_v39 = vpack.c.b16 %v3501_v24, %v3500_v26  ;;  %v2485_v41 = vsel %vm5402_vm7, %v2483_v20, %v2484_v58 }
 0x1d2   : > { %v1417_v60 = vadd.f32 %v1377_v33, %v1025_v38  ;;  %v3277_v4 = vor.u32 %v3276_v3, %v3273_v56  ;;  %v3287_v0 = vor.u32 %v3286_v6, %v6143_v11  ;;  %v3898_v34 = vunpack.c.l.b16 %v3817_v43  ;;  %v6167_v56 = vld [vmem:[%s5216_s19 + $0x7c] sm:$0xf] }
 0x1d3   : > { %v3899_v38 = vunpack.c.l.b16 %v3820_v16  ;;  %v2558_v33 = vunpack.c.l.b16 %v2482_v10  ;;  %v2559_v26 = vunpack.c.l.b16 %v2485_v41  ;;  %v3295_v3 = vshrl.u32 %v4777_v47, 16  ;;  %v5017_v10 = vld [vmem:[%s5216_s19 + $0x70] sm:$0xf] }
 0x1d4   : > { %v3278_v58 = vrot.slane %v3277_v4, 4  ;;  %v3288_v37 = vrot.slane %v3287_v0, 4  ;;  %v3298_v6 = vshll.u32 %v4777_v47, 16  ;;  %v2488_v41 = vrot.slane %v5017_v10, 5 }
 0x1d5   : > { %v2321_v63 = vpop.f32.mrf.mxu0  ;;  %v2583_v20 = vpack.c.b16 %v2559_v26, %v2558_v33  ;;  %v3825_v23 = vrot.slane %v3823_v25, 4 }
 0x1d6   : > { %v1667_v62 = vpop.f32.mrf.mxu3  ;;  %4743 = vmatmul.msk.bf16.gmra.mxu2 %vm675_vm4, %v4910_v61  ;;  %v1029_v35 = vpop.f32.mrf.mxu1  ;;  %v3924_v61 = vpack.c.b16 %v3899_v38, %v3898_v34  ;;  %v3283_v55 = vsel %vm5228_vm3, %v3278_v58, %v6143_v11  ;;  %v3308_v34 = vshrl.u32 %v6167_v56, 16  ;;  %v3297_v11 = vrot.slane %v3295_v3, 4  ;;  %v6191_v3 = vld [vmem:[%s5216_s19 + $0x80] sm:$0x1] }
 0x1d7   : > { %v1707_v27 = vadd.f32 %v1667_v62, %v1417_v60  ;;  %v4825_v60 = vld [vmem:[%s5216_s19 + $0x6c] sm:$0xe]  ;;  %v1030_v0 = vadd.f32 %v1029_v35, %v5628_v12  ;;  %v3300_v33 = vrot.slane %v3298_v6, 5  ;;  %v2490_v47 = vrot.slane %v2488_v41, 4 }
 0x1d8   : > { %v4841_v62 = vrot.slane %v4825_v60, 9  ;;  %v3502_v12 = vunpack.c.l.b16 %v3283_v55 }
 0x1d9   : > { %v1380_v14 = vpop.f32.mrf.mxu2  ;;  %v6164_v45 = vadd.f32 %v2321_v63, %v1707_v27  ;;  %v3293_v63 = vsel %vm5228_vm3, %v3288_v37, %v3292_v7  ;;  %v3826_v27 = vrot.slane %v6146_v28, 5  ;;  %v5018_v28 = vld [vmem:[%s5216_s19 + $0x74] sm:$0x1]  ;;  %v3301_v6 = vor.u32 %v3300_v33, %v3297_v11  ;;  %v4826_v33 = vld [vmem:[%s5216_s19 + $0x78] sm:$0xe] }
 0x1da   : > { %v1418_v24 = vadd.f32 %v1380_v14, %v1028_v49  ;;  %v3304_v49 = vshll.u32 %v6167_v56, 16  ;;  %v2491_v58 = vrot.slane %v5018_v28, 5  ;;  %v3503_v35 = vunpack.c.l.b16 %v3293_v63  ;;  %v6205_v28 = vld [vmem:[%s5216_s19 + $0x88] sm:$0xf] }
 0x1db   : > { %4808 = vmatmul.msk.bf16.gmra.mxu3 %vm675_vm4, %v3526_v39  ;;  %v4599_v39 = vld [vmem:[%s5216_s19 + $0x6c] sm:$0xe]  ;;  %v3824_v7 = vsel %vm5402_vm7, %v4841_v62, %v3823_v25  ;;  %v3827_v60 = vsel %vm5402_vm7, %v3825_v23, %v3826_v27  ;;  %v3314_v23 = vshll.u32 %v6191_v3, 16  ;;  %v3302_v11 = vrot.slane %v3301_v6, 4 }
 0x1dc   : > { %v4615_v14 = vrot.slane %v4599_v39, 9  ;;  %v2492_v25 = vsel %vm5402_vm7, %v2490_v47, %v2491_v58  ;;  %v3900_v55 = vunpack.c.l.b16 %v3824_v7  ;;  %v3901_v63 = vunpack.c.l.b16 %v3827_v60 }
 0x1dd   : > { %v2324_v48 = vpop.f32.mrf.mxu0 }
 0x1de   : > { %v1670_v43 = vpop.f32.mrf.mxu3  ;;  %v1032_v16 = vpop.f32.mrf.mxu1  ;;  %v2489_v10 = vsel %vm5402_vm7, %v4615_v14, %v2488_v41  ;;  %v4780_v41 = vld [vmem:[%s5216_s19 + $0x84] sm:$0xf]  ;;  %v3925_v14 = vpack.c.b16 %v3901_v63, %v3900_v55 }
 0x1df   : > { %v1708_v4 = vadd.f32 %v1670_v43, %v1418_v24  ;;  %v4911_v24 = vld [vmem:[%s5216_s19 + $0x6c] sm:$0xff]  ;;  %v1033_v27 = vadd.f32 %v1032_v16, %v5647_v59  ;;  %v3316_v59 = vrot.slane %v3314_v23, 5  ;;  %v4842_v16 = vrot.slane %v4826_v33, 9  ;;  %v4912_v33 = vld [vmem:[%s5216_s19 + $0x78] sm:$0xff] }
 0x1e0   : > { %4857 = vmatmul.msk.bf16.gmra.mxu0 %vm675_vm4, %v3924_v61  ;;  %v3306_v61 = vrot.slane %v3304_v49, 5  ;;  %v3319_v60 = vshrl.u32 %v4780_v41, 16 }
 0x1e1   : > { %v1382_v38 = vpop.f32.mrf.mxu2  ;;  %4631 = vmatmul.msk.bf16.gmra.mxu1 %vm675_vm4, %v2583_v20  ;;  %v6184_v37 = vadd.f32 %v2324_v48, %v1708_v4  ;;  %v3310_v20 = vrot.slane %v3308_v34, 4  ;;  %v3527_v4 = vpack.c.b16 %v3503_v35, %v3502_v12  ;;  %v2560_v34 = vunpack.c.l.b16 %v2489_v10 }
 0x1e2   : > { %v1419_v26 = vadd.f32 %v1382_v38, %v1030_v0  ;;  %v2561_v38 = vunpack.c.l.b16 %v2492_v25  ;;  %v3307_v7 = vsel %vm5228_vm3, %v3302_v11, %v3306_v61  ;;  %v3833_v10 = vrot.slane %v6191_v3, 5  ;;  %v4600_v25 = vld [vmem:[%s5216_s19 + $0x78] sm:$0xe] }
 0x1e3   : > { %v3311_v0 = vor.u32 %v3310_v20, %v3306_v61  ;;  %v3322_v20 = vshll.u32 %v4780_v41, 16  ;;  %v5020_v41 = vld [vmem:[%s5216_s19 + $0x80] sm:$0x1] }
 0x1e4   : > { %v2584_v35 = vpack.c.b16 %v2561_v38, %v2560_v34  ;;  %v3321_v34 = vrot.slane %v3319_v60, 4 }
 0x1e5   : > { %v2326_v43 = vpop.f32.mrf.mxu0  ;;  %v3312_v47 = vrot.slane %v3311_v0, 4  ;;  %v3504_v0 = vunpack.c.l.b16 %v3307_v7  ;;  %v3324_v38 = vrot.slane %v3322_v20, 5  ;;  %v4782_v7 = vld [vmem:[%s5216_s19 + $0x8c] sm:$0x1] }
 0x1e6   : > { %v1672_v39 = vpop.f32.mrf.mxu3  ;;  %4744 = vmatmul.msk.bf16.gmra.mxu2 %vm675_vm4, %v4911_v24  ;;  %v1034_v48 = vpop.f32.mrf.mxu1 }
 0x1e7   : > { %v1709_v62 = vadd.f32 %v1672_v39, %v1419_v26  ;;  %v3830_v26 = vrot.slane %v6167_v56, 5  ;;  %v5019_v56 = vld [vmem:[%s5216_s19 + $0x7c] sm:$0xf]  ;;  %v1035_v61 = vadd.f32 %v1034_v48, %v5664_v32 }
 0x1e9   : > { %v1385_v49 = vpop.f32.mrf.mxu2  ;;  %v6207_v58 = vadd.f32 %v2326_v43, %v1709_v62  ;;  %v3832_v63 = vrot.slane %v3830_v26, 4  ;;  %v3328_v43 = vshll.u32 %v6205_v28, 16  ;;  %v3332_v62 = vshrl.u32 %v6205_v28, 16 }
 0x1ea   : > { %v1420_v24 = vadd.f32 %v1385_v49, %v1033_v27  ;;  %v3317_v27 = vsel %vm5228_vm3, %v3312_v47, %v3316_v59  ;;  %v3831_v23 = vsel %vm5402_vm7, %v4842_v16, %v3830_v26  ;;  %v4616_v49 = vrot.slane %v4600_v25, 9 }
 0x1eb   : > { %4809 = vmatmul.msk.bf16.gmra.mxu3 %vm675_vm4, %v3527_v4  ;;  %v2495_v4 = vrot.slane %v5019_v56, 5  ;;  %v3505_v48 = vunpack.c.l.b16 %v3317_v27  ;;  %v3834_v47 = vsel %vm5402_vm7, %v3832_v63, %v3833_v10  ;;  %v6229_v59 = vrot.slane %v3328_v43, 5 }
 0x1ec   : > { %v3902_v16 = vunpack.c.l.b16 %v3831_v23  ;;  %v3903_v20 = vunpack.c.l.b16 %v3834_v47  ;;  %v3325_v25 = vor.u32 %v3324_v38, %v3321_v34  ;;  %v3338_v43 = vshll.u32 %v4782_v7, 16  ;;  %v6243_v47 = vld [vmem:[%s5216_s19 + $0x94] sm:$0xf] }
 0x1ed   : > { %v2329_v12 = vpop.f32.mrf.mxu0 }
 0x1ee   : > { %v1675_v6 = vpop.f32.mrf.mxu3  ;;  %v2652_v39 = vpop.f32.mrf.mxu1  ;;  %v3340_v38 = vrot.slane %v3338_v43, 5 }
 0x1ef   : > { %v1710_v55 = vadd.f32 %v1675_v6, %v1420_v24  ;;  %v2497_v24 = vrot.slane %v2495_v4, 4  ;;  %v2732_v27 = vadd.f32 %v2652_v39, %v5681_v46 }
 0x1f0   : > { %4858 = vmatmul.msk.bf16.gmra.mxu0 %vm675_vm4, %v3925_v14  ;;  %v2498_v14 = vrot.slane %v5020_v41, 5  ;;  %v3326_v41 = vrot.slane %v3325_v25, 4  ;;  %v3356_v25 = vshrl.u32 %v6243_v47, 16 }
 0x1f1   : > { %v1387_v3 = vpop.f32.mrf.mxu2  ;;  %4632 = vmatmul.msk.bf16.gmra.mxu1 %vm675_vm4, %v2584_v35  ;;  %v6225_v32 = vadd.f32 %v2329_v12, %v1710_v55  ;;  %v3334_v35 = vrot.slane %v3332_v62, 4  ;;  %v2496_v12 = vsel %vm5402_vm7, %v4616_v49, %v2495_v4  ;;  %v3528_v55 = vpack.c.b16 %v3505_v48, %v3504_v0  ;;  %v4827_v62 = vld [vmem:[%s5216_s19 + $0x84] sm:$0xe]  ;;  %v4783_v4 = vld [vmem:[%s5216_s19 + $0x90] sm:$0xf] }
 0x1f2   : > { %v1421_v11 = vadd.f32 %v1387_v3, %v1035_v61  ;;  %v2499_v10 = vsel %vm5402_vm7, %v2497_v24, %v2498_v14  ;;  %v3837_v61 = vrot.slane %v6205_v28, 5  ;;  %v2562_v23 = vunpack.c.l.b16 %v2496_v12  ;;  %v5021_v12 = vld [vmem:[%s5216_s19 + $0x88] sm:$0xf] }
 0x1f3   : > { %v3335_v63 = vor.u32 %v3334_v35, %v6229_v59  ;;  %v3926_v49 = vpack.c.b16 %v3903_v20, %v3902_v16  ;;  %v3840_v24 = vrot.slane %v4782_v7, 5  ;;  %v3343_v46 = vshrl.u32 %v4783_v4, 16  ;;  %v6257_v7 = vld [vmem:[%s6620_s2] ss:$0 sm:$0xff] }
 0x1f4   : > { %v3839_v28 = vrot.slane %v3837_v61, 4  ;;  %v3346_v35 = vshll.u32 %v4783_v4, 16  ;;  %v3352_v16 = vshll.u32 %v6243_v47, 16 }
 0x1f5   : > { %v2331_v26 = vpop.f32.mrf.mxu0  ;;  %v3336_v34 = vrot.slane %v3335_v63, 4 }
 0x1f6   : > { %v1677_v60 = vpop.f32.mrf.mxu3  ;;  %4745 = vmatmul.msk.bf16.gmra.mxu2 %vm675_vm4, %v4912_v33  ;;  %v2654_v6 = vpop.f32.mrf.mxu1  ;;  %v2563_v33 = vunpack.c.l.b16 %v2499_v10  ;;  %v2502_v10 = vrot.slane %v5021_v12, 5  ;;  %v6272_v4 = vrot.slane %v3352_v16, 5 }
 0x1f7   : > { %v1711_v56 = vadd.f32 %v1677_v60, %v1421_v11  ;;  %v4843_v11 = vrot.slane %v4827_v62, 9  ;;  %v3341_v63 = vsel %vm5228_vm3, %v3336_v34, %v3340_v38  ;;  %v3841_v62 = vsel %vm5402_vm7, %v3839_v28, %v3840_v24  ;;  %v5022_v34 = vld [vmem:[%s5216_s19 + $0x8c] sm:$0x1] }
 0x1f8   : > { %v2585_v48 = vpack.c.b16 %v2563_v33, %v2562_v23  ;;  %v2733_v23 = vadd.f32 %v2654_v6, %v5694_v42  ;;  %v2505_v38 = vrot.slane %v5022_v34, 5 }
 0x1f9   : > { %v2942_v3 = vpop.f32.mrf.mxu2  ;;  %v6247_v39 = vadd.f32 %v2331_v26, %v1711_v56  ;;  %v3331_v26 = vsel %vm5228_vm3, %v3326_v41, %v6229_v59  ;;  %v4601_v56 = vld [vmem:[%s5216_s19 + $0x84] sm:$0xe]  ;;  %v3838_v43 = vsel %vm5402_vm7, %v4843_v11, %v3837_v61  ;;  %v3348_v59 = vrot.slane %v3346_v35, 5 }
 0x1fa   : > { %v3022_v0 = vadd.f32 %v2942_v3, %v2732_v27  ;;  %v3345_v27 = vrot.slane %v3343_v46, 4  ;;  %v4617_v41 = vrot.slane %v4601_v56, 9  ;;  %v3358_v61 = vrot.slane %v3356_v25, 4 }
 0x1fb   : > { %4810 = vmatmul.msk.bf16.gmra.mxu3 %vm675_vm4, %v3528_v55  ;;  %v3506_v24 = vunpack.c.l.b16 %v3331_v26  ;;  %v3507_v46 = vunpack.c.l.b16 %v3341_v63  ;;  %v3904_v6 = vunpack.c.l.b16 %v3838_v43 }
 0x1fc   : > { %v3349_v25 = vor.u32 %v3348_v59, %v3345_v27 }
 0x1fd   : > { %v3994_v14 = vpop.f32.mrf.mxu0  ;;  %v3529_v56 = vpack.c.b16 %v3507_v46, %v3506_v24 }
 0x1fe   : > { %v3596_v60 = vpop.f32.mrf.mxu3  ;;  %v2657_v20 = vpop.f32.mrf.mxu1 }
 0x1ff   : > { %v3676_v55 = vadd.f32 %v3596_v60, %v3022_v0  ;;  %v2504_v0 = vrot.slane %v2502_v10, 4  ;;  %v2503_v60 = vsel %vm5402_vm7, %v4617_v41, %v2502_v10  ;;  %v6293_v10 = vld [vmem:[%s5216_s19 + $0xa0] sm:$0xf] }
 0x200   : > { %4859 = vmatmul.msk.bf16.gmra.mxu0 %vm675_vm4, %v3926_v49  ;;  %v4913_v49 = vld [vmem:[%s5216_s19 + $0x84] sm:$0xff]  ;;  %v3380_v24 = vshrl.u32 %v6293_v10, 16 }
 0x201   : > { %v4074_v3 = vadd.f32 %v3994_v14, %v3676_v55  ;;  %v2944_v33 = vpop.f32.mrf.mxu2  ;;  %4633 = vmatmul.msk.bf16.gmra.mxu1 %vm675_vm4, %v2585_v48  ;;  %v6278_v14 = vld [vmem:[%s5216_s19 + $0x98] sm:$0x1]  ;;  %v3905_v48 = vunpack.c.l.b16 %v3841_v62  ;;  %v2506_v12 = vsel %vm5402_vm7, %v2504_v0, %v2505_v38  ;;  %v3359_v55 = vor.u32 %v3358_v61, %v6272_v4  ;;  %v4828_v61 = vld [vmem:[%s5216_s19 + $0x90] sm:$0xe] }
 0x202   : > { %v3023_v28 = vadd.f32 %v2944_v33, %v2733_v23  ;;  %v3362_v63 = vshll.u32 %v6278_v14, 16  ;;  %v2734_v62 = vadd.f32 %v2657_v20, %v5707_v15  ;;  %v2564_v23 = vunpack.c.l.b16 %v2503_v60 }
 0x203   : > { %v4110_v11 = vadd.f32 %v6257_v7, %v4074_v3  ;;  %v2565_v33 = vunpack.c.l.b16 %v2506_v12  ;;  %v3927_v41 = vpack.c.b16 %v3905_v48, %v3904_v6  ;;  %v3350_v0 = vrot.slane %v3349_v25, 4  ;;  %v5023_v12 = vld [vmem:[%s5216_s19 + $0x94] sm:$0xf] }
 0x204   : > { %v3360_v27 = vrot.slane %v3359_v55, 4  ;;  %v3364_v38 = vrot.slane %v3362_v63, 5  ;;  %v3844_v15 = vrot.slane %v6243_v47, 5  ;;  %v3847_v60 = vrot.slane %v6278_v14, 5  ;;  %v4602_v63 = vld [vmem:[%s5216_s19 + $0x90] sm:$0xe] }
 0x205   : > { %4142 = vst [vmem:[%s6280_s9] sm:$0xff] %v4110_v11  ;;  %v3996_v42 = vpop.f32.mrf.mxu0  ;;  %v2509_v25 = vrot.slane %v5023_v12, 5  ;;  %v3355_v55 = vsel %vm5228_vm3, %v3350_v0, %v6272_v4  ;;  %v6316_v4 = vld [vmem:[%s5216_s19 + $0xa4] sm:$0x1]  ;;  %v4914_v0 = vld [vmem:[%s5216_s19 + $0x90] sm:$0xff] }
 0x206   : > { %v3598_v35 = vpop.f32.mrf.mxu3  ;;  %4746 = vmatmul.msk.bf16.gmra.mxu2 %vm675_vm4, %v4913_v49  ;;  %v2659_v16 = vpop.f32.mrf.mxu1  ;;  %v4786_v49 = vld [vmem:[%s5216_s19 + $0x9c] sm:$0xf] }
 0x207   : > { %v3677_v26 = vadd.f32 %v3598_v35, %v3023_v28  ;;  %v3367_v20 = vshrl.u32 %v4786_v49, 16  ;;  %v3370_v11 = vshll.u32 %v4786_v49, 16  ;;  %v3376_v28 = vshll.u32 %v6293_v10, 16 }
 0x208   : > { %v4844_v35 = vrot.slane %v4828_v61, 9 }
 0x209   : > { %v4075_v43 = vadd.f32 %v3996_v42, %v3677_v26  ;;  %v2947_v3 = vpop.f32.mrf.mxu2  ;;  %v2586_v42 = vpack.c.b16 %v2565_v33, %v2564_v23  ;;  %v3365_v26 = vsel %vm5228_vm3, %v3360_v27, %v3364_v38  ;;  %v6311_v14 = vrot.slane %v3376_v28, 5  ;;  %v5024_v38 = vld [vmem:[%s5216_s19 + $0x98] sm:$0x1] }
 0x20a   : > { %v3024_v34 = vadd.f32 %v2947_v3, %v2734_v62  ;;  %v3372_v62 = vrot.slane %v3370_v11, 5  ;;  %v3382_v3 = vrot.slane %v3380_v24, 4  ;;  %v2735_v33 = vadd.f32 %v2659_v16, %v5720_v13 }
 0x20b   : > { %v4111_v59 = vadd.f32 %v6257_v7, %v4075_v43  ;;  %4811 = vmatmul.msk.bf16.gmra.mxu3 %vm675_vm4, %v3529_v56  ;;  %v3846_v56 = vrot.slane %v3844_v15, 4  ;;  %v3369_v43 = vrot.slane %v3367_v20, 4  ;;  %v3508_v27 = vunpack.c.l.b16 %v3355_v55 }
 0x20c   : > { %v3509_v11 = vunpack.c.l.b16 %v3365_v26  ;;  %v3845_v28 = vsel %vm5402_vm7, %v4844_v35, %v3844_v15  ;;  %v3383_v24 = vor.u32 %v3382_v3, %v6311_v14 }
 0x20d   : > { %4143 = vst [vmem:[%s6280_s9 + $0x8] sm:$0xff] %v4111_v59  ;;  %v3999_v46 = vpop.f32.mrf.mxu0  ;;  %v4618_v59 = vrot.slane %v4602_v63, 9  ;;  %v3848_v13 = vsel %vm5402_vm7, %v3846_v56, %v3847_v60  ;;  %v3373_v16 = vor.u32 %v3372_v62, %v3369_v43  ;;  %v3906_v55 = vunpack.c.l.b16 %v3845_v28 }
 0x20e   : > { %v3601_v6 = vpop.f32.mrf.mxu3  ;;  %v2662_v48 = vpop.f32.mrf.mxu1  ;;  %v3530_v60 = vpack.c.b16 %v3509_v11, %v3508_v27  ;;  %v3907_v26 = vunpack.c.l.b16 %v3848_v13  ;;  %v3384_v63 = vrot.slane %v3383_v24, 4  ;;  %v3851_v62 = vrot.slane %v6293_v10, 5 }
 0x20f   : > { %v3678_v47 = vadd.f32 %v3601_v6, %v3024_v34  ;;  %v2511_v34 = vrot.slane %v2509_v25, 4  ;;  %v3374_v56 = vrot.slane %v3373_v16, 4  ;;  %v3854_v28 = vrot.slane %v6316_v4, 5 }
 0x210   : > { %4860 = vmatmul.msk.bf16.gmra.mxu0 %vm675_vm4, %v3927_v41  ;;  %v2512_v41 = vrot.slane %v5024_v38, 5  ;;  %v3928_v38 = vpack.c.b16 %v3907_v26, %v3906_v55  ;;  %v3853_v11 = vrot.slane %v3851_v62, 4 }
 0x211   : > { %v4076_v23 = vadd.f32 %v3999_v46, %v3678_v47  ;;  %v2949_v49 = vpop.f32.mrf.mxu2  ;;  %4634 = vmatmul.msk.bf16.gmra.mxu1 %vm675_vm4, %v2586_v42  ;;  %v3386_v46 = vshll.u32 %v6316_v4, 16  ;;  %v2510_v47 = vsel %vm5402_vm7, %v4618_v59, %v2509_v25  ;;  %v4789_v59 = vld [vmem:[%s5216_s19 + $0xa8] sm:$0xf]  ;;  %v3379_v10 = vsel %vm5228_vm3, %v3374_v56, %v6311_v14 }
 0x212   : > { %v3025_v20 = vadd.f32 %v2949_v49, %v2735_v33  ;;  %v2513_v15 = vsel %vm5402_vm7, %v2511_v34, %v2512_v41  ;;  %v2566_v25 = vunpack.c.l.b16 %v2510_v47  ;;  %v6345_v41 = vld [vmem:[%s5216_s19 + $0xac] sm:$0xf]  ;;  %v3391_v13 = vshrl.u32 %v4789_v59, 16  ;;  %v4603_v47 = vld [vmem:[%s5216_s19 + $0x9c] sm:$0xe] }
 0x213   : > { %v4112_v61 = vadd.f32 %v6257_v7, %v4076_v23  ;;  %v3388_v43 = vrot.slane %v3386_v46, 5  ;;  %v2736_v23 = vadd.f32 %v2662_v48, %v5733_v57  ;;  %v2567_v49 = vunpack.c.l.b16 %v2513_v15  ;;  %v5025_v46 = vld [vmem:[%s5216_s19 + $0xa0] sm:$0xf] }
 0x214   : > { %v3394_v14 = vshll.u32 %v4789_v59, 16  ;;  %v3400_v15 = vshll.u32 %v6345_v41, 16 }
 0x215   : > { %4144 = vst [vmem:[%s6280_s9 + $0x10] sm:$0xff] %v4112_v61  ;;  %v4001_v42 = vpop.f32.mrf.mxu0  ;;  %v3389_v57 = vsel %vm5228_vm3, %v3384_v63, %v3388_v43  ;;  %v3855_v43 = vsel %vm5402_vm7, %v3853_v11, %v3854_v28 }
 0x216   : > { %v3603_v6 = vpop.f32.mrf.mxu3  ;;  %4747 = vmatmul.msk.bf16.gmra.mxu2 %vm675_vm4, %v4914_v0  ;;  %v2664_v12 = vpop.f32.mrf.mxu1  ;;  %v4829_v0 = vld [vmem:[%s5216_s19 + $0x9c] sm:$0xe]  ;;  %v3511_v55 = vunpack.c.l.b16 %v3389_v57  ;;  %v3396_v59 = vrot.slane %v3394_v14, 5 }
 0x217   : > { %v3679_v35 = vadd.f32 %v3603_v6, %v3025_v20  ;;  %v4845_v48 = vrot.slane %v4829_v0, 9  ;;  %v2587_v20 = vpack.c.b16 %v2567_v49, %v2566_v25  ;;  %v2737_v56 = vadd.f32 %v2664_v12, %v5746_v54  ;;  %v5026_v49 = vld [vmem:[%s5216_s19 + $0xa4] sm:$0x1]  ;;  %v6366_v12 = vld [vmem:[%s5216_s19 + $0xb0] sm:$0x1] }
 0x218   : > { %v2519_v0 = vrot.slane %v5026_v49, 5  ;;  %v3410_v14 = vshll.u32 %v6366_v12, 16 }
 0x219   : > { %v4077_v3 = vadd.f32 %v4001_v42, %v3679_v35  ;;  %v2952_v33 = vpop.f32.mrf.mxu2  ;;  %v2516_v42 = vrot.slane %v5025_v46, 5  ;;  %v3404_v35 = vshrl.u32 %v6345_v41, 16  ;;  %v3852_v4 = vsel %vm5402_vm7, %v4845_v48, %v3851_v62 }
 0x21a   : > { %v3026_v27 = vadd.f32 %v2952_v33, %v2736_v23  ;;  %v4915_v23 = vld [vmem:[%s5216_s19 + $0x9c] sm:$0xff]  ;;  %v4619_v33 = vrot.slane %v4603_v47, 9  ;;  %v3909_v48 = vunpack.c.l.b16 %v3855_v43 }
 0x21b   : > { %v4113_v34 = vadd.f32 %v6257_v7, %v4077_v3  ;;  %4812 = vmatmul.msk.bf16.gmra.mxu3 %vm675_vm4, %v3530_v60  ;;  %v3510_v60 = vunpack.c.l.b16 %v3379_v10  ;;  %v3393_v3 = vrot.slane %v3391_v13, 4  ;;  %v2518_v25 = vrot.slane %v2516_v42, 4 }
 0x21c   : > { %v3406_v54 = vrot.slane %v3404_v35, 4  ;;  %v3908_v10 = vunpack.c.l.b16 %v3852_v4 }
 0x21d   : > { %4145 = vst [vmem:[%s6280_s9 + $0x18] sm:$0xff] %v4113_v34  ;;  %v4004_v61 = vpop.f32.mrf.mxu0  ;;  %v2520_v11 = vsel %vm5402_vm7, %v2518_v25, %v2519_v0  ;;  %v3397_v28 = vor.u32 %v3396_v59, %v3393_v3  ;;  %v3412_v3 = vrot.slane %v3410_v14, 5  ;;  %v3858_v59 = vrot.slane %v6345_v41, 5 }
 0x21e   : > { %v3606_v16 = vpop.f32.mrf.mxu3  ;;  %v2667_v24 = vpop.f32.mrf.mxu1  ;;  %v2569_v4 = vunpack.c.l.b16 %v2520_v11  ;;  %v4604_v11 = vld [vmem:[%s5216_s19 + $0xa8] sm:$0xe] }
 0x21f   : > { %v3680_v6 = vadd.f32 %v3606_v16, %v3026_v27  ;;  %v6363_v27 = vrot.slane %v3400_v15, 5  ;;  %v3531_v16 = vpack.c.b16 %v3511_v55, %v3510_v60  ;;  %v2738_v47 = vadd.f32 %v2667_v24, %v5758_v31 }
 0x220   : > { %4861 = vmatmul.msk.bf16.gmra.mxu0 %vm675_vm4, %v3928_v38 }
 0x221   : > { %v4078_v26 = vadd.f32 %v4004_v61, %v3680_v6  ;;  %v2954_v63 = vpop.f32.mrf.mxu2  ;;  %4635 = vmatmul.msk.bf16.gmra.mxu1 %vm675_vm4, %v2587_v20  ;;  %v2517_v20 = vsel %vm5402_vm7, %v4619_v33, %v2516_v42  ;;  %v3407_v46 = vor.u32 %v3406_v54, %v6363_v27  ;;  %v6379_v42 = vld [vmem:[%s5216_s19 + $0xb8] sm:$0xf]  ;;  %v5027_v54 = vld [vmem:[%s5216_s19 + $0xac] sm:$0xf] }
 0x222   : > { %v3027_v34 = vadd.f32 %v2954_v63, %v2737_v56  ;;  %v2568_v35 = vunpack.c.l.b16 %v2517_v20  ;;  %v3929_v56 = vpack.c.b16 %v3909_v48, %v3908_v10  ;;  %v3398_v63 = vrot.slane %v3397_v28, 4 }
 0x223   : > { %v4114_v62 = vadd.f32 %v6257_v7, %v4078_v26  ;;  %v4792_v26 = vld [vmem:[%s5216_s19 + $0xb4] sm:$0xf]  ;;  %v3408_v55 = vrot.slane %v3407_v46, 4  ;;  %v3424_v24 = vshll.u32 %v6379_v42, 16  ;;  %v3428_v25 = vshrl.u32 %v6379_v42, 16 }
 0x224   : > { %v3415_v33 = vshrl.u32 %v4792_v26, 16  ;;  %v3418_v31 = vshll.u32 %v4792_v26, 16  ;;  %v2588_v0 = vpack.c.b16 %v2569_v4, %v2568_v35  ;;  %v4916_v35 = vld [vmem:[%s5216_s19 + $0xa8] sm:$0xff]  ;;  %v4620_v4 = vrot.slane %v4604_v11, 9 }
 0x225   : > { %4146 = vst [vmem:[%s6280_s9 + $0x20] sm:$0xff] %v4114_v62  ;;  %v4006_v38 = vpop.f32.mrf.mxu0  ;;  %v3413_v48 = vsel %vm5228_vm3, %v3408_v55, %v3412_v3 }
 0x226   : > { %v3608_v57 = vpop.f32.mrf.mxu3  ;;  %4748 = vmatmul.msk.bf16.gmra.mxu2 %vm675_vm4, %v4915_v23  ;;  %v2669_v61 = vpop.f32.mrf.mxu1  ;;  %v4830_v23 = vld [vmem:[%s5216_s19 + $0xa8] sm:$0xe]  ;;  %v3417_v41 = vrot.slane %v3415_v33, 4  ;;  %v3420_v28 = vrot.slane %v3418_v31, 5  ;;  %v3513_v3 = vunpack.c.l.b16 %v3413_v48 }
 0x227   : > { %v3681_v13 = vadd.f32 %v3608_v57, %v3027_v34  ;;  %v3403_v57 = vsel %vm5228_vm3, %v3398_v63, %v6363_v27  ;;  %v4846_v20 = vrot.slane %v4830_v23, 9  ;;  %v2739_v14 = vadd.f32 %v2669_v61, %v5771_v44 }
 0x228   : > { %v3860_v27 = vrot.slane %v3858_v59, 4  ;;  %v3512_v55 = vunpack.c.l.b16 %v3403_v57  ;;  %v3421_v61 = vor.u32 %v3420_v28, %v3417_v41 }
 0x229   : > { %v4079_v6 = vadd.f32 %v4006_v38, %v3681_v13  ;;  %v2957_v15 = vpop.f32.mrf.mxu2  ;;  %v2523_v38 = vrot.slane %v5027_v54, 5  ;;  %v6396_v13 = vrot.slane %v3424_v24, 5  ;;  %v3859_v44 = vsel %vm5402_vm7, %v4846_v20, %v3858_v59 }
 0x22a   : > { %v3028_v60 = vadd.f32 %v2957_v15, %v2738_v47  ;;  %v3861_v47 = vrot.slane %v6366_v12, 5  ;;  %v6402_v15 = vld [vmem:[%s5216_s19 + $0xbc] sm:$0x1]  ;;  %v3910_v54 = vunpack.c.l.b16 %v3859_v44  ;;  %v3422_v57 = vrot.slane %v3421_v61, 4  ;;  %v4605_v61 = vld [vmem:[%s5216_s19 + $0xb4] sm:$0xe] }
 0x22b   : > { %v4115_v43 = vadd.f32 %v6257_v7, %v4079_v6  ;;  %4813 = vmatmul.msk.bf16.gmra.mxu3 %vm675_vm4, %v3531_v16  ;;  %v3430_v16 = vrot.slane %v3428_v25, 4  ;;  %v2525_v26 = vrot.slane %v2523_v38, 4  ;;  %v3434_v12 = vshll.u32 %v6402_v15, 16 }
 0x22c   : > { %v3862_v31 = vsel %vm5402_vm7, %v3860_v27, %v3861_v47  ;;  %v3865_v47 = vrot.slane %v6379_v42, 5 }
 0x22d   : > { %4147 = vst [vmem:[%s6280_s9 + $0x28] sm:$0xff] %v4115_v43  ;;  %v4009_v49 = vpop.f32.mrf.mxu0  ;;  %v3431_v23 = vor.u32 %v3430_v16, %v6396_v13  ;;  %v3436_v20 = vrot.slane %v3434_v12, 5 }
 0x22e   : > { %v3611_v62 = vpop.f32.mrf.mxu3  ;;  %v2672_v34 = vpop.f32.mrf.mxu1 }
 0x22f   : > { %v3682_v10 = vadd.f32 %v3611_v62, %v3028_v60  ;;  %v3532_v62 = vpack.c.b16 %v3513_v3, %v3512_v55  ;;  %v3432_v48 = vrot.slane %v3431_v23, 4  ;;  %v2740_v41 = vadd.f32 %v2672_v34, %v5785_v30  ;;  %v5029_v55 = vld [vmem:[%s5216_s19 + $0xb8] sm:$0xf] }
 0x230   : > { %4862 = vmatmul.msk.bf16.gmra.mxu0 %vm675_vm4, %v3929_v56  ;;  %v5028_v56 = vld [vmem:[%s5216_s19 + $0xb0] sm:$0x1]  ;;  %v3427_v34 = vsel %vm5228_vm3, %v3422_v57, %v6396_v13  ;;  %v2530_v3 = vrot.slane %v5029_v55, 5  ;;  %v4621_v57 = vrot.slane %v4605_v61, 9 }
 0x231   : > { %v4080_v46 = vadd.f32 %v4009_v49, %v3682_v10  ;;  %v2959_v6 = vpop.f32.mrf.mxu2  ;;  %4636 = vmatmul.msk.bf16.gmra.mxu1 %vm675_vm4, %v2588_v0  ;;  %v2526_v63 = vrot.slane %v5028_v56, 5  ;;  %v2524_v49 = vsel %vm5402_vm7, %v4620_v4, %v2523_v38  ;;  %v3911_v10 = vunpack.c.l.b16 %v3862_v31  ;;  %v4795_v38 = vld [vmem:[%s5216_s19 + $0xc0] sm:$0xf]  ;;  %v4831_v56 = vld [vmem:[%s5216_s19 + $0xb4] sm:$0xe] }
 0x232   : > { %v3029_v60 = vadd.f32 %v2959_v6, %v2739_v14  ;;  %v2570_v16 = vunpack.c.l.b16 %v2524_v49  ;;  %v3442_v44 = vshll.u32 %v4795_v38, 16  ;;  %v3514_v13 = vunpack.c.l.b16 %v3427_v34 }
 0x233   : > { %v4116_v43 = vadd.f32 %v6257_v7, %v4080_v46  ;;  %v2527_v0 = vsel %vm5402_vm7, %v2525_v26, %v2526_v63  ;;  %v3930_v27 = vpack.c.b16 %v3911_v10, %v3910_v54  ;;  %v3437_v26 = vsel %vm5228_vm3, %v3432_v48, %v3436_v20  ;;  %v4917_v10 = vld [vmem:[%s5216_s19 + $0xb4] sm:$0xff]  ;;  %v5030_v20 = vld [vmem:[%s5216_s19 + $0xbc] sm:$0x1] }
 0x234   : > { %v2571_v46 = vunpack.c.l.b16 %v2527_v0  ;;  %v3439_v63 = vshrl.u32 %v4795_v38, 16  ;;  %v4847_v31 = vrot.slane %v4831_v56, 9  ;;  %v2532_v48 = vrot.slane %v2530_v3, 4 }
 0x235   : > { %4148 = vst [vmem:[%s6280_s9 + $0x30] sm:$0xff] %v4116_v43  ;;  %v4011_v33 = vpop.f32.mrf.mxu0 }
 0x236   : > { %v3613_v24 = vpop.f32.mrf.mxu3  ;;  %4749 = vmatmul.msk.bf16.gmra.mxu2 %vm675_vm4, %v4916_v35  ;;  %v2674_v25 = vpop.f32.mrf.mxu1  ;;  %v6425_v35 = vld [vmem:[%s5216_s19 + $0xc4] sm:$0xf]  ;;  %v2589_v30 = vpack.c.b16 %v2571_v46, %v2570_v16  ;;  %v3441_v54 = vrot.slane %v3439_v63, 4 }
 0x237   : > { %v3683_v59 = vadd.f32 %v3613_v24, %v3029_v60  ;;  %v3448_v23 = vshll.u32 %v6425_v35, 16  ;;  %v3452_v12 = vshrl.u32 %v6425_v35, 16  ;;  %v3867_v24 = vrot.slane %v3865_v47, 4 }
 0x238   : > { %v2741_v0 = vadd.f32 %v2674_v25, %v5798_v51  ;;  %v3866_v25 = vsel %vm5402_vm7, %v4847_v31, %v3865_v47 }
 0x239   : > { %v4081_v11 = vadd.f32 %v4011_v33, %v3683_v59  ;;  %v2962_v28 = vpop.f32.mrf.mxu2  ;;  %v3515_v33 = vunpack.c.l.b16 %v3437_v26  ;;  %v3450_v46 = vrot.slane %v3448_v23, 5  ;;  %v3454_v38 = vrot.slane %v3452_v12, 4 }
 0x23a   : > { %v3030_v6 = vadd.f32 %v2962_v28, %v2740_v41  ;;  %v3444_v41 = vrot.slane %v3442_v44, 5 }
 0x23b   : > { %v4117_v14 = vadd.f32 %v6257_v7, %v4081_v11  ;;  %4814 = vmatmul.msk.bf16.gmra.mxu3 %vm675_vm4, %v3532_v62  ;;  %v3868_v62 = vrot.slane %v6402_v15, 5  ;;  %v2533_v11 = vrot.slane %v5030_v20, 5  ;;  %v3533_v56 = vpack.c.b16 %v3515_v33, %v3514_v13 }
 0x23c   : > { %v3445_v34 = vor.u32 %v3444_v41, %v3441_v54  ;;  %v3455_v63 = vor.u32 %v3454_v38, %v3450_v46  ;;  %v6467_v54 = vld [vmem:[%s5216_s19 + $0xd0] sm:$0xf]  ;;  %v4606_v38 = vld [vmem:[%s5216_s19 + $0xc0] sm:$0xe] }
 0x23d   : > { %4149 = vst [vmem:[%s6280_s9 + $0x38] sm:$0xff] %v4117_v14  ;;  %v4014_v4 = vpop.f32.mrf.mxu0  ;;  %v6446_v14 = vld [vmem:[%s5216_s19 + $0xc8] sm:$0x1]  ;;  %v3869_v15 = vsel %vm5402_vm7, %v3867_v24, %v3868_v62  ;;  %v4798_v62 = vld [vmem:[%s5216_s19 + $0xcc] sm:$0xf] }
 0x23e   : > { %v3616_v43 = vpop.f32.mrf.mxu3  ;;  %v2677_v60 = vpop.f32.mrf.mxu1  ;;  %v3458_v47 = vshll.u32 %v6446_v14, 16  ;;  %v3913_v55 = vunpack.c.l.b16 %v3869_v15  ;;  %v3446_v12 = vrot.slane %v3445_v34, 4  ;;  %v3456_v33 = vrot.slane %v3455_v63, 4 }
 0x23f   : > { %v3684_v42 = vadd.f32 %v3616_v43, %v3030_v6  ;;  %v3912_v43 = vunpack.c.l.b16 %v3866_v25  ;;  %v3472_v25 = vshll.u32 %v6467_v54, 16  ;;  %v3476_v15 = vshrl.u32 %v6467_v54, 16 }
 0x240   : > { %4863 = vmatmul.msk.bf16.gmra.mxu0 %vm675_vm4, %v3930_v27  ;;  %v3460_v24 = vrot.slane %v3458_v47, 5  ;;  %v3451_v41 = vsel %vm5228_vm3, %v3446_v12, %v3450_v46  ;;  %v4622_v47 = vrot.slane %v4606_v38, 9 }
 0x241   : > { %v4082_v49 = vadd.f32 %v4014_v4, %v3684_v42  ;;  %v2964_v59 = vpop.f32.mrf.mxu2  ;;  %4637 = vmatmul.msk.bf16.gmra.mxu1 %vm675_vm4, %v2589_v30  ;;  %v2531_v4 = vsel %vm5402_vm7, %v4621_v57, %v2530_v3  ;;  %v2534_v30 = vsel %vm5402_vm7, %v2532_v48, %v2533_v11  ;;  %v2742_v42 = vadd.f32 %v2677_v60, %v5814_v1  ;;  %v5031_v48 = vld [vmem:[%s5216_s19 + $0xc4] sm:$0xf] }
 0x242   : > { %v3031_v16 = vadd.f32 %v2964_v59, %v2741_v0  ;;  %v2572_v3 = vunpack.c.l.b16 %v2531_v4  ;;  %v2573_v23 = vunpack.c.l.b16 %v2534_v30  ;;  %v4832_v0 = vld [vmem:[%s5216_s19 + $0xc0] sm:$0xe]  ;;  %v3872_v60 = vrot.slane %v6425_v35, 5 }
 0x243   : > { %v4118_v28 = vadd.f32 %v6257_v7, %v4082_v49  ;;  %v3931_v49 = vpack.c.b16 %v3913_v55, %v3912_v43  ;;  %v2537_v20 = vrot.slane %v5031_v48, 5  ;;  %v3463_v35 = vshrl.u32 %v4798_v62, 16  ;;  %v6631_v4 = vld [vmem:[#allocation5_spill] sm:$0xff]  ;;  %v5032_v55 = vld [vmem:[%s5216_s19 + $0xc8] sm:$0x1] }
 0x244   : > { %v2590_v1 = vpack.c.b16 %v2573_v23, %v2572_v3  ;;  %v3874_v46 = vrot.slane %v3872_v60, 4  ;;  %v3516_v63 = vunpack.c.l.b16 %v3451_v41 }
 0x245   : > { %4150 = vst [vmem:[%s6280_s9 + $0x40] sm:$0xff] %v4118_v28  ;;  %v4016_v51 = vpop.f32.mrf.mxu0  ;;  %v3461_v28 = vsel %vm5228_vm3, %v3456_v33, %v3460_v24  ;;  %v2539_v43 = vrot.slane %v2537_v20, 4  ;;  %v3465_v23 = vrot.slane %v3463_v35, 4  ;;  %v4800_v24 = vld [vmem:[%s5216_s19 + $0xd4] sm:$0x1] }
 0x246   : > { %v3618_v6 = vpop.f32.mrf.mxu3  ;;  %4750 = vmatmul.msk.bf16.gmra.mxu2 %vm675_vm4, %v4917_v10  ;;  %v2679_v27 = vpop.f32.mrf.mxu1  ;;  %v3517_v3 = vunpack.c.l.b16 %v3461_v28  ;;  %v3482_v28 = vshll.u32 %v4800_v24, 16 }
 0x247   : > { %v3685_v26 = vadd.f32 %v3618_v6, %v3031_v16  ;;  %v4848_v16 = vrot.slane %v4832_v0, 9  ;;  %v2743_v30 = vadd.f32 %v2679_v27, %v6631_v4 }
 0x249   : > { %v4083_v44 = vadd.f32 %v4016_v51, %v3685_v26  ;;  %v2967_v61 = vpop.f32.mrf.mxu2  ;;  %v3466_v51 = vshll.u32 %v4798_v62, 16  ;;  %v3875_v26 = vrot.slane %v6446_v14, 5  ;;  %v3873_v27 = vsel %vm5402_vm7, %v4848_v16, %v3872_v60 }
 0x24a   : > { %v3032_v13 = vadd.f32 %v2967_v61, %v2742_v42  ;;  %v3534_v62 = vpack.c.b16 %v3517_v3, %v3516_v63  ;;  %v3879_v63 = vrot.slane %v6467_v54, 5 }
 0x24b   : > { %v4119_v31 = vadd.f32 %v6257_v7, %v4083_v44  ;;  %4815 = vmatmul.msk.bf16.gmra.mxu3 %vm675_vm4, %v3533_v56  ;;  %v4918_v56 = vld [vmem:[%s5216_s19 + $0xc0] sm:$0xff]  ;;  %v2540_v44 = vrot.slane %v5032_v55, 5  ;;  %v3468_v12 = vrot.slane %v3466_v51, 5  ;;  %v3876_v33 = vsel %vm5402_vm7, %v3874_v46, %v3875_v26 }
 0x24c   : > { %v3915_v48 = vunpack.c.l.b16 %v3876_v33  ;;  %v3881_v54 = vrot.slane %v3879_v63, 4 }
 0x24d   : > { %4151 = vst [vmem:[%s6280_s9 + $0x48] sm:$0xff] %v4119_v31  ;;  %v4019_v59 = vpop.f32.mrf.mxu0  ;;  %v3474_v31 = vrot.slane %v3472_v25, 5 }
 0x24e   : > { %v3621_v10 = vpop.f32.mrf.mxu3  ;;  %v2682_v57 = vpop.f32.mrf.mxu1 }
 0x24f   : > { %v3686_v11 = vadd.f32 %v3621_v10, %v3032_v13  ;;  %v3478_v13 = vrot.slane %v3476_v15, 4  ;;  %v3914_v10 = vunpack.c.l.b16 %v3873_v27  ;;  %v2744_v38 = vadd.f32 %v2682_v57, %v5850_v52 }
 0x250   : > { %4864 = vmatmul.msk.bf16.gmra.mxu0 %vm675_vm4, %v3931_v49  ;;  %v3882_v27 = vrot.slane %v4800_v24, 5 }
 0x251   : > { %v4084_v6 = vadd.f32 %v4019_v59, %v3686_v11  ;;  %v2969_v34 = vpop.f32.mrf.mxu2  ;;  %4638 = vmatmul.msk.bf16.gmra.mxu1 %vm675_vm4, %v2590_v1  ;;  %v2538_v59 = vsel %vm5402_vm7, %v4622_v47, %v2537_v20  ;;  %v2541_v1 = vsel %vm5402_vm7, %v2539_v43, %v2540_v44  ;;  %v3469_v11 = vor.u32 %v3468_v12, %v3465_v23  ;;  %v4919_v23 = vld [vmem:[%s5216_s19 + $0xcc] sm:$0xff] }
 0x252   : > { %v3033_v61 = vadd.f32 %v2969_v34, %v2743_v30  ;;  %v3479_v41 = vor.u32 %v3478_v13, %v3474_v31  ;;  %v2574_v51 = vunpack.c.l.b16 %v2538_v59  ;;  %v2575_v25 = vunpack.c.l.b16 %v2541_v1 }
 0x253   : > { %v4120_v42 = vadd.f32 %v6257_v7, %v4084_v6  ;;  %v3932_v6 = vpack.c.b16 %v3915_v48, %v3914_v10  ;;  %v3470_v4 = vrot.slane %v3469_v11, 4  ;;  %v3484_v34 = vrot.slane %v3482_v28, 5 }
 0x254   : > { %v3480_v30 = vrot.slane %v3479_v41, 4  ;;  %v2591_v26 = vpack.c.b16 %v2575_v25, %v2574_v51  ;;  %v6632_v25 = vld [vmem:[#allocation6_spill] sm:$0xff] }
 0x255   : > { %4152 = vst [vmem:[%s6280_s9 + $0x50] sm:$0xff] %v4120_v42  ;;  %v4021_v14 = vpop.f32.mrf.mxu0  ;;  %v3475_v43 = vsel %vm5228_vm3, %v3470_v4, %v3474_v31 }
 0x256   : > { %v3623_v49 = vpop.f32.mrf.mxu3  ;;  %4751 = vmatmul.msk.bf16.gmra.mxu2 %vm675_vm4, %v4918_v56  ;;  %v2684_v0 = vpop.f32.mrf.mxu1  ;;  %v4833_v56 = vld [vmem:[%s5216_s19 + $0xcc] sm:$0xe]  ;;  %v3485_v55 = vsel %vm5228_vm3, %v3480_v30, %v3484_v34 }
 0x257   : > { %v3687_v60 = vadd.f32 %v3623_v49, %v3033_v61  ;;  %v4849_v44 = vrot.slane %v4833_v56, 9  ;;  %v2745_v61 = vadd.f32 %v2684_v0, %v5870_v21  ;;  %v3519_v33 = vunpack.c.l.b16 %v3485_v55 }
 0x258   : > { %v3883_v21 = vsel %vm5402_vm7, %v3881_v54, %v3882_v27 }
 0x259   : > { %v4085_v16 = vadd.f32 %v4021_v14, %v3687_v60  ;;  %v2972_v35 = vpop.f32.mrf.mxu2  ;;  %v3518_v14 = vunpack.c.l.b16 %v3475_v43  ;;  %v3880_v36 = vsel %vm5402_vm7, %v4849_v44, %v3879_v63  ;;  %v3917_v60 = vunpack.c.l.b16 %v3883_v21 }
 0x25a   : > { %v3034_v15 = vadd.f32 %v2972_v35, %v2744_v38  ;;  %v3916_v1 = vunpack.c.l.b16 %v3880_v36 }
 0x25b   : > { %v4121_v20 = vadd.f32 %v6257_v7, %v4085_v16  ;;  %4816 = vmatmul.msk.bf16.gmra.mxu3 %vm675_vm4, %v3534_v62  ;;  %v3535_v59 = vpack.c.b16 %v3519_v33, %v3518_v14 }
 0x25c   : > { %v3933_v41 = vpack.c.b16 %v3917_v60, %v3916_v1 }
 0x25d   : > { %4153 = vst [vmem:[%s6280_s9 + $0x58] sm:$0xff] %v4121_v20  ;;  %v4024_v46 = vpop.f32.mrf.mxu0 }
 0x25e   : > { %v3626_v52 = vpop.f32.mrf.mxu3  ;;  %v2687_v57 = vpop.f32.mrf.mxu1 }
 0x25f   : > { %v3688_v47 = vadd.f32 %v3626_v52, %v3034_v15  ;;  %v2746_v10 = vadd.f32 %v2687_v57, %v5889_v29 }
 0x260   : > { %4865 = vmatmul.msk.bf16.gmra.mxu0 %vm675_vm4, %v3932_v6 }
 0x261   : > { %v4086_v42 = vadd.f32 %v4024_v46, %v3688_v47  ;;  %v2974_v3 = vpop.f32.mrf.mxu2  ;;  %4639 = vmatmul.msk.bf16.gmra.mxu1 %vm675_vm4, %v2591_v26 }
 0x262   : > { %v3035_v13 = vadd.f32 %v2974_v3, %v2745_v61 }
 0x263   : > { %v4122_v12 = vadd.f32 %v6257_v7, %v4086_v42 }
 0x265   : > { %4154 = vst [vmem:[%s6280_s9 + $0x60] sm:$0xff] %v4122_v12  ;;  %v4026_v31 = vpop.f32.mrf.mxu0 }
 0x266   : > { %v3628_v49 = vpop.f32.mrf.mxu3  ;;  %4752 = vmatmul.msk.bf16.gmra.mxu2 %vm675_vm4, %v4919_v23  ;;  %v2689_v0 = vpop.f32.mrf.mxu1 }
 0x267   : > { %v3689_v24 = vadd.f32 %v3628_v49, %v3035_v13  ;;  %v2747_v20 = vadd.f32 %v2689_v0, %v6632_v25 }
 0x269   : > { %v4087_v62 = vadd.f32 %v4026_v31, %v3689_v24  ;;  %v2977_v48 = vpop.f32.mrf.mxu2 }
 0x26a   : > { %v3036_v18 = vadd.f32 %v2977_v48, %v2746_v10 }
 0x26b   : > { %v4123_v11 = vadd.f32 %v6257_v7, %v4087_v62  ;;  %4817 = vmatmul.msk.bf16.gmra.mxu3 %vm675_vm4, %v3535_v59 }
 0x26d   : > { %4155 = vst [vmem:[%s6280_s9 + $0x68] sm:$0xff] %v4123_v11  ;;  %v4029_v28 = vpop.f32.mrf.mxu0 }
 0x26e   : > { %v3631_v16 = vpop.f32.mrf.mxu3  ;;  %v2692_v38 = vpop.f32.mrf.mxu1 }
 0x26f   : > { %v3690_v35 = vadd.f32 %v3631_v16, %v3036_v18  ;;  %v2748_v56 = vadd.f32 %v2692_v38, %v5932_v5 }
 0x270   : > { %4866 = vmatmul.msk.bf16.gmra.mxu0 %vm675_vm4, %v3933_v41 }
 0x271   : > { %v4088_v51 = vadd.f32 %v4029_v28, %v3690_v35  ;;  %v2979_v29 = vpop.f32.mrf.mxu2 }
 0x272   : > { %v3037_v6 = vadd.f32 %v2979_v29, %v2747_v20 }
 0x273   : > { %v4124_v15 = vadd.f32 %v6257_v7, %v4088_v51 }
 0x275   : > { %4156 = vst [vmem:[%s6280_s9 + $0x70] sm:$0xff] %v4124_v15  ;;  %v4031_v4 = vpop.f32.mrf.mxu0 }
 0x276   : > { %v3633_v30 = vpop.f32.mrf.mxu3  ;;  %v2694_v34 = vpop.f32.mrf.mxu1 }
 0x277   : > { %v3691_v46 = vadd.f32 %v3633_v30, %v3037_v6  ;;  %v2749_v61 = vadd.f32 %v2694_v34, %v5956_v22 }
 0x279   : > { %v4089_v26 = vadd.f32 %v4031_v4, %v3691_v46  ;;  %v2982_v63 = vpop.f32.mrf.mxu2 }
 0x27a   : > { %v3038_v57 = vadd.f32 %v2982_v63, %v2748_v56 }
 0x27b   : > { %v4125_v52 = vadd.f32 %v6257_v7, %v4089_v26 }
 0x27d   : > { %4157 = vst [vmem:[%s6280_s9 + $0x78] sm:$0xff] %v4125_v52  ;;  %v4034_v47 = vpop.f32.mrf.mxu0 }
 0x27e   : > { %v3636_v43 = vpop.f32.mrf.mxu3  ;;  %v2697_v55 = vpop.f32.mrf.mxu1 }
 0x27f   : > { %v3692_v44 = vadd.f32 %v3636_v43, %v3038_v57  ;;  %v2750_v33 = vadd.f32 %v2697_v55, %v5975_v19 }
 0x281   : > { %v4090_v42 = vadd.f32 %v4034_v47, %v3692_v44  ;;  %v2984_v3 = vpop.f32.mrf.mxu2 }
 0x282   : > { %v3039_v27 = vadd.f32 %v2984_v3, %v2749_v61  ;;  %v6633_v61 = vld [vmem:[#allocation7_spill] sm:$0xff] }
 0x283   : > { %v4126_v54 = vadd.f32 %v6257_v7, %v4090_v42 }
 0x285   : > { %4158 = vst [vmem:[%s6280_s9 + $0x80] sm:$0xff] %v4126_v54  ;;  %v4036_v23 = vpop.f32.mrf.mxu0 }
 0x286   : > { %v3638_v5 = vpop.f32.mrf.mxu3  ;;  %v2699_v12 = vpop.f32.mrf.mxu1 }
 0x287   : > { %v3693_v13 = vadd.f32 %v3638_v5, %v3039_v27  ;;  %v2751_v1 = vadd.f32 %v2699_v12, %v5999_v53  ;;  %v6549_v27 = vld [vmem:[%s6620_s2] ss:$0 sm:$0xff] }
 0x289   : > { %v4091_v14 = vadd.f32 %v4036_v23, %v3693_v13  ;;  %v2987_v31 = vpop.f32.mrf.mxu2 }
 0x28a   : > { %v3040_v21 = vadd.f32 %v2987_v31, %v2750_v33 }
 0x28b   : > { %v4127_v36 = vadd.f32 %v6257_v7, %v4091_v14 }
 0x28d   : > { %4159 = vst [vmem:[%s6280_s9 + $0x88] sm:$0xff] %v4127_v36  ;;  %v4039_v49 = vpop.f32.mrf.mxu0 }
 0x28e   : > { %v3641_v22 = vpop.f32.mrf.mxu3  ;;  %v2702_v0 = vpop.f32.mrf.mxu1 }
 0x28f   : > { %v3694_v24 = vadd.f32 %v3641_v22, %v3040_v21  ;;  %v2752_v28 = vadd.f32 %v2702_v0, %v6018_v2 }
 0x291   : > { %v4092_v59 = vadd.f32 %v4039_v49, %v3694_v24  ;;  %v2989_v60 = vpop.f32.mrf.mxu2 }
 0x292   : > { %v3041_v10 = vadd.f32 %v2989_v60, %v2751_v1 }
 0x293   : > { %v4128_v62 = vadd.f32 %v6257_v7, %v4092_v59 }
 0x295   : > { %4160 = vst [vmem:[%s6280_s9 + $0x90] sm:$0xff] %v4128_v62  ;;  %v4041_v48 = vpop.f32.mrf.mxu0 }
 0x296   : > { %v3643_v19 = vpop.f32.mrf.mxu3  ;;  %v2704_v11 = vpop.f32.mrf.mxu1 }
 0x297   : > { %v3695_v18 = vadd.f32 %v3643_v19, %v3041_v10  ;;  %v2753_v15 = vadd.f32 %v2704_v11, %v6042_v40 }
 0x299   : > { %v4093_v41 = vadd.f32 %v4041_v48, %v3695_v18  ;;  %v2992_v16 = vpop.f32.mrf.mxu2 }
 0x29a   : > { %v3042_v35 = vadd.f32 %v2992_v16, %v2752_v28 }
 0x29b   : > { %v4129_v38 = vadd.f32 %v6257_v7, %v4093_v41 }
 0x29d   : > { %4161 = vst [vmem:[%s6280_s9 + $0x98] sm:$0xff] %v4129_v38  ;;  %v4044_v51 = vpop.f32.mrf.mxu0 }
 0x29e   : > { %v3646_v53 = vpop.f32.mrf.mxu3  ;;  %v2707_v25 = vpop.f32.mrf.mxu1 }
 0x29f   : > { %v3696_v20 = vadd.f32 %v3646_v53, %v3042_v35  ;;  %v2754_v63 = vadd.f32 %v2707_v25, %v6061_v8 }
 0x2a1   : > { %v4094_v29 = vadd.f32 %v4044_v51, %v3696_v20  ;;  %v2994_v6 = vpop.f32.mrf.mxu2 }
 0x2a2   : > { %v3043_v30 = vadd.f32 %v2994_v6, %v2753_v15 }
 0x2a3   : > { %v4130_v4 = vadd.f32 %v6257_v7, %v4094_v29 }
 0x2a5   : > { %4162 = vst [vmem:[%s6280_s9 + $0xa0] sm:$0xff] %v4130_v4  ;;  %v4046_v34 = vpop.f32.mrf.mxu0 }
 0x2a6   : > { %v3648_v2 = vpop.f32.mrf.mxu3  ;;  %v2709_v46 = vpop.f32.mrf.mxu1 }
 0x2a7   : > { %v3697_v26 = vadd.f32 %v3648_v2, %v3043_v30  ;;  %v2755_v3 = vadd.f32 %v2709_v46, %v6633_v61 }
 0x2a9   : > { %v4095_v56 = vadd.f32 %v4046_v34, %v3697_v26  ;;  %v2997_v52 = vpop.f32.mrf.mxu2 }
 0x2aa   : > { %v3044_v47 = vadd.f32 %v2997_v52, %v2754_v63 }
 0x2ab   : > { %v4131_v57 = vadd.f32 %v6257_v7, %v4095_v56 }
 0x2ad   : > { %4163 = vst [vmem:[%s6280_s9 + $0xa8] sm:$0xff] %v4131_v57  ;;  %v4049_v43 = vpop.f32.mrf.mxu0 }
 0x2ae   : > { %v3651_v40 = vpop.f32.mrf.mxu3  ;;  %v2712_v55 = vpop.f32.mrf.mxu1 }
 0x2af   : > { %v3698_v44 = vadd.f32 %v3651_v40, %v3044_v47  ;;  %v2756_v33 = vadd.f32 %v2712_v55, %v6102_v17 }
 0x2b1   : > { %v4096_v42 = vadd.f32 %v4049_v43, %v3698_v44  ;;  %v2999_v54 = vpop.f32.mrf.mxu2 }
 0x2b2   : > { %v3045_v23 = vadd.f32 %v2999_v54, %v2755_v3 }
 0x2b3   : > { %v4132_v8 = vadd.f32 %v6549_v27, %v4096_v42 }
 0x2b5   : > { %4164 = vst [vmem:[%s6280_s9 + $0xb0] sm:$0xff] %v4132_v8  ;;  %v4051_v7 = vpop.f32.mrf.mxu0 }
 0x2b6   : > { %v3653_v5 = vpop.f32.mrf.mxu3  ;;  %v2714_v12 = vpop.f32.mrf.mxu1 }
 0x2b7   : > { %v3699_v13 = vadd.f32 %v3653_v5, %v3045_v23  ;;  %v2757_v1 = vadd.f32 %v2714_v12, %v6123_v50 }
 0x2b9   : > { %v4097_v14 = vadd.f32 %v4051_v7, %v3699_v13  ;;  %v3002_v31 = vpop.f32.mrf.mxu2 }
 0x2ba   : > { %v3046_v21 = vadd.f32 %v3002_v31, %v2756_v33 }
 0x2bb   : > { %v4133_v36 = vadd.f32 %v6549_v27, %v4097_v14 }
 0x2bd   : > { %4165 = vst [vmem:[%s6280_s9 + $0xb8] sm:$0xff] %v4133_v36  ;;  %v4054_v49 = vpop.f32.mrf.mxu0 }
 0x2be   : > { %v3656_v22 = vpop.f32.mrf.mxu3  ;;  %v2717_v0 = vpop.f32.mrf.mxu1 }
 0x2bf   : > { %v3700_v24 = vadd.f32 %v3656_v22, %v3046_v21  ;;  %v2758_v41 = vadd.f32 %v2717_v0, %v6141_v9 }
 0x2c1   : > { %v4098_v59 = vadd.f32 %v4054_v49, %v3700_v24  ;;  %v3004_v60 = vpop.f32.mrf.mxu2 }
 0x2c2   : > { %v3047_v10 = vadd.f32 %v3004_v60, %v2757_v1 }
 0x2c3   : > { %v4134_v62 = vadd.f32 %v6549_v27, %v4098_v59 }
 0x2c5   : > { %4166 = vst [vmem:[%s6280_s9 + $0xc0] sm:$0xff] %v4134_v62  ;;  %v4056_v48 = vpop.f32.mrf.mxu0 }
 0x2c6   : > { %v3658_v17 = vpop.f32.mrf.mxu3  ;;  %v2719_v19 = vpop.f32.mrf.mxu1 }
 0x2c7   : > { %v3701_v11 = vadd.f32 %v3658_v17, %v3047_v10  ;;  %v2759_v20 = vadd.f32 %v2719_v19, %v6164_v45 }
 0x2c9   : > { %v4099_v18 = vadd.f32 %v4056_v48, %v3701_v11  ;;  %v3007_v28 = vpop.f32.mrf.mxu2 }
 0x2ca   : > { %v3048_v38 = vadd.f32 %v3007_v28, %v2758_v41 }
 0x2cb   : > { %v4135_v16 = vadd.f32 %v6549_v27, %v4099_v18 }
 0x2cd   : > { %4167 = vst [vmem:[%s6280_s9 + $0xc8] sm:$0xff] %v4135_v16  ;;  %v4059_v35 = vpop.f32.mrf.mxu0 }
 0x2ce   : > { %v3661_v50 = vpop.f32.mrf.mxu3  ;;  %v2722_v53 = vpop.f32.mrf.mxu1 }
 0x2cf   : > { %v3702_v51 = vadd.f32 %v3661_v50, %v3048_v38  ;;  %v2760_v2 = vadd.f32 %v2722_v53, %v6184_v37 }
 0x2d1   : > { %v4100_v25 = vadd.f32 %v4059_v35, %v3702_v51  ;;  %v3009_v29 = vpop.f32.mrf.mxu2 }
 0x2d2   : > { %v3049_v6 = vadd.f32 %v3009_v29, %v2759_v20 }
 0x2d3   : > { %v4136_v15 = vadd.f32 %v6549_v27, %v4100_v25 }
 0x2d5   : > { %4168 = vst [vmem:[%s6280_s9 + $0xd0] sm:$0xff] %v4136_v15  ;;  %v4061_v4 = vpop.f32.mrf.mxu0 }
 0x2d6   : > { %v3663_v9 = vpop.f32.mrf.mxu3  ;;  %v2724_v26 = vpop.f32.mrf.mxu1 }
 0x2d7   : > { %v3703_v30 = vadd.f32 %v3663_v9, %v3049_v6  ;;  %v2761_v43 = vadd.f32 %v2724_v26, %v6207_v58 }
 0x2d9   : > { %v4101_v34 = vadd.f32 %v4061_v4, %v3703_v30  ;;  %v3012_v46 = vpop.f32.mrf.mxu2 }
 0x2da   : > { %v3050_v63 = vadd.f32 %v3012_v46, %v2760_v2 }
 0x2db   : > { %v4137_v56 = vadd.f32 %v6549_v27, %v4101_v34 }
 0x2dd   : > { %4169 = vst [vmem:[%s6280_s9 + $0xd8] sm:$0xff] %v4137_v56  ;;  %v4064_v52 = vpop.f32.mrf.mxu0 }
 0x2de   : > { %v3666_v45 = vpop.f32.mrf.mxu3  ;;  %v2727_v42 = vpop.f32.mrf.mxu1 }
 0x2df   : > { %v3704_v57 = vadd.f32 %v3666_v45, %v3050_v63  ;;  %v2762_v8 = vadd.f32 %v2727_v42, %v6225_v32 }
 0x2e1   : > { %v4102_v47 = vadd.f32 %v4064_v52, %v3704_v57  ;;  %v3014_v40 = vpop.f32.mrf.mxu2 }
 0x2e2   : > { %v3051_v44 = vadd.f32 %v3014_v40, %v2761_v43 }
 0x2e3   : > { %v4138_v55 = vadd.f32 %v6549_v27, %v4102_v47 }
 0x2e5   : > { %4170 = vst [vmem:[%s6280_s9 + $0xe0] sm:$0xff] %v4138_v55  ;;  %v4066_v37 = vpop.f32.mrf.mxu0 }
 0x2e6   : > { %v3668_v61 = vpop.f32.mrf.mxu3  ;;  %v2729_v58 = vpop.f32.mrf.mxu1 }
 0x2e7   : > { %v3705_v3 = vadd.f32 %v3668_v61, %v3051_v44  ;;  %v2763_v31 = vadd.f32 %v2729_v58, %v6247_v39 }
 0x2e9   : > { %v4103_v54 = vadd.f32 %v4066_v37, %v3705_v3  ;;  %v3017_v23 = vpop.f32.mrf.mxu2 }
 0x2ea   : > { %v3052_v5 = vadd.f32 %v3017_v23, %v2762_v8 }
 0x2eb   : > { %v4139_v7 = vadd.f32 %v6549_v27, %v4103_v54 }
 0x2ed   : > { %4171 = vst [vmem:[%s6280_s9 + $0xe8] sm:$0xff] %v4139_v7  ;;  %v4069_v12 = vpop.f32.mrf.mxu0 }
 0x2ee   : > { %v3671_v13 = vpop.f32.mrf.mxu3 }
 0x2ef   : > { %v3706_v14 = vadd.f32 %v3671_v13, %v3052_v5 }
 0x2f1   : > { %v4104_v33 = vadd.f32 %v4069_v12, %v3706_v14  ;;  %v3019_v36 = vpop.f32.mrf.mxu2 }
 0x2f2   : > { %v3053_v21 = vadd.f32 %v3019_v36, %v2763_v31 }
 0x2f3   : > { %v4140_v32 = vadd.f32 %v6549_v27, %v4104_v33 }
 0x2f5   : > { %4172 = vst [vmem:[%s6280_s9 + $0xf0] sm:$0xff] %v4140_v32  ;;  %v4071_v0 = vpop.f32.mrf.mxu0 }
 0x2f6   : > { %v3673_v49 = vpop.f32.mrf.mxu3 }
 0x2f7   : > { %v3707_v22 = vadd.f32 %v3673_v49, %v3053_v21 }
 0x2f9   : > { %v4105_v24 = vadd.f32 %v4071_v0, %v3707_v22 }
 0x2fb   : > { %v4141_v39 = vadd.f32 %v6549_v27, %v4105_v24 }
 0x2fd   : > { %4173 = vst [vmem:[%s6280_s9 + $0xf8] sm:$0xff] %v4141_v39 }
 0x2fe   : > { %5061 = shalt.err (!%p5058_p5)
}
 0x2ff   : > { %s5114_s5 = smov 128   ;;  %s5115_s9 = smov 8  }
 0x300   : > { %4925 = dma.vmem_to_hbm [thread:$0]  (%p5176_p4), %s4191_s26, 4096, %s4193_s27, %s4175_s15, %s5114_s5, %s5114_s5, %s5115_s9  }
 0x301 PF: > { %p4931_p6 = scmp.ge.s32.totalorder %s5112_s17, 2  ;;  %s4207_s10 = sand.u32 1, %s5092_s12  }
 0x302   : > { %s4208_s11 = scalar_lea.sflag [#allocation3], %s4207_s10 }
 0x303   : > { %p4928_p7 = pnand %p4931_p6, %p5183_p8 }
 0x305   : > { %p4929_p9 = pneg %p4928_p7 }
 0x307   : > { %5087 = dma.done.wait (%p4929_p9), %s4208_s11, 4096  }
 0x308   : > { %5089 = vsyncadd (%p4929_p9), %s4208_s11, 4294963200  ;;  %s16_s17 = sadd.s32 1, %s5112_s17   ;;  %s6634_s12 = smov %s5096_s13 }
 0x309   : > { %p13_p10 = scmp.ge.s32.totalorder %s16_s17, 4   ;;  %s6635_s13 = smov %s5100_s14 }
 0x30a   : > { %s6636_s14 = smov %s5189_s25  ;;  %s6637_s15 = smov %s5108_s16 }
 0x30b   : > { %s6638_s16 = smov %s6640_s20  ;;  %15 = sbr.rel (!%p13_p10) target bundleno = 4 (0x4), region = 78 }
 0x310   :  { %4214 = vsyncpa [#allocation3], 1 }
 0x311   :  { %4216 = vsyncpa [#allocation3 + $0x1], 1 }

</bundles_post_ra>
